<compile_context>
chip_gen: v7x
topology: tpu7x:2x2x1
jax: 0.10.0
libtpu: 0.0.40
codegen_flags: <defaults>
</compile_context>

<pallas_src>
import functools

import numpy as np

import jax
import jax.numpy as jnp
from jax.experimental import pallas as pl
from jax.experimental.pallas import tpu as pltpu


def _conv_out(h, k, s, p):
    return (h + 2 * p - k) // s + 1


# ----------------------------- Pallas kernel --------------------------------

def _gather_patches(x, s_ref, mo):
    """im2col of a VMEM-resident activation via one gather matmul.

    x:     (Mi, Cin)      activation, rows = (image, spatial) flattened.
    s_ref: (taps*Mo, Mi)  constant 0/1 gather matrix (all-zero rows = padding).
    Returns (Mo, taps*Cin) lane-dense patches, tap-major / channel-minor, so
    the following weight matmul has K = taps*Cin and tap accumulation stays
    inside the MXU.
    """
    taps = s_ref.shape[0] // mo
    z = jnp.dot(s_ref[...], x, preferred_element_type=jnp.float32)   # (taps*Mo, Cin)
    # Static, sublane-aligned row slices (mo is a multiple of 8) -> lane concat.
    return jnp.concatenate([z[t * mo:(t + 1) * mo, :] for t in range(taps)],
                           axis=1)


def _conv(x, s_ref, w_ref, b_ref, mo):
    """Conv as: gather matmul -> lane-dense patches -> ONE K=taps*Cin matmul."""
    patches = _gather_patches(x, s_ref, mo)
    return jnp.dot(patches, w_ref[...], preferred_element_type=jnp.float32) + b_ref[...]


def _encoder_kernel(*refs, num_res_layers):
    (a1_ref, w1_ref, b1_ref,
     s2_ref, w2_ref, b2_ref,
     s3_ref, w3_ref, b3_ref) = refs[:9]
    res_refs = refs[9:9 + 4 * num_res_layers]
    o_ref = refs[-1]
    mo = o_ref.shape[0]          # rows of every post-conv2 activation (= nb*H2*W2)

    # conv1 (4x4 / s2): input already im2col'd in the wrapper -> one matmul.
    h = jnp.dot(a1_ref[0], w1_ref[...], preferred_element_type=jnp.float32)
    h = jnp.maximum(h + b1_ref[...], 0.0)                       # (nb*M1, hidden//2)

    # conv2 (4x4 / s2) + ReLU
    h = jnp.maximum(_conv(h, s2_ref, w2_ref, b2_ref, mo), 0.0)  # (mo, hidden)

    # conv3 (3x3 / s1)
    x = _conv(h, s3_ref, w3_ref, b3_ref, mo)                    # (mo, hidden)

    # ResidualStack: x = x + Conv1x1(ReLU(Conv3x3(ReLU(x)))), then final ReLU.
    for l in range(num_res_layers):
        wa_ref, ba_ref, wb_ref, bb_ref = res_refs[4 * l: 4 * l + 4]
        r = jnp.maximum(x, 0.0)                                  # ReLU once, pre-gather
        r = jnp.maximum(_conv(r, s3_ref, wa_ref, ba_ref, mo), 0.0)
        r = jnp.dot(r, wb_ref[...], preferred_element_type=jnp.float32) + bb_ref[...]
        x = x + r
    x = jnp.maximum(x, 0.0)                                      # final F.relu

    o_ref[...] = x.astype(o_ref.dtype)


# ------------------------------ JAX glue -------------------------------------

def _im2col_input(x, kh, kw, stride, pad):
    """NHWC -> (N, Ho*Wo, kh*kw*C) patches; feature order = (kh, kw, Cin)."""
    N, H, W, C = x.shape
    Ho, Wo = _conv_out(H, kh, stride, pad), _conv_out(W, kw, stride, pad)
    xp = jnp.pad(x, ((0, 0), (pad, pad), (pad, pad), (0, 0)))
    cols = []
    for i in range(kh):
        for j in range(kw):
            cols.append(xp[:, i:i + stride * Ho:stride, j:j + stride * Wo:stride, :])
    patches = jnp.concatenate(cols, axis=-1)                 # (N, Ho, Wo, kh*kw*C)
    return patches.reshape(N, Ho * Wo, kh * kw * C), Ho, Wo


def _stacked_gather(H, W, kh, kw, stride, pad, nb):
    """Constant 0/1 gather matrix, block-diagonal over the nb images folded
    into the row dimension.  S[(t*nb + b)*Mo + m, b*Mi + r*W + c] = 1 iff
    output position m of image b reads input (r, c) at tap t; all-zero rows
    implement the conv zero-padding."""
    Ho, Wo = _conv_out(H, kh, stride, pad), _conv_out(W, kw, stride, pad)
    mo_img, mi_img = Ho * Wo, H * W
    S = np.zeros((kh * kw * nb * mo_img, nb * mi_img), np.float32)
    for ki in range(kh):
        for kj in range(kw):
            t = ki * kw + kj
            for ho in range(Ho):
                for wo in range(Wo):
                    r, c = stride * ho - pad + ki, stride * wo - pad + kj
                    if 0 <= r < H and 0 <= c < W:
                        for b in range(nb):
                            S[(t * nb + b) * mo_img + ho * Wo + wo,
                              b * mi_img + r * W + c] = 1.0
    return jnp.asarray(S), Ho, Wo


# --------------------------- Encoder forward ----------------------------------

def init_params(key, in_channels, hidden, res_hidden, num_res_layers):
    def conv_init(k, kh, kw, cin, cout):
        kw_, kb_ = jax.random.split(k)
        scale = 1.0 / jnp.sqrt(kh * kw * cin)
        w = jax.random.normal(kw_, (kh, kw, cin, cout), jnp.float32) * scale
        b = jax.random.normal(kb_, (cout,), jnp.float32) * 0.01
        return w, b

    keys = jax.random.split(key, 3 + 2 * num_res_layers)
    p = {}
    p['c1_w'], p['c1_b'] = conv_init(keys[0], 4, 4, in_channels, hidden // 2)
    p['c2_w'], p['c2_b'] = conv_init(keys[1], 4, 4, hidden // 2, hidden)
    p['c3_w'], p['c3_b'] = conv_init(keys[2], 3, 3, hidden, hidden)
    for l in range(num_res_layers):
        p[f'r{l}_w1'], p[f'r{l}_b1'] = conv_init(keys[3 + 2 * l], 3, 3, hidden, res_hidden)
        p[f'r{l}_w2'], p[f'r{l}_b2'] = conv_init(keys[4 + 2 * l], 1, 1, res_hidden, hidden)
    return p


@functools.partial(jax.jit, static_argnums=(2,))
def encoder_forward(params, x_nchw, num_res_layers):
    x = jnp.transpose(x_nchw, (0, 2, 3, 1)).astype(jnp.float32)     # NCHW -> NHWC
    N, H, W, Cin = x.shape
    half = params['c1_w'].shape[-1]
    hidden = params['c2_w'].shape[-1]

    # Fold the whole (small) batch into matmul rows.  Keep a 2-way "parallel"
    # grid only when each block still gets >= 2 images, so v7x's two
    # TensorCores split the work; for tiny batches grid=(1,) avoids all
    # per-step overhead on single-TC chips (v5e/v6e).
    num_blocks = 2 if (N % 2 == 0 and N >= 4) else 1
    nb = N // num_blocks

    # Only the raw input is im2col'd outside the kernel (it is read once anyway).
    a1, H1, W1 = _im2col_input(x, 4, 4, 2, 1)                       # (N, M1, K1)
    M1, K1 = a1.shape[1], a1.shape[2]
    a1 = a1.reshape(num_blocks, nb * M1, K1)

    s2, H2, W2 = _stacked_gather(H1, W1, 4, 4, 2, 1, nb)            # conv2 gather
    s3, _, _ = _stacked_gather(H2, W2, 3, 3, 1, 1, nb)              # shared 3x3 gather
    mo = nb * H2 * W2                                               # rows per block

    def wmat(w):                                                    # HWIO -> (kh*kw*Cin, Cout)
        kh, kw, ci, co = w.shape
        return w.reshape(kh * kw * ci, co)

    args = [a1,
            wmat(params['c1_w']), params['c1_b'].reshape(1, half),
            s2, wmat(params['c2_w']), params['c2_b'].reshape(1, hidden),
            s3, wmat(params['c3_w']), params['c3_b'].reshape(1, hidden)]
    for l in range(num_res_layers):
        rh = params[f'r{l}_w1'].shape[-1]
        args += [wmat(params[f'r{l}_w1']), params[f'r{l}_b1'].reshape(1, rh),
                 wmat(params[f'r{l}_w2']), params[f'r{l}_b2'].reshape(1, hidden)]

    # Weights / biases / gathers: full-extent constant-index blocks (fetched
    # once; with grid=(1,) there is no re-fetch to avoid anyway).
    def const_spec(a):
        nd = a.ndim
        return pl.BlockSpec(a.shape, lambda n, _nd=nd: (0,) * _nd)

    in_specs = [pl.BlockSpec((1, nb * M1, K1), lambda n: (n, 0, 0))]
    in_specs += [const_spec(a) for a in args[1:]]
    out_specs = pl.BlockSpec((mo, hidden), lambda n: (n, 0))

    out = pl.pallas_call(
        functools.partial(_encoder_kernel, num_res_layers=num_res_layers),
        out_shape=jax.ShapeDtypeStruct((num_blocks * mo, hidden), jnp.float32),
        grid=(num_blocks,),
        in_specs=in_specs,
        out_specs=out_specs,
        compiler_params=pltpu.CompilerParams(
            dimension_semantics=("parallel",)),     # 2 TCs on v7x when blocks=2
    )(*args)

    out = out.reshape(N, H2, W2, hidden)
    return jnp.transpose(out, (0, 3, 1, 2))                         # NHWC -> NCHW


# --------------------------- Pure-JAX reference --------------------------------

def _ref_conv(x, w, b, stride, pad):
    y = jax.lax.conv_general_dilated(
        x, w, window_strides=(stride, stride),
        padding=[(pad, pad), (pad, pad)],
        dimension_numbers=('NHWC', 'HWIO', 'NHWC'))
    return y + b


def encoder_ref(params, x_nchw, num_res_layers):
    x = jnp.transpose(x_nchw, (0, 2, 3, 1)).astype(jnp.float32)
    x = jax.nn.relu(_ref_conv(x, params['c1_w'], params['c1_b'], 2, 1))
    x = jax.nn.relu(_ref_conv(x, params['c2_w'], params['c2_b'], 2, 1))
    x = _ref_conv(x, params['c3_w'], params['c3_b'], 1, 1)
    for l in range(num_res_layers):
        h = jax.nn.relu(x)
        h = jax.nn.relu(_ref_conv(h, params[f'r{l}_w1'], params[f'r{l}_b1'], 1, 1))
        h = _ref_conv(h, params[f'r{l}_w2'], params[f'r{l}_b2'], 1, 0)
        x = x + h
    x = jax.nn.relu(x)
    return jnp.transpose(x, (0, 3, 1, 2))


# ----------------------------------- main --------------------------------------

if __name__ == "__main__":
    in_channels = 4
    hidden_channels = 32
    res_hidden_channels = 16
    num_res_layers = 2

    key = jax.random.PRNGKey(0)
    k_x, k_p = jax.random.split(key)
    x = jax.random.normal(k_x, (2, in_channels, 16, 16), jnp.float32)   # NCHW
    params = init_params(k_p, in_channels, hidden_channels,
                         res_hidden_channels, num_res_layers)

    out = jax.block_until_ready(encoder_forward(params, x, num_res_layers))
    ref = jax.block_until_ready(encoder_ref(params, x, num_res_layers))

    assert out.shape == ref.shape == (2, hidden_channels, 4, 4), out.shape
    assert bool(jnp.isfinite(out).all())
    assert bool(jnp.allclose(out, ref, atol=1e-2, rtol=1e-2))

    print("KERNEL_OK")
</pallas_src>

<mosaic_0001>
module attributes {stable_mosaic.version = 11 : i64} {
  func.func @_encoder_kernel(%arg0: i32, %arg1: memref<1x128x64xf32, #tpu.memory_space<vmem>>, %arg2: memref<64x16xf32, #tpu.memory_space<vmem>>, %arg3: memref<1x16xf32, #tpu.memory_space<vmem>>, %arg4: memref<512x128xf32, #tpu.memory_space<vmem>>, %arg5: memref<256x32xf32, #tpu.memory_space<vmem>>, %arg6: memref<1x32xf32, #tpu.memory_space<vmem>>, %arg7: memref<288x32xf32, #tpu.memory_space<vmem>>, %arg8: memref<288x32xf32, #tpu.memory_space<vmem>>, %arg9: memref<1x32xf32, #tpu.memory_space<vmem>>, %arg10: memref<288x16xf32, #tpu.memory_space<vmem>>, %arg11: memref<1x16xf32, #tpu.memory_space<vmem>>, %arg12: memref<16x32xf32, #tpu.memory_space<vmem>>, %arg13: memref<1x32xf32, #tpu.memory_space<vmem>>, %arg14: memref<288x16xf32, #tpu.memory_space<vmem>>, %arg15: memref<1x16xf32, #tpu.memory_space<vmem>>, %arg16: memref<16x32xf32, #tpu.memory_space<vmem>>, %arg17: memref<1x32xf32, #tpu.memory_space<vmem>>, %arg18: memref<32x32xf32, #tpu.memory_space<vmem>>) attributes {dimension_semantics = [#tpu.dimension_semantics<parallel>], iteration_bounds = array<i64: 1>, scalar_prefetch = 0 : i64, scratch_operands = 0 : i64, tpu.core_type = #tpu.core_type<tc>, window_params = [{transform_indices = @transform_0, window_bounds = array<i64: 1, 128, 64>}, {pipeline_mode = #tpu.pipeline_mode<synchronous>, transform_indices = @transform_1, window_bounds = array<i64: 64, 16>}, {pipeline_mode = #tpu.pipeline_mode<synchronous>, transform_indices = @transform_2, window_bounds = array<i64: 1, 16>}, {pipeline_mode = #tpu.pipeline_mode<synchronous>, transform_indices = @transform_3, window_bounds = array<i64: 512, 128>}, {pipeline_mode = #tpu.pipeline_mode<synchronous>, transform_indices = @transform_4, window_bounds = array<i64: 256, 32>}, {pipeline_mode = #tpu.pipeline_mode<synchronous>, transform_indices = @transform_5, window_bounds = array<i64: 1, 32>}, {pipeline_mode = #tpu.pipeline_mode<synchronous>, transform_indices = @transform_6, window_bounds = array<i64: 288, 32>}, {pipeline_mode = #tpu.pipeline_mode<synchronous>, transform_indices = @transform_7, window_bounds = array<i64: 288, 32>}, {pipeline_mode = #tpu.pipeline_mode<synchronous>, transform_indices = @transform_8, window_bounds = array<i64: 1, 32>}, {pipeline_mode = #tpu.pipeline_mode<synchronous>, transform_indices = @transform_9, window_bounds = array<i64: 288, 16>}, {pipeline_mode = #tpu.pipeline_mode<synchronous>, transform_indices = @transform_10, window_bounds = array<i64: 1, 16>}, {pipeline_mode = #tpu.pipeline_mode<synchronous>, transform_indices = @transform_11, window_bounds = array<i64: 16, 32>}, {pipeline_mode = #tpu.pipeline_mode<synchronous>, transform_indices = @transform_12, window_bounds = array<i64: 1, 32>}, {pipeline_mode = #tpu.pipeline_mode<synchronous>, transform_indices = @transform_13, window_bounds = array<i64: 288, 16>}, {pipeline_mode = #tpu.pipeline_mode<synchronous>, transform_indices = @transform_14, window_bounds = array<i64: 1, 16>}, {pipeline_mode = #tpu.pipeline_mode<synchronous>, transform_indices = @transform_15, window_bounds = array<i64: 16, 32>}, {pipeline_mode = #tpu.pipeline_mode<synchronous>, transform_indices = @transform_16, window_bounds = array<i64: 1, 32>}, {transform_indices = @transform_17, window_bounds = array<i64: 32, 32>}]} {
    %c0 = arith.constant 0 : index
    %c0_0 = arith.constant 0 : index
    %c0_1 = arith.constant 0 : index
    %0 = vector.load %arg1[%c0, %c0_0, %c0_1] : memref<1x128x64xf32, #tpu.memory_space<vmem>>, vector<1x128x64xf32>
    %1 = vector.shape_cast %0 : vector<1x128x64xf32> to vector<128x64xf32>
    %c0_2 = arith.constant 0 : index
    %c0_3 = arith.constant 0 : index
    %2 = vector.load %arg2[%c0_2, %c0_3] : memref<64x16xf32, #tpu.memory_space<vmem>>, vector<64x16xf32>
    %cst = arith.constant dense<0.000000e+00> : vector<128x16xf32>
    %3 = tpu.matmul %1, %2, %cst {dimension_numbers = #tpu.dot_dimension_numbers<[1], [0], [0], [1], [0, 0, 1, 1], [], []>} : vector<128x64xf32>, vector<64x16xf32>, vector<128x16xf32> -> vector<128x16xf32>
    %c0_4 = arith.constant 0 : index
    %c0_5 = arith.constant 0 : index
    %4 = vector.load %arg3[%c0_4, %c0_5] : memref<1x16xf32, #tpu.memory_space<vmem>>, vector<1x16xf32>
    %5 = vector.broadcast %4 : vector<1x16xf32> to vector<128x16xf32>
    %6 = arith.addf %3, %5 : vector<128x16xf32>
    %cst_6 = arith.constant 0.000000e+00 : f32
    %7 = vector.broadcast %cst_6 : f32 to vector<128x16xf32>
    %8 = arith.maximumf %6, %7 : vector<128x16xf32>
    %c0_7 = arith.constant 0 : index
    %c0_8 = arith.constant 0 : index
    %9 = vector.load %arg4[%c0_7, %c0_8] : memref<512x128xf32, #tpu.memory_space<vmem>>, vector<512x128xf32>
    %cst_9 = arith.constant dense<0.000000e+00> : vector<512x16xf32>
    %10 = tpu.matmul %9, %8, %cst_9 {dimension_numbers = #tpu.dot_dimension_numbers<[1], [0], [0], [1], [0, 0, 1, 1], [], []>} : vector<512x128xf32>, vector<128x16xf32>, vector<512x16xf32> -> vector<512x16xf32>
    %11 = vector.extract_strided_slice %10 {offsets = [0, 0], sizes = [32, 16], strides = [1, 1]} : vector<512x16xf32> to vector<32x16xf32>
    %12 = vector.extract_strided_slice %10 {offsets = [32, 0], sizes = [32, 16], strides = [1, 1]} : vector<512x16xf32> to vector<32x16xf32>
    %13 = vector.extract_strided_slice %10 {offsets = [64, 0], sizes = [32, 16], strides = [1, 1]} : vector<512x16xf32> to vector<32x16xf32>
    %14 = vector.extract_strided_slice %10 {offsets = [96, 0], sizes = [32, 16], strides = [1, 1]} : vector<512x16xf32> to vector<32x16xf32>
    %15 = vector.extract_strided_slice %10 {offsets = [128, 0], sizes = [32, 16], strides = [1, 1]} : vector<512x16xf32> to vector<32x16xf32>
    %16 = vector.extract_strided_slice %10 {offsets = [160, 0], sizes = [32, 16], strides = [1, 1]} : vector<512x16xf32> to vector<32x16xf32>
    %17 = vector.extract_strided_slice %10 {offsets = [192, 0], sizes = [32, 16], strides = [1, 1]} : vector<512x16xf32> to vector<32x16xf32>
    %18 = vector.extract_strided_slice %10 {offsets = [224, 0], sizes = [32, 16], strides = [1, 1]} : vector<512x16xf32> to vector<32x16xf32>
    %19 = vector.extract_strided_slice %10 {offsets = [256, 0], sizes = [32, 16], strides = [1, 1]} : vector<512x16xf32> to vector<32x16xf32>
    %20 = vector.extract_strided_slice %10 {offsets = [288, 0], sizes = [32, 16], strides = [1, 1]} : vector<512x16xf32> to vector<32x16xf32>
    %21 = vector.extract_strided_slice %10 {offsets = [320, 0], sizes = [32, 16], strides = [1, 1]} : vector<512x16xf32> to vector<32x16xf32>
    %22 = vector.extract_strided_slice %10 {offsets = [352, 0], sizes = [32, 16], strides = [1, 1]} : vector<512x16xf32> to vector<32x16xf32>
    %23 = vector.extract_strided_slice %10 {offsets = [384, 0], sizes = [32, 16], strides = [1, 1]} : vector<512x16xf32> to vector<32x16xf32>
    %24 = vector.extract_strided_slice %10 {offsets = [416, 0], sizes = [32, 16], strides = [1, 1]} : vector<512x16xf32> to vector<32x16xf32>
    %25 = vector.extract_strided_slice %10 {offsets = [448, 0], sizes = [32, 16], strides = [1, 1]} : vector<512x16xf32> to vector<32x16xf32>
    %26 = vector.extract_strided_slice %10 {offsets = [480, 0], sizes = [32, 16], strides = [1, 1]} : vector<512x16xf32> to vector<32x16xf32>
    %27 = tpu.concatenate %11, %12, %13, %14, %15, %16, %17, %18, %19, %20, %21, %22, %23, %24, %25, %26 in 1 : vector<32x16xf32>, vector<32x16xf32>, vector<32x16xf32>, vector<32x16xf32>, vector<32x16xf32>, vector<32x16xf32>, vector<32x16xf32>, vector<32x16xf32>, vector<32x16xf32>, vector<32x16xf32>, vector<32x16xf32>, vector<32x16xf32>, vector<32x16xf32>, vector<32x16xf32>, vector<32x16xf32>, vector<32x16xf32> -> vector<32x256xf32>
    %c0_10 = arith.constant 0 : index
    %c0_11 = arith.constant 0 : index
    %28 = vector.load %arg5[%c0_10, %c0_11] : memref<256x32xf32, #tpu.memory_space<vmem>>, vector<256x32xf32>
    %cst_12 = arith.constant dense<0.000000e+00> : vector<32x32xf32>
    %29 = tpu.matmul %27, %28, %cst_12 {dimension_numbers = #tpu.dot_dimension_numbers<[1], [0], [0], [1], [0, 0, 1, 1], [], []>} : vector<32x256xf32>, vector<256x32xf32>, vector<32x32xf32> -> vector<32x32xf32>
    %c0_13 = arith.constant 0 : index
    %c0_14 = arith.constant 0 : index
    %30 = vector.load %arg6[%c0_13, %c0_14] : memref<1x32xf32, #tpu.memory_space<vmem>>, vector<1x32xf32>
    %31 = vector.broadcast %30 : vector<1x32xf32> to vector<32x32xf32>
    %32 = arith.addf %29, %31 : vector<32x32xf32>
    %cst_15 = arith.constant 0.000000e+00 : f32
    %33 = vector.broadcast %cst_15 : f32 to vector<32x32xf32>
    %34 = arith.maximumf %32, %33 : vector<32x32xf32>
    %c0_16 = arith.constant 0 : index
    %c0_17 = arith.constant 0 : index
    %35 = vector.load %arg7[%c0_16, %c0_17] : memref<288x32xf32, #tpu.memory_space<vmem>>, vector<288x32xf32>
    %cst_18 = arith.constant dense<0.000000e+00> : vector<288x32xf32>
    %36 = tpu.matmul %35, %34, %cst_18 {dimension_numbers = #tpu.dot_dimension_numbers<[1], [0], [0], [1], [0, 0, 1, 1], [], []>} : vector<288x32xf32>, vector<32x32xf32>, vector<288x32xf32> -> vector<288x32xf32>
    %37 = vector.extract_strided_slice %36 {offsets = [0, 0], sizes = [32, 32], strides = [1, 1]} : vector<288x32xf32> to vector<32x32xf32>
    %38 = vector.extract_strided_slice %36 {offsets = [32, 0], sizes = [32, 32], strides = [1, 1]} : vector<288x32xf32> to vector<32x32xf32>
    %39 = vector.extract_strided_slice %36 {offsets = [64, 0], sizes = [32, 32], strides = [1, 1]} : vector<288x32xf32> to vector<32x32xf32>
    %40 = vector.extract_strided_slice %36 {offsets = [96, 0], sizes = [32, 32], strides = [1, 1]} : vector<288x32xf32> to vector<32x32xf32>
    %41 = vector.extract_strided_slice %36 {offsets = [128, 0], sizes = [32, 32], strides = [1, 1]} : vector<288x32xf32> to vector<32x32xf32>
    %42 = vector.extract_strided_slice %36 {offsets = [160, 0], sizes = [32, 32], strides = [1, 1]} : vector<288x32xf32> to vector<32x32xf32>
    %43 = vector.extract_strided_slice %36 {offsets = [192, 0], sizes = [32, 32], strides = [1, 1]} : vector<288x32xf32> to vector<32x32xf32>
    %44 = vector.extract_strided_slice %36 {offsets = [224, 0], sizes = [32, 32], strides = [1, 1]} : vector<288x32xf32> to vector<32x32xf32>
    %45 = vector.extract_strided_slice %36 {offsets = [256, 0], sizes = [32, 32], strides = [1, 1]} : vector<288x32xf32> to vector<32x32xf32>
    %46 = tpu.concatenate %37, %38, %39, %40, %41, %42, %43, %44, %45 in 1 : vector<32x32xf32>, vector<32x32xf32>, vector<32x32xf32>, vector<32x32xf32>, vector<32x32xf32>, vector<32x32xf32>, vector<32x32xf32>, vector<32x32xf32>, vector<32x32xf32> -> vector<32x288xf32>
    %c0_19 = arith.constant 0 : index
    %c0_20 = arith.constant 0 : index
    %47 = vector.load %arg8[%c0_19, %c0_20] : memref<288x32xf32, #tpu.memory_space<vmem>>, vector<288x32xf32>
    %cst_21 = arith.constant dense<0.000000e+00> : vector<32x32xf32>
    %48 = tpu.matmul %46, %47, %cst_21 {dimension_numbers = #tpu.dot_dimension_numbers<[1], [0], [0], [1], [0, 0, 1, 1], [], []>} : vector<32x288xf32>, vector<288x32xf32>, vector<32x32xf32> -> vector<32x32xf32>
    %c0_22 = arith.constant 0 : index
    %c0_23 = arith.constant 0 : index
    %49 = vector.load %arg9[%c0_22, %c0_23] : memref<1x32xf32, #tpu.memory_space<vmem>>, vector<1x32xf32>
    %50 = vector.broadcast %49 : vector<1x32xf32> to vector<32x32xf32>
    %51 = arith.addf %48, %50 : vector<32x32xf32>
    %cst_24 = arith.constant 0.000000e+00 : f32
    %52 = vector.broadcast %cst_24 : f32 to vector<32x32xf32>
    %53 = arith.maximumf %51, %52 : vector<32x32xf32>
    %c0_25 = arith.constant 0 : index
    %c0_26 = arith.constant 0 : index
    %54 = vector.load %arg7[%c0_25, %c0_26] : memref<288x32xf32, #tpu.memory_space<vmem>>, vector<288x32xf32>
    %cst_27 = arith.constant dense<0.000000e+00> : vector<288x32xf32>
    %55 = tpu.matmul %54, %53, %cst_27 {dimension_numbers = #tpu.dot_dimension_numbers<[1], [0], [0], [1], [0, 0, 1, 1], [], []>} : vector<288x32xf32>, vector<32x32xf32>, vector<288x32xf32> -> vector<288x32xf32>
    %56 = vector.extract_strided_slice %55 {offsets = [0, 0], sizes = [32, 32], strides = [1, 1]} : vector<288x32xf32> to vector<32x32xf32>
    %57 = vector.extract_strided_slice %55 {offsets = [32, 0], sizes = [32, 32], strides = [1, 1]} : vector<288x32xf32> to vector<32x32xf32>
    %58 = vector.extract_strided_slice %55 {offsets = [64, 0], sizes = [32, 32], strides = [1, 1]} : vector<288x32xf32> to vector<32x32xf32>
    %59 = vector.extract_strided_slice %55 {offsets = [96, 0], sizes = [32, 32], strides = [1, 1]} : vector<288x32xf32> to vector<32x32xf32>
    %60 = vector.extract_strided_slice %55 {offsets = [128, 0], sizes = [32, 32], strides = [1, 1]} : vector<288x32xf32> to vector<32x32xf32>
    %61 = vector.extract_strided_slice %55 {offsets = [160, 0], sizes = [32, 32], strides = [1, 1]} : vector<288x32xf32> to vector<32x32xf32>
    %62 = vector.extract_strided_slice %55 {offsets = [192, 0], sizes = [32, 32], strides = [1, 1]} : vector<288x32xf32> to vector<32x32xf32>
    %63 = vector.extract_strided_slice %55 {offsets = [224, 0], sizes = [32, 32], strides = [1, 1]} : vector<288x32xf32> to vector<32x32xf32>
    %64 = vector.extract_strided_slice %55 {offsets = [256, 0], sizes = [32, 32], strides = [1, 1]} : vector<288x32xf32> to vector<32x32xf32>
    %65 = tpu.concatenate %56, %57, %58, %59, %60, %61, %62, %63, %64 in 1 : vector<32x32xf32>, vector<32x32xf32>, vector<32x32xf32>, vector<32x32xf32>, vector<32x32xf32>, vector<32x32xf32>, vector<32x32xf32>, vector<32x32xf32>, vector<32x32xf32> -> vector<32x288xf32>
    %c0_28 = arith.constant 0 : index
    %c0_29 = arith.constant 0 : index
    %66 = vector.load %arg10[%c0_28, %c0_29] : memref<288x16xf32, #tpu.memory_space<vmem>>, vector<288x16xf32>
    %cst_30 = arith.constant dense<0.000000e+00> : vector<32x16xf32>
    %67 = tpu.matmul %65, %66, %cst_30 {dimension_numbers = #tpu.dot_dimension_numbers<[1], [0], [0], [1], [0, 0, 1, 1], [], []>} : vector<32x288xf32>, vector<288x16xf32>, vector<32x16xf32> -> vector<32x16xf32>
    %c0_31 = arith.constant 0 : index
    %c0_32 = arith.constant 0 : index
    %68 = vector.load %arg11[%c0_31, %c0_32] : memref<1x16xf32, #tpu.memory_space<vmem>>, vector<1x16xf32>
    %69 = vector.broadcast %68 : vector<1x16xf32> to vector<32x16xf32>
    %70 = arith.addf %67, %69 : vector<32x16xf32>
    %cst_33 = arith.constant 0.000000e+00 : f32
    %71 = vector.broadcast %cst_33 : f32 to vector<32x16xf32>
    %72 = arith.maximumf %70, %71 : vector<32x16xf32>
    %c0_34 = arith.constant 0 : index
    %c0_35 = arith.constant 0 : index
    %73 = vector.load %arg12[%c0_34, %c0_35] : memref<16x32xf32, #tpu.memory_space<vmem>>, vector<16x32xf32>
    %cst_36 = arith.constant dense<0.000000e+00> : vector<32x32xf32>
    %74 = tpu.matmul %72, %73, %cst_36 {dimension_numbers = #tpu.dot_dimension_numbers<[1], [0], [0], [1], [0, 0, 1, 1], [], []>} : vector<32x16xf32>, vector<16x32xf32>, vector<32x32xf32> -> vector<32x32xf32>
    %c0_37 = arith.constant 0 : index
    %c0_38 = arith.constant 0 : index
    %75 = vector.load %arg13[%c0_37, %c0_38] : memref<1x32xf32, #tpu.memory_space<vmem>>, vector<1x32xf32>
    %76 = vector.broadcast %75 : vector<1x32xf32> to vector<32x32xf32>
    %77 = arith.addf %74, %76 : vector<32x32xf32>
    %78 = arith.addf %51, %77 : vector<32x32xf32>
    %cst_39 = arith.constant 0.000000e+00 : f32
    %79 = vector.broadcast %cst_39 : f32 to vector<32x32xf32>
    %80 = arith.maximumf %78, %79 : vector<32x32xf32>
    %c0_40 = arith.constant 0 : index
    %c0_41 = arith.constant 0 : index
    %81 = vector.load %arg7[%c0_40, %c0_41] : memref<288x32xf32, #tpu.memory_space<vmem>>, vector<288x32xf32>
    %cst_42 = arith.constant dense<0.000000e+00> : vector<288x32xf32>
    %82 = tpu.matmul %81, %80, %cst_42 {dimension_numbers = #tpu.dot_dimension_numbers<[1], [0], [0], [1], [0, 0, 1, 1], [], []>} : vector<288x32xf32>, vector<32x32xf32>, vector<288x32xf32> -> vector<288x32xf32>
    %83 = vector.extract_strided_slice %82 {offsets = [0, 0], sizes = [32, 32], strides = [1, 1]} : vector<288x32xf32> to vector<32x32xf32>
    %84 = vector.extract_strided_slice %82 {offsets = [32, 0], sizes = [32, 32], strides = [1, 1]} : vector<288x32xf32> to vector<32x32xf32>
    %85 = vector.extract_strided_slice %82 {offsets = [64, 0], sizes = [32, 32], strides = [1, 1]} : vector<288x32xf32> to vector<32x32xf32>
    %86 = vector.extract_strided_slice %82 {offsets = [96, 0], sizes = [32, 32], strides = [1, 1]} : vector<288x32xf32> to vector<32x32xf32>
    %87 = vector.extract_strided_slice %82 {offsets = [128, 0], sizes = [32, 32], strides = [1, 1]} : vector<288x32xf32> to vector<32x32xf32>
    %88 = vector.extract_strided_slice %82 {offsets = [160, 0], sizes = [32, 32], strides = [1, 1]} : vector<288x32xf32> to vector<32x32xf32>
    %89 = vector.extract_strided_slice %82 {offsets = [192, 0], sizes = [32, 32], strides = [1, 1]} : vector<288x32xf32> to vector<32x32xf32>
    %90 = vector.extract_strided_slice %82 {offsets = [224, 0], sizes = [32, 32], strides = [1, 1]} : vector<288x32xf32> to vector<32x32xf32>
    %91 = vector.extract_strided_slice %82 {offsets = [256, 0], sizes = [32, 32], strides = [1, 1]} : vector<288x32xf32> to vector<32x32xf32>
    %92 = tpu.concatenate %83, %84, %85, %86, %87, %88, %89, %90, %91 in 1 : vector<32x32xf32>, vector<32x32xf32>, vector<32x32xf32>, vector<32x32xf32>, vector<32x32xf32>, vector<32x32xf32>, vector<32x32xf32>, vector<32x32xf32>, vector<32x32xf32> -> vector<32x288xf32>
    %c0_43 = arith.constant 0 : index
    %c0_44 = arith.constant 0 : index
    %93 = vector.load %arg14[%c0_43, %c0_44] : memref<288x16xf32, #tpu.memory_space<vmem>>, vector<288x16xf32>
    %cst_45 = arith.constant dense<0.000000e+00> : vector<32x16xf32>
    %94 = tpu.matmul %92, %93, %cst_45 {dimension_numbers = #tpu.dot_dimension_numbers<[1], [0], [0], [1], [0, 0, 1, 1], [], []>} : vector<32x288xf32>, vector<288x16xf32>, vector<32x16xf32> -> vector<32x16xf32>
    %c0_46 = arith.constant 0 : index
    %c0_47 = arith.constant 0 : index
    %95 = vector.load %arg15[%c0_46, %c0_47] : memref<1x16xf32, #tpu.memory_space<vmem>>, vector<1x16xf32>
    %96 = vector.broadcast %95 : vector<1x16xf32> to vector<32x16xf32>
    %97 = arith.addf %94, %96 : vector<32x16xf32>
    %cst_48 = arith.constant 0.000000e+00 : f32
    %98 = vector.broadcast %cst_48 : f32 to vector<32x16xf32>
    %99 = arith.maximumf %97, %98 : vector<32x16xf32>
    %c0_49 = arith.constant 0 : index
    %c0_50 = arith.constant 0 : index
    %100 = vector.load %arg16[%c0_49, %c0_50] : memref<16x32xf32, #tpu.memory_space<vmem>>, vector<16x32xf32>
    %cst_51 = arith.constant dense<0.000000e+00> : vector<32x32xf32>
    %101 = tpu.matmul %99, %100, %cst_51 {dimension_numbers = #tpu.dot_dimension_numbers<[1], [0], [0], [1], [0, 0, 1, 1], [], []>} : vector<32x16xf32>, vector<16x32xf32>, vector<32x32xf32> -> vector<32x32xf32>
    %c0_52 = arith.constant 0 : index
    %c0_53 = arith.constant 0 : index
    %102 = vector.load %arg17[%c0_52, %c0_53] : memref<1x32xf32, #tpu.memory_space<vmem>>, vector<1x32xf32>
    %103 = vector.broadcast %102 : vector<1x32xf32> to vector<32x32xf32>
    %104 = arith.addf %101, %103 : vector<32x32xf32>
    %105 = arith.addf %78, %104 : vector<32x32xf32>
    %cst_54 = arith.constant 0.000000e+00 : f32
    %106 = vector.broadcast %cst_54 : f32 to vector<32x32xf32>
    %107 = arith.maximumf %105, %106 : vector<32x32xf32>
    %c0_55 = arith.constant 0 : index
    %c0_56 = arith.constant 0 : index
    %108 = vector.load %arg18[%c0_55, %c0_56] : memref<32x32xf32, #tpu.memory_space<vmem>>, vector<32x32xf32>
    tpu.vector_store %arg18[%c0_55, %c0_56], %107 {strides = array<i32>} : memref<32x32xf32, #tpu.memory_space<vmem>>, vector<32x32xf32>,
    return
  }
  func.func @transform_0(%arg0: i32) -> (i32, i32, i32) {
    %c0_i32 = arith.constant 0 : i32
    %c0_i32_0 = arith.constant 0 : i32
    %c0_i32_1 = arith.constant 0 : i32
    return %arg0, %c0_i32, %c0_i32_0 : i32, i32, i32
  }
  func.func @transform_1(%arg0: i32) -> (i32, i32) {
    %c0_i32 = arith.constant 0 : i32
    %c0_i32_0 = arith.constant 0 : i32
    %c0_i32_1 = arith.constant 0 : i32
    return %c0_i32, %c0_i32_0 : i32, i32
  }
  func.func @transform_2(%arg0: i32) -> (i32, i32) {
    %c0_i32 = arith.constant 0 : i32
    %c0_i32_0 = arith.constant 0 : i32
    %c0_i32_1 = arith.constant 0 : i32
    return %c0_i32, %c0_i32_0 : i32, i32
  }
  func.func @transform_3(%arg0: i32) -> (i32, i32) {
    %c0_i32 = arith.constant 0 : i32
    %c0_i32_0 = arith.constant 0 : i32
    %c0_i32_1 = arith.constant 0 : i32
    return %c0_i32, %c0_i32_0 : i32, i32
  }
  func.func @transform_4(%arg0: i32) -> (i32, i32) {
    %c0_i32 = arith.constant 0 : i32
    %c0_i32_0 = arith.constant 0 : i32
    %c0_i32_1 = arith.constant 0 : i32
    return %c0_i32, %c0_i32_0 : i32, i32
  }
  func.func @transform_5(%arg0: i32) -> (i32, i32) {
    %c0_i32 = arith.constant 0 : i32
    %c0_i32_0 = arith.constant 0 : i32
    %c0_i32_1 = arith.constant 0 : i32
    return %c0_i32, %c0_i32_0 : i32, i32
  }
  func.func @transform_6(%arg0: i32) -> (i32, i32) {
    %c0_i32 = arith.constant 0 : i32
    %c0_i32_0 = arith.constant 0 : i32
    %c0_i32_1 = arith.constant 0 : i32
    return %c0_i32, %c0_i32_0 : i32, i32
  }
  func.func @transform_7(%arg0: i32) -> (i32, i32) {
    %c0_i32 = arith.constant 0 : i32
    %c0_i32_0 = arith.constant 0 : i32
    %c0_i32_1 = arith.constant 0 : i32
    return %c0_i32, %c0_i32_0 : i32, i32
  }
  func.func @transform_8(%arg0: i32) -> (i32, i32) {
    %c0_i32 = arith.constant 0 : i32
    %c0_i32_0 = arith.constant 0 : i32
    %c0_i32_1 = arith.constant 0 : i32
    return %c0_i32, %c0_i32_0 : i32, i32
  }
  func.func @transform_9(%arg0: i32) -> (i32, i32) {
    %c0_i32 = arith.constant 0 : i32
    %c0_i32_0 = arith.constant 0 : i32
    %c0_i32_1 = arith.constant 0 : i32
    return %c0_i32, %c0_i32_0 : i32, i32
  }
  func.func @transform_10(%arg0: i32) -> (i32, i32) {
    %c0_i32 = arith.constant 0 : i32
    %c0_i32_0 = arith.constant 0 : i32
    %c0_i32_1 = arith.constant 0 : i32
    return %c0_i32, %c0_i32_0 : i32, i32
  }
  func.func @transform_11(%arg0: i32) -> (i32, i32) {
    %c0_i32 = arith.constant 0 : i32
    %c0_i32_0 = arith.constant 0 : i32
    %c0_i32_1 = arith.constant 0 : i32
    return %c0_i32, %c0_i32_0 : i32, i32
  }
  func.func @transform_12(%arg0: i32) -> (i32, i32) {
    %c0_i32 = arith.constant 0 : i32
    %c0_i32_0 = arith.constant 0 : i32
    %c0_i32_1 = arith.constant 0 : i32
    return %c0_i32, %c0_i32_0 : i32, i32
  }
  func.func @transform_13(%arg0: i32) -> (i32, i32) {
    %c0_i32 = arith.constant 0 : i32
    %c0_i32_0 = arith.constant 0 : i32
    %c0_i32_1 = arith.constant 0 : i32
    return %c0_i32, %c0_i32_0 : i32, i32
  }
  func.func @transform_14(%arg0: i32) -> (i32, i32) {
    %c0_i32 = arith.constant 0 : i32
    %c0_i32_0 = arith.constant 0 : i32
    %c0_i32_1 = arith.constant 0 : i32
    return %c0_i32, %c0_i32_0 : i32, i32
  }
  func.func @transform_15(%arg0: i32) -> (i32, i32) {
    %c0_i32 = arith.constant 0 : i32
    %c0_i32_0 = arith.constant 0 : i32
    %c0_i32_1 = arith.constant 0 : i32
    return %c0_i32, %c0_i32_0 : i32, i32
  }
  func.func @transform_16(%arg0: i32) -> (i32, i32) {
    %c0_i32 = arith.constant 0 : i32
    %c0_i32_0 = arith.constant 0 : i32
    %c0_i32_1 = arith.constant 0 : i32
    return %c0_i32, %c0_i32_0 : i32, i32
  }
  func.func @transform_17(%arg0: i32) -> (i32, i32) {
    %c0_i32 = arith.constant 0 : i32
    %c0_i32_0 = arith.constant 0 : i32
    return %arg0, %c0_i32 : i32, i32
  }
}

</mosaic_0001>

<bundles_post_ra>
// kernel: encoder_forward.1
= control target key start
LH: loop header
LB: loop body
LE: loop exit
PB: predicated region body
PF: predicated region fallthrough
CT: control target
= control target key end

     0   :  { %s6813_s0 = inlined_call_operand.vmem [shape: f32[1,128,64], index: 0, kind: input, shape index: {}]   ;;  %s6814_s1 = inlined_call_operand.vmem [shape: f32[64,16], index: 1, kind: input, shape index: {}]   ;;  %s6815_s2 = inlined_call_operand.vmem [shape: f32[1,16], index: 2, kind: input, shape index: {}]   ;;  %s6816_s3 = inlined_call_operand.vmem [shape: f32[512,128], index: 3, kind: input, shape index: {}]   ;;  %s6817_s4 = inlined_call_operand.vmem [shape: f32[256,32], index: 4, kind: input, shape index: {}]   ;;  %s6818_s5 = inlined_call_operand.vmem [shape: f32[1,32], index: 5, kind: input, shape index: {}]   ;;  %s6819_s6 = inlined_call_operand.vmem [shape: f32[288,32], index: 6, kind: input, shape index: {}]   ;;  %s6820_s7 = inlined_call_operand.vmem [shape: f32[288,32], index: 7, kind: input, shape index: {}]   ;;  %s6821_s8 = inlined_call_operand.vmem [shape: f32[1,32], index: 8, kind: input, shape index: {}]   ;;  %s6822_s9 = inlined_call_operand.vmem [shape: f32[288,16], index: 9, kind: input, shape index: {}]   ;;  %s6823_s10 = inlined_call_operand.vmem [shape: f32[1,16], index: 10, kind: input, shape index: {}]   ;;  %s6824_s11 = inlined_call_operand.vmem [shape: f32[16,32], index: 11, kind: input, shape index: {}]   ;;  %s6825_s12 = inlined_call_operand.vmem [shape: f32[1,32], index: 12, kind: input, shape index: {}]   ;;  %s6826_s13 = inlined_call_operand.vmem [shape: f32[288,16], index: 13, kind: input, shape index: {}]   ;;  %s6827_s14 = inlined_call_operand.vmem [shape: f32[1,16], index: 14, kind: input, shape index: {}]   ;;  %s6828_s15 = inlined_call_operand.vmem [shape: f32[16,32], index: 15, kind: input, shape index: {}]   ;;  %s6829_s16 = inlined_call_operand.vmem [shape: f32[1,32], index: 16, kind: input, shape index: {}]   ;;  %s6830_s17 = inlined_call_operand.hbm [shape: f32[32,32], index: 17, kind: output, shape index: {}]  }
   0x1   :  { %6843 = sst [smem:[#allocation15_spill]] %s6813_s0 }
   0x2   :  { %6844 = sst [smem:[#allocation16_spill]] %s6814_s1 }
   0x3   :  { %s6845_s26 = sld [smem:[#allocation16_spill]]  ;;  %vm88_vm0 = vcmask 523264   ;;  %s6846_s24 = sld [smem:[#allocation15_spill]] }
   0x9   :  { %v73_v0 = vld [vmem:[%s6845_s26] sm:$0xff]  ;;  %v74_v1 = vld [vmem:[%s6845_s26 + $0x8] sm:$0xff]  ;;  %v75_v2 = vld [vmem:[%s6845_s26 + $0x10] sm:$0xff] }
   0xa   :  { %v4338_v3 = vpack.c.bf16 %v74_v1, %v73_v0  ;;  %v76_v4 = vld [vmem:[%s6845_s26 + $0x18] sm:$0xff]  ;;  %v77_v6 = vld [vmem:[%s6845_s26 + $0x20] sm:$0xff]  ;;  %v78_v7 = vld [vmem:[%s6845_s26 + $0x28] sm:$0xff] }
   0xb   :  { %v4342_v5 = vpack.c.bf16 %v76_v4, %v75_v2  ;;  %v57_v8 = vld [vmem:[%s6846_s24] sm:$0xff]  ;;  %v4346_v9 = vpack.c.bf16 %v78_v7, %v77_v6  ;;  %v79_v10 = vld [vmem:[%s6845_s26 + $0x30] sm:$0xff]  ;;  %v80_v11 = vld [vmem:[%s6845_s26 + $0x38] sm:$0xff] }
   0xc   :  { %4339 = vmatprep.subr.bf16.mxu0 %v4338_v3  ;;  %3938 = vmatprep.mubr.msk.f32.mxu0 %vm88_vm0, %v57_v8 }
   0xd   :  { %4341 = vmatpush3.bf16.msra.mxu0 %v4338_v3 }
   0xe   :  { %4343 = vmatprep.subr.bf16.mxu0 %v4342_v5 }
  0x11   :  { %4345 = vmatpush3.bf16.msra.mxu0 %v4342_v5 }
  0x12   :  { %22 = vsyncpa [#allocation3], 0  ;;  %4347 = vmatprep.subr.bf16.mxu0 %v4346_v9  ;;  %v4350_v12 = vpack.c.bf16 %v80_v11, %v79_v10  ;;  %v58_v13 = vld [vmem:[%s6846_s24 + $0x8] sm:$0xff]  ;;  %v59_v14 = vld [vmem:[%s6846_s24 + $0x10] sm:$0xff]  ;;  %s4962_s25 = smov 48   ;;  %s4963_s28 = smov 64  }
  0x13   :  { %v60_v15 = vld [vmem:[%s6846_s24 + $0x18] sm:$0xff]  ;;  %v61_v16 = vld [vmem:[%s6846_s24 + $0x20] sm:$0xff]  ;;  %v62_v17 = vld [vmem:[%s6846_s24 + $0x28] sm:$0xff]  ;;  %s4964_s0 = smov 80   ;;  %s4965_s21 = smov 96   ;;  %vm971_vm1 = vcmask 130048  }
  0x14   :  { %v63_v18 = vld [vmem:[%s6846_s24 + $0x30] sm:$0xff]  ;;  %v64_v19 = vld [vmem:[%s6846_s24 + $0x38] sm:$0xff]  ;;  %v65_v20 = vld [vmem:[%s6846_s24 + $0x40] sm:$0xff]  ;;  %vm976_vm2 = vcmask 261120   ;;  %vm981_vm3 = vcmask 392192   ;;  %vm990_vm4 = vcmask 654336  }
  0x15   :  { %4349 = vmatpush3.bf16.msra.mxu0 %v4346_v9  ;;  %v66_v21 = vld [vmem:[%s6846_s24 + $0x48] sm:$0xff]  ;;  %v67_v22 = vld [vmem:[%s6846_s24 + $0x50] sm:$0xff]  ;;  %v68_v23 = vld [vmem:[%s6846_s24 + $0x58] sm:$0xff]  ;;  %vm995_vm5 = vcmask 785408   ;;  %vm1000_vm6 = vcmask 916480   ;;  %s4967_s23 = smov [#allocation2]  }
  0x16   :  { %4351 = vmatprep.subr.bf16.mxu0 %v4350_v12  ;;  %v69_v24 = vld [vmem:[%s6846_s24 + $0x60] sm:$0xff]  ;;  %v70_v25 = vld [vmem:[%s6846_s24 + $0x68] sm:$0xff]  ;;  %v71_v26 = vld [vmem:[%s6846_s24 + $0x70] sm:$0xff] }
  0x17   :  { %v72_v27 = vld [vmem:[%s6846_s24 + $0x78] sm:$0xff]  ;;  %v298_v28 = vld [vmem:[%s6816_s3] sm:$0xff] }
  0x18   :  { %3994 = vmatprep.mubr.f32.mxu1 %v298_v28  ;;  %v5154_v29 = vld [vmem:[%s6815_s2] ss:$0 sm:$0xff]  ;;  %v305_v28 = vld [vmem:[%s6816_s3 + $0x38] sm:$0xff] }
  0x19   :  { %4353 = vmatpush3.bf16.msra.mxu0 %v4350_v12 }
  0x1c   :  { %3939 = vmatmul.mubr.msk.f32.vlgmr.msra.gmra.mrb[0].mxu0 %vm88_vm0, %v58_v13 }
  0x1d   :  { %3941 = vmatprep.mubr.msk.f32.mxu0 %vm88_vm0, %v59_v14 }
  0x20   :  { %3942 = vmatmul.mubr.msk.f32.gmra.mrb[2].mxu0 %vm88_vm0, %v60_v15 }
  0x21   :  { %3944 = vmatprep.mubr.msk.f32.mxu0 %vm88_vm0, %v61_v16 }
  0x24   :  { %3945 = vmatmul.mubr.msk.f32.gmra.mrb[4].mxu0 %vm88_vm0, %v62_v17 }
  0x25   :  { %3947 = vmatprep.mubr.msk.f32.mxu0 %vm88_vm0, %v63_v18 }
  0x28   :  { %3948 = vmatmul.mubr.msk.f32.gmra.mrb[6].mxu0 %vm88_vm0, %v64_v19 }
  0x29   :  { %3950 = vmatprep.mubr.msk.f32.mxu0 %vm88_vm0, %v65_v20 }
  0x2c   :  { %3951 = vmatmul.mubr.msk.f32.gmra.mrb[8].mxu0 %vm88_vm0, %v66_v21 }
  0x2d   :  { %3953 = vmatprep.mubr.msk.f32.mxu0 %vm88_vm0, %v67_v22  ;;  %v299_v22 = vld [vmem:[%s6816_s3 + $0x8] sm:$0xff] }
  0x30   :  { %3954 = vmatmul.mubr.msk.f32.gmra.mrb[10].mxu0 %vm88_vm0, %v68_v23  ;;  %v300_v23 = vld [vmem:[%s6816_s3 + $0x10] sm:$0xff] }
  0x31   :  { %3956 = vmatprep.mubr.msk.f32.mxu0 %vm88_vm0, %v69_v24  ;;  %v301_v24 = vld [vmem:[%s6816_s3 + $0x18] sm:$0xff] }
  0x34   :  { %3957 = vmatmul.mubr.msk.f32.gmra.mrb[12].mxu0 %vm88_vm0, %v70_v25  ;;  %v302_v25 = vld [vmem:[%s6816_s3 + $0x20] sm:$0xff] }
  0x35   :  { %3959 = vmatprep.mubr.msk.f32.mxu0 %vm88_vm0, %v71_v26  ;;  %v303_v26 = vld [vmem:[%s6816_s3 + $0x28] sm:$0xff] }
  0x38   :  { %3960 = vmatmul.mubr.msk.f32.gmra.mrb[14].mxu0 %vm88_vm0, %v72_v27  ;;  %v304_v27 = vld [vmem:[%s6816_s3 + $0x30] sm:$0xff] }
  0xef   :  { %v3940_v30 = vpop.f32.mrb[0].mxu0 }
  0xf0   :  { %v209_v31 = vadd.f32 %v3940_v30, %v5154_v29  ;;  %v203_v32 = vpop.f32.mrb[1].mxu0  ;;  %v307_v30 = vld [vmem:[%s6816_s3 + $0x48] sm:$0xff] }
  0xf1   :  { %v204_v33 = vadd.f32 %v5154_v29, %v203_v32  ;;  %v309_v32 = vld [vmem:[%s6816_s3 + $0x58] sm:$0xff] }
  0xf2   :  { %v283_v34 = vmax.f32 %v209_v31, 0.0  ;;  %v308_v31 = vld [vmem:[%s6816_s3 + $0x50] sm:$0xff] }
  0xf3   :  { %v282_v35 = vmax.f32 %v204_v33, 0.0  ;;  %v3943_v36 = vpop.f32.mrb[2].mxu0  ;;  %v310_v33 = vld [vmem:[%s6816_s3 + $0x60] sm:$0xff] }
  0xf4   :  { %v219_v37 = vadd.f32 %v3943_v36, %v5154_v29  ;;  %v213_v38 = vpop.f32.mrb[3].mxu0  ;;  %v313_v36 = vld [vmem:[%s6816_s3 + $0x78] sm:$0xff] }
  0xf5   :  { %v214_v39 = vadd.f32 %v5154_v29, %v213_v38  ;;  %v4354_v40 = vpack.c.bf16 %v283_v34, %v282_v35  ;;  %v311_v34 = vld [vmem:[%s6816_s3 + $0x68] sm:$0xff]  ;;  %v312_v35 = vld [vmem:[%s6816_s3 + $0x70] sm:$0xff] }
  0xf6   :  { %v285_v41 = vmax.f32 %v219_v37, 0.0  ;;  %v314_v37 = vld [vmem:[%s6816_s3 + $0x80] sm:$0xff]  ;;  %v315_v38 = vld [vmem:[%s6816_s3 + $0x88] sm:$0xff] }
  0xf7   :  { %v284_v42 = vmax.f32 %v214_v39, 0.0  ;;  %v3946_v43 = vpop.f32.mrb[4].mxu0  ;;  %4355 = vmatprep.subr.bf16.mxu1 %v4354_v40  ;;  %v316_v39 = vld [vmem:[%s6816_s3 + $0x90] sm:$0xff] }
  0xf8   :  { %v229_v44 = vadd.f32 %v3946_v43, %v5154_v29  ;;  %v223_v45 = vpop.f32.mrb[5].mxu0  ;;  %4357 = vmatpush3.bf16.msra.mxu1 %v4354_v40  ;;  %v317_v40 = vld [vmem:[%s6816_s3 + $0x98] sm:$0xff]  ;;  %v320_v43 = vld [vmem:[%s6816_s3 + $0xb0] sm:$0xff] }
  0xf9   :  { %v4358_v46 = vpack.c.bf16 %v285_v41, %v284_v42  ;;  %v224_v47 = vadd.f32 %v5154_v29, %v223_v45  ;;  %v318_v41 = vld [vmem:[%s6816_s3 + $0xa0] sm:$0xff]  ;;  %v319_v42 = vld [vmem:[%s6816_s3 + $0xa8] sm:$0xff] }
  0xfa   :  { %v287_v48 = vmax.f32 %v229_v44, 0.0  ;;  %v321_v44 = vld [vmem:[%s6816_s3 + $0xb8] sm:$0xff]  ;;  %v322_v45 = vld [vmem:[%s6816_s3 + $0xc0] sm:$0xff] }
  0xfb   :  { %v286_v49 = vmax.f32 %v224_v47, 0.0  ;;  %v3949_v50 = vpop.f32.mrb[6].mxu0  ;;  %4359 = vmatprep.subr.bf16.mxu1 %v4358_v46  ;;  %v324_v47 = vld [vmem:[%s6816_s3 + $0xd0] sm:$0xff] }
  0xfc   :  { %v239_v51 = vadd.f32 %v3949_v50, %v5154_v29  ;;  %v233_v52 = vpop.f32.mrb[7].mxu0  ;;  %4361 = vmatpush3.bf16.msra.mxu1 %v4358_v46  ;;  %v323_v46 = vld [vmem:[%s6816_s3 + $0xc8] sm:$0xff] }
  0xfd   :  { %v4362_v53 = vpack.c.bf16 %v287_v48, %v286_v49  ;;  %v234_v54 = vadd.f32 %v5154_v29, %v233_v52  ;;  %v325_v48 = vld [vmem:[%s6816_s3 + $0xd8] sm:$0xff]  ;;  %v326_v49 = vld [vmem:[%s6816_s3 + $0xe0] sm:$0xff]  ;;  %v327_v50 = vld [vmem:[%s6816_s3 + $0xe8] sm:$0xff] }
  0xfe   :  { %v289_v55 = vmax.f32 %v239_v51, 0.0  ;;  %v328_v51 = vld [vmem:[%s6816_s3 + $0xf0] sm:$0xff]  ;;  %v329_v52 = vld [vmem:[%s6816_s3 + $0xf8] sm:$0xff] }
  0xff   :  { %v288_v56 = vmax.f32 %v234_v54, 0.0  ;;  %v3952_v57 = vpop.f32.mrb[8].mxu0  ;;  %4363 = vmatprep.subr.bf16.mxu1 %v4362_v53  ;;  %v331_v54 = vld [vmem:[%s6816_s3 + $0x108] sm:$0xff] }
 0x100   :  { %v249_v58 = vadd.f32 %v3952_v57, %v5154_v29  ;;  %v243_v59 = vpop.f32.mrb[9].mxu0  ;;  %4365 = vmatpush3.bf16.msra.mxu1 %v4362_v53  ;;  %v330_v53 = vld [vmem:[%s6816_s3 + $0x100] sm:$0xff] }
 0x101   :  { %v4366_v60 = vpack.c.bf16 %v289_v55, %v288_v56  ;;  %v244_v61 = vadd.f32 %v5154_v29, %v243_v59  ;;  %v332_v55 = vld [vmem:[%s6816_s3 + $0x110] sm:$0xff]  ;;  %v333_v56 = vld [vmem:[%s6816_s3 + $0x118] sm:$0xff]  ;;  %v334_v57 = vld [vmem:[%s6816_s3 + $0x120] sm:$0xff] }
 0x102   :  { %v291_v62 = vmax.f32 %v249_v58, 0.0  ;;  %v335_v58 = vld [vmem:[%s6816_s3 + $0x128] sm:$0xff]  ;;  %v336_v59 = vld [vmem:[%s6816_s3 + $0x130] sm:$0xff] }
 0x103   :  { %v290_v63 = vmax.f32 %v244_v61, 0.0  ;;  %v3955_v0 = vpop.f32.mrb[10].mxu0  ;;  %4367 = vmatprep.subr.bf16.mxu1 %v4366_v60  ;;  %v338_v61 = vld [vmem:[%s6816_s3 + $0x140] sm:$0xff] }
 0x104   :  { %v259_v1 = vadd.f32 %v3955_v0, %v5154_v29  ;;  %v253_v2 = vpop.f32.mrb[11].mxu0  ;;  %4369 = vmatpush3.bf16.msra.mxu1 %v4366_v60  ;;  %v337_v60 = vld [vmem:[%s6816_s3 + $0x138] sm:$0xff] }
 0x105   :  { %v4370_v3 = vpack.c.bf16 %v291_v62, %v290_v63  ;;  %v254_v4 = vadd.f32 %v5154_v29, %v253_v2  ;;  %v339_v62 = vld [vmem:[%s6816_s3 + $0x148] sm:$0xff]  ;;  %v340_v63 = vld [vmem:[%s6816_s3 + $0x150] sm:$0xff]  ;;  %v341_v0 = vld [vmem:[%s6816_s3 + $0x158] sm:$0xff] }
 0x106   :  { %v293_v5 = vmax.f32 %v259_v1, 0.0  ;;  %v342_v1 = vld [vmem:[%s6816_s3 + $0x160] sm:$0xff]  ;;  %v343_v2 = vld [vmem:[%s6816_s3 + $0x168] sm:$0xff] }
 0x107   :  { %v292_v6 = vmax.f32 %v254_v4, 0.0  ;;  %v3958_v7 = vpop.f32.mrb[12].mxu0  ;;  %4371 = vmatprep.subr.bf16.mxu1 %v4370_v3  ;;  %v345_v4 = vld [vmem:[%s6816_s3 + $0x178] sm:$0xff] }
 0x108   :  { %v269_v8 = vadd.f32 %v3958_v7, %v5154_v29  ;;  %v263_v9 = vpop.f32.mrb[13].mxu0  ;;  %4373 = vmatpush3.bf16.msra.mxu1 %v4370_v3  ;;  %v344_v3 = vld [vmem:[%s6816_s3 + $0x170] sm:$0xff] }
 0x109   :  { %v4374_v10 = vpack.c.bf16 %v293_v5, %v292_v6  ;;  %v264_v11 = vadd.f32 %v5154_v29, %v263_v9  ;;  %v346_v5 = vld [vmem:[%s6816_s3 + $0x180] sm:$0xff]  ;;  %v347_v6 = vld [vmem:[%s6816_s3 + $0x188] sm:$0xff]  ;;  %v348_v7 = vld [vmem:[%s6816_s3 + $0x190] sm:$0xff] }
 0x10a   :  { %v295_v12 = vmax.f32 %v269_v8, 0.0  ;;  %v349_v8 = vld [vmem:[%s6816_s3 + $0x198] sm:$0xff]  ;;  %v350_v9 = vld [vmem:[%s6816_s3 + $0x1a0] sm:$0xff] }
 0x10b   :  { %v294_v13 = vmax.f32 %v264_v11, 0.0  ;;  %v3961_v14 = vpop.f32.mrb[14].mxu0  ;;  %4375 = vmatprep.subr.bf16.mxu1 %v4374_v10  ;;  %v352_v11 = vld [vmem:[%s6816_s3 + $0x1b0] sm:$0xff] }
 0x10c   :  { %v279_v15 = vadd.f32 %v3961_v14, %v5154_v29  ;;  %v273_v16 = vpop.f32.mrb[15].mxu0  ;;  %4377 = vmatpush3.bf16.msra.mxu1 %v4374_v10  ;;  %v351_v10 = vld [vmem:[%s6816_s3 + $0x1a8] sm:$0xff] }
 0x10d   :  { %v4378_v17 = vpack.c.bf16 %v295_v12, %v294_v13  ;;  %v274_v18 = vadd.f32 %v5154_v29, %v273_v16  ;;  %v306_v29 = vld [vmem:[%s6816_s3 + $0x40] sm:$0xff]  ;;  %v353_v12 = vld [vmem:[%s6816_s3 + $0x1b8] sm:$0xff]  ;;  %v355_v14 = vld [vmem:[%s6816_s3 + $0x1c8] sm:$0xff] }
 0x10e   :  { %v297_v19 = vmax.f32 %v279_v15, 0.0  ;;  %v354_v13 = vld [vmem:[%s6816_s3 + $0x1c0] sm:$0xff]  ;;  %v356_v15 = vld [vmem:[%s6816_s3 + $0x1d0] sm:$0xff]  ;;  %v357_v16 = vld [vmem:[%s6816_s3 + $0x1d8] sm:$0xff] }
 0x10f   :  { %v296_v20 = vmax.f32 %v274_v18, 0.0  ;;  %4379 = vmatprep.subr.bf16.mxu1 %v4378_v17  ;;  %v359_v18 = vld [vmem:[%s6816_s3 + $0x1e8] sm:$0xff] }
 0x110   :  { %4381 = vmatpush3.bf16.msra.mxu1 %v4378_v17  ;;  %v358_v17 = vld [vmem:[%s6816_s3 + $0x1e0] sm:$0xff] }
 0x111   :  { %v4382_v21 = vpack.c.bf16 %v297_v19, %v296_v20  ;;  %v360_v19 = vld [vmem:[%s6816_s3 + $0x1f0] sm:$0xff]  ;;  %v361_v20 = vld [vmem:[%s6816_s3 + $0x1f8] sm:$0xff]  ;;  %s4960_s3 = smov 16  }
 0x113   :  { %4383 = vmatprep.subr.bf16.mxu1 %v4382_v21 }
 0x114   :  { %4385 = vmatpush3.bf16.msra.mxu1 %v4382_v21 }
 0x117   :  { %3995 = vmatmul.mubr.f32.vlgmr.msra.gmra.mrb[0].mxu1 %v299_v22 }
 0x118   :  { %3997 = vmatprep.mubr.f32.mxu1 %v300_v23 }
 0x11b   :  { %3998 = vmatmul.mubr.f32.gmra.mrb[2].mxu1 %v301_v24 }
 0x11c   :  { %4000 = vmatprep.mubr.f32.mxu1 %v302_v25 }
 0x11f   :  { %4001 = vmatmul.mubr.f32.gmra.mrb[4].mxu1 %v303_v26 }
 0x120   :  { %4003 = vmatprep.mubr.f32.mxu1 %v304_v27 }
 0x123   :  { %4004 = vmatmul.mubr.f32.gmra.mrb[6].mxu1 %v305_v28 }
 0x124   :  { %4006 = vmatprep.mubr.f32.mxu1 %v306_v29 }
 0x127   :  { %4007 = vmatmul.mubr.f32.gmra.mrb[8].mxu1 %v307_v30 }
 0x128   :  { %4009 = vmatprep.mubr.f32.mxu1 %v308_v31 }
 0x12b   :  { %4010 = vmatmul.mubr.f32.gmra.mrb[10].mxu1 %v309_v32 }
 0x12c   :  { %4012 = vmatprep.mubr.f32.mxu1 %v310_v33 }
 0x12f   :  { %4013 = vmatmul.mubr.f32.gmra.mrb[12].mxu1 %v311_v34 }
 0x130   :  { %4015 = vmatprep.mubr.f32.mxu1 %v312_v35 }
 0x133   :  { %4016 = vmatmul.mubr.f32.gmra.mrb[14].mxu1 %v313_v36 }
 0x134   :  { %4018 = vmatprep.mubr.f32.mxu1 %v314_v37 }
 0x137   :  { %4019 = vmatmul.mubr.f32.gmra.mrb[16].mxu1 %v315_v38 }
 0x138   :  { %4021 = vmatprep.mubr.f32.mxu1 %v316_v39 }
 0x13b   :  { %4022 = vmatmul.mubr.f32.gmra.mrb[18].mxu1 %v317_v40 }
 0x13c   :  { %4024 = vmatprep.mubr.f32.mxu1 %v318_v41 }
 0x13f   :  { %4025 = vmatmul.mubr.f32.gmra.mrb[20].mxu1 %v319_v42 }
 0x140   :  { %4027 = vmatprep.mubr.f32.mxu1 %v320_v43 }
 0x143   :  { %4028 = vmatmul.mubr.f32.gmra.mrb[22].mxu1 %v321_v44 }
 0x144   :  { %4030 = vmatprep.mubr.f32.mxu1 %v322_v45 }
 0x147   :  { %4031 = vmatmul.mubr.f32.gmra.mrb[24].mxu1 %v323_v46 }
 0x148   :  { %4033 = vmatprep.mubr.f32.mxu1 %v324_v47 }
 0x14b   :  { %4034 = vmatmul.mubr.f32.gmra.mrb[26].mxu1 %v325_v48 }
 0x14c   :  { %4036 = vmatprep.mubr.f32.mxu1 %v326_v49 }
 0x14f   :  { %4037 = vmatmul.mubr.f32.gmra.mrb[28].mxu1 %v327_v50 }
 0x150   :  { %4039 = vmatprep.mubr.f32.mxu1 %v328_v51 }
 0x153   :  { %4040 = vmatmul.mubr.f32.gmra.mrb[30].mxu1 %v329_v52 }
 0x154   :  { %4042 = vmatprep.mubr.f32.mxu1 %v330_v53 }
 0x157   :  { %4043 = vmatmul.mubr.f32.gmra.mrb[32].mxu1 %v331_v54 }
 0x158   :  { %4045 = vmatprep.mubr.f32.mxu1 %v332_v55 }
 0x15b   :  { %4046 = vmatmul.mubr.f32.gmra.mrb[34].mxu1 %v333_v56 }
 0x15c   :  { %4048 = vmatprep.mubr.f32.mxu1 %v334_v57 }
 0x15f   :  { %4049 = vmatmul.mubr.f32.gmra.mrb[36].mxu1 %v335_v58 }
 0x160   :  { %4051 = vmatprep.mubr.f32.mxu1 %v336_v59 }
 0x163   :  { %4052 = vmatmul.mubr.f32.gmra.mrb[38].mxu1 %v337_v60 }
 0x164   :  { %4054 = vmatprep.mubr.f32.mxu1 %v338_v61 }
 0x167   :  { %4055 = vmatmul.mubr.f32.gmra.mrb[40].mxu1 %v339_v62 }
 0x168   :  { %4057 = vmatprep.mubr.f32.mxu1 %v340_v63 }
 0x16b   :  { %4058 = vmatmul.mubr.f32.gmra.mrb[42].mxu1 %v341_v0 }
 0x16c   :  { %4060 = vmatprep.mubr.f32.mxu1 %v342_v1 }
 0x16f   :  { %4061 = vmatmul.mubr.f32.gmra.mrb[44].mxu1 %v343_v2  ;;  %v1049_v2 = vld [vmem:[%s6817_s4 + $0x80] sm:$0xff] }
 0x170   :  { %4063 = vmatprep.mubr.f32.mxu1 %v344_v3  ;;  %v1050_v3 = vld [vmem:[%s6817_s4 + $0x88] sm:$0xff] }
 0x173   :  { %4064 = vmatmul.mubr.f32.gmra.mrb[46].mxu1 %v345_v4 }
 0x174   :  { %4066 = vmatprep.mubr.f32.mxu1 %v346_v5 }
 0x177   :  { %4067 = vmatmul.mubr.f32.gmra.mrb[48].mxu1 %v347_v6  ;;  %v4386_v6 = vpack.c.bf16 %v1050_v3, %v1049_v2 }
 0x178   :  { %4069 = vmatprep.mubr.f32.mxu1 %v348_v7  ;;  %v1033_v7 = vld [vmem:[%s6817_s4] sm:$0xff] }
 0x179   :  { %4387 = vmatprep.subr.bf16.mxu0 %v4386_v6 }
 0x17b   :  { %4070 = vmatmul.mubr.f32.gmra.mrb[50].mxu1 %v349_v8  ;;  %v1034_v8 = vld [vmem:[%s6817_s4 + $0x8] sm:$0xff] }
 0x17c   :  { %4072 = vmatprep.mubr.f32.mxu1 %v350_v9 }
 0x17f   :  { %4073 = vmatmul.mubr.f32.gmra.mrb[52].mxu1 %v351_v10  ;;  %v4388_v10 = vpack.c.bf16 %v1034_v8, %v1033_v7  ;;  %v1041_v7 = vld [vmem:[%s6817_s4 + $0x40] sm:$0xff]  ;;  %v1042_v8 = vld [vmem:[%s6817_s4 + $0x48] sm:$0xff] }
 0x180   :  { %4075 = vmatprep.mubr.f32.mxu1 %v352_v11 }
 0x181   :  { %4389 = vmatpush3.bf16.msra.mxu0 %v4388_v10  ;;  %v4404_v10 = vpack.c.bf16 %v1042_v8, %v1041_v7 }
 0x183   :  { %4076 = vmatmul.mubr.f32.gmra.mrb[54].mxu1 %v353_v12  ;;  %v1051_v12 = vld [vmem:[%s6817_s4 + $0x90] sm:$0xff] }
 0x184   :  { %4078 = vmatprep.mubr.f32.mxu1 %v354_v13  ;;  %v1052_v13 = vld [vmem:[%s6817_s4 + $0x98] sm:$0xff] }
 0x187   :  { %4079 = vmatmul.mubr.f32.gmra.mrb[56].mxu1 %v355_v14 }
 0x188   :  { %4081 = vmatprep.mubr.f32.mxu1 %v356_v15 }
 0x18b   :  { %4082 = vmatmul.mubr.f32.gmra.mrb[58].mxu1 %v357_v16  ;;  %v4390_v16 = vpack.c.bf16 %v1052_v13, %v1051_v12  ;;  %v1060_v12 = vld [vmem:[%s6817_s4 + $0xd8] sm:$0xff] }
 0x18c   :  { %4084 = vmatprep.mubr.f32.mxu1 %v358_v17  ;;  %v1035_v17 = vld [vmem:[%s6817_s4 + $0x10] sm:$0xff] }
 0x18d   :  { %4391 = vmatprep.subr.bf16.mxu0 %v4390_v16  ;;  %v1044_v16 = vld [vmem:[%s6817_s4 + $0x58] sm:$0xff] }
 0x18f   :  { %4085 = vmatmul.mubr.f32.gmra.mrb[60].mxu1 %v359_v18  ;;  %v1036_v18 = vld [vmem:[%s6817_s4 + $0x18] sm:$0xff] }
 0x190   :  { %4087 = vmatprep.mubr.f32.mxu1 %v360_v19 }
 0x193   :  { %4088 = vmatmul.mubr.f32.gmra.mrb[62].mxu1 %v361_v20  ;;  %v4392_v20 = vpack.c.bf16 %v1036_v18, %v1035_v17 }
 0x195   :  { %4393 = vmatpush3.bf16.msra.mxu0 %v4392_v20  ;;  %v1061_v20 = vld [vmem:[%s6817_s4 + $0xe0] sm:$0xff] }
 0x1ea   :  { %v5361_v21 = vpop.f32.mrb[0].mxu1 }
 0x1eb   :  { %v5363_v22 = vpop.f32.mrb[1].mxu1 }
 0x1ee   :  { %v5365_v23 = vpop.f32.mrb[2].mxu1 }
 0x1ef   :  { %v5367_v24 = vpop.f32.mrb[3].mxu1 }
 0x1f2   :  { %v4002_v25 = vpop.f32.mrb[4].mxu1 }
 0x1f3   :  { %v448_v26 = vpop.f32.mrb[5].mxu1 }
 0x1f6   :  { %v4005_v27 = vpop.f32.mrb[6].mxu1 }
 0x1f7   :  { %v458_v28 = vpop.f32.mrb[7].mxu1 }
 0x1fa   :  { %v5369_v29 = vpop.f32.mrb[8].mxu1 }
 0x1fb   :  { %v5371_v30 = vpop.f32.mrb[9].mxu1 }
 0x1fe   :  { %v5373_v31 = vpop.f32.mrb[10].mxu1 }
 0x1ff   :  { %v5375_v32 = vpop.f32.mrb[11].mxu1 }
 0x202   :  { %v5377_v33 = vpop.f32.mrb[12].mxu1 }
 0x203   :  { %v5379_v34 = vpop.f32.mrb[13].mxu1 }
 0x206   :  { %v5381_v35 = vpop.f32.mrb[14].mxu1 }
 0x207   :  { %v5383_v36 = vpop.f32.mrb[15].mxu1 }
 0x20a   :  { %v5385_v37 = vpop.f32.mrb[16].mxu1 }
 0x20b   :  { %v5387_v38 = vpop.f32.mrb[17].mxu1 }
 0x20e   :  { %v5389_v39 = vpop.f32.mrb[18].mxu1 }
 0x20f   :  { %v5391_v40 = vpop.f32.mrb[19].mxu1 }
 0x212   :  { %v5393_v41 = vpop.f32.mrb[20].mxu1 }
 0x213   :  { %v5395_v42 = vpop.f32.mrb[21].mxu1 }
 0x216   :  { %v5397_v43 = vpop.f32.mrb[22].mxu1 }
 0x217   :  { %v5399_v44 = vpop.f32.mrb[23].mxu1 }
 0x21a   :  { %v5401_v45 = vpop.f32.mrb[24].mxu1 }
 0x21b   :  { %v5403_v46 = vpop.f32.mrb[25].mxu1 }
 0x21e   :  { %v5405_v47 = vpop.f32.mrb[26].mxu1 }
 0x21f   :  { %v5407_v48 = vpop.f32.mrb[27].mxu1 }
 0x222   :  { %v5409_v49 = vpop.f32.mrb[28].mxu1 }
 0x223   :  { %v5411_v50 = vpop.f32.mrb[29].mxu1 }
 0x226   :  { %v5413_v51 = vpop.f32.mrb[30].mxu1 }
 0x227   :  { %v5415_v52 = vpop.f32.mrb[31].mxu1 }
 0x22a   :  { %v5417_v53 = vpop.f32.mrb[32].mxu1 }
 0x22b   :  { %v5419_v54 = vpop.f32.mrb[33].mxu1 }
 0x22e   :  { %v5421_v55 = vpop.f32.mrb[34].mxu1 }
 0x22f   :  { %v5423_v56 = vpop.f32.mrb[35].mxu1 }
 0x232   :  { %v4050_v57 = vpop.f32.mrb[36].mxu1 }
 0x233   :  { %v4580_v58 = vpack.i.bf16 %v4002_v25, %v4050_v57  ;;  %v608_v59 = vpop.f32.mrb[37].mxu1 }
 0x234   :  { %v4585_v60 = vpack.i.bf16 %v448_v26, %v608_v59  ;;  %v1053_v26 = vld [vmem:[%s6817_s4 + $0xa0] sm:$0xff]  ;;  %v1055_v59 = vld [vmem:[%s6817_s4 + $0xb0] sm:$0xff] }
 0x235   :  { %4581 = vrot.lane.b32.xlu0 %v4580_v58, %s4960_s3 }
 0x236   :  { %v4053_v61 = vpop.f32.mrb[38].mxu1 }
 0x237   :  { %v4590_v62 = vpack.i.bf16 %v4005_v27, %v4053_v61  ;;  %v618_v63 = vpop.f32.mrb[39].mxu1  ;;  %v1054_v27 = vld [vmem:[%s6817_s4 + $0xa8] sm:$0xff] }
 0x238   :  { %v4595_v0 = vpack.i.bf16 %v458_v28, %v618_v63  ;;  %v1039_v63 = vld [vmem:[%s6817_s4 + $0x30] sm:$0xff] }
 0x239   :  { %4586 = vrot.lane.b32.xlu0 %v4585_v60, %s4960_s3  ;;  %v1056_v60 = vld [vmem:[%s6817_s4 + $0xb8] sm:$0xff] }
 0x23a   :  { %4596 = vrot.lane.b32.xlu1 %v4595_v0, %s4960_s3  ;;  %v4056_v1 = vpop.f32.mrb[40].mxu1  ;;  %v1040_v0 = vld [vmem:[%s6817_s4 + $0x38] sm:$0xff] }
 0x23b   :  { %v4600_v4 = vpack.i.bf16 %v5369_v29, %v4056_v1  ;;  %v628_v5 = vpop.f32.mrb[41].mxu1  ;;  %v4400_v2 = vpack.c.bf16 %v1040_v0, %v1039_v63 }
 0x23c   :  { %v4605_v9 = vpack.i.bf16 %v5371_v30, %v628_v5  ;;  %v4394_v30 = vpack.c.bf16 %v1054_v27, %v1053_v26 }
 0x23d   :  { %4591 = vrot.lane.b32.xlu0 %v4590_v62, %s4960_s3  ;;  %s4961_s3 = smov 32   ;;  %v4398_v62 = vpack.c.bf16 %v1056_v60, %v1055_v59  ;;  %v1047_v59 = vld [vmem:[%s6817_s4 + $0x70] sm:$0xff]  ;;  %v1048_v60 = vld [vmem:[%s6817_s4 + $0x78] sm:$0xff] }
 0x23e   :  { %v4059_v11 = vpop.f32.mrb[42].mxu1  ;;  %4395 = vmatprep.subr.bf16.mxu0 %v4394_v30 }
 0x23f   :  { %v4610_v14 = vpack.i.bf16 %v5373_v31, %v4059_v11  ;;  %v638_v15 = vpop.f32.mrb[43].mxu1  ;;  %v1037_v31 = vld [vmem:[%s6817_s4 + $0x20] sm:$0xff]  ;;  %v1059_v11 = vld [vmem:[%s6817_s4 + $0xd0] sm:$0xff] }
 0x240   :  { %v4615_v19 = vpack.i.bf16 %v5375_v32, %v638_v15  ;;  %v1038_v32 = vld [vmem:[%s6817_s4 + $0x28] sm:$0xff]  ;;  %v1043_v15 = vld [vmem:[%s6817_s4 + $0x50] sm:$0xff] }
 0x241   :  { %4601 = vrot.lane.b32.xlu0 %v4600_v4, %s4961_s3  ;;  %v4396_v58 = vpack.c.bf16 %v1038_v32, %v1037_v31  ;;  %v1058_v4 = vld [vmem:[%s6817_s4 + $0xc8] sm:$0xff]  ;;  %v4408_v18 = vpack.c.bf16 %v1044_v16, %v1043_v15  ;;  %v1063_v32 = vld [vmem:[%s6817_s4 + $0xf0] sm:$0xff] }
 0x242   :  { %4616 = vrot.lane.b32.xlu1 %v4615_v19, %s4961_s3  ;;  %v4062_v25 = vpop.f32.mrb[44].mxu1 }
 0x243   :  { %v4620_v28 = vpack.i.bf16 %v5377_v33, %v4062_v25  ;;  %v648_v29 = vpop.f32.mrb[45].mxu1  ;;  %4397 = vmatpush3.bf16.msra.mxu0 %v4396_v58  ;;  %v1062_v25 = vld [vmem:[%s6817_s4 + $0xe8] sm:$0xff] }
 0x244   :  { %v4625_v57 = vpack.i.bf16 %v5379_v34, %v648_v29  ;;  %4399 = vmatprep.subr.bf16.mxu0 %v4398_v62  ;;  %v1046_v29 = vld [vmem:[%s6817_s4 + $0x68] sm:$0xff] }
 0x245   :  { %4606 = vrot.lane.b32.xlu0 %v4605_v9, %s4961_s3 }
 0x246   :  { %4626 = vrot.lane.b32.xlu1 %v4625_v57, %s4962_s25  ;;  %v4065_v33 = vpop.f32.mrb[46].mxu1  ;;  %v1064_v57 = vld [vmem:[%s6817_s4 + $0xf8] sm:$0xff] }
 0x247   :  { %v4630_v61 = vpack.i.bf16 %v5381_v35, %v4065_v33  ;;  %v658_v34 = vpop.f32.mrb[47].mxu1  ;;  %4401 = vmatpush3.bf16.msra.mxu0 %v4400_v2  ;;  %v1057_v35 = vld [vmem:[%s6817_s4 + $0xc0] sm:$0xff]  ;;  %v4414_v33 = vpack.c.bf16 %v1064_v57, %v1063_v32 }
 0x248   :  { %v4635_v1 = vpack.i.bf16 %v5383_v36, %v658_v34  ;;  %v4402_v36 = vpack.c.bf16 %v1058_v4, %v1057_v35  ;;  %v4416_v34 = vpack.c.bf16 %v1048_v60, %v1047_v59 }
 0x249   :  { %4611 = vrot.lane.b32.xlu0 %v4610_v14, %s4961_s3  ;;  %v4406_v14 = vpack.c.bf16 %v1060_v12, %v1059_v11 }
 0x24a   :  { %4636 = vrot.lane.b32.xlu1 %v4635_v1, %s4962_s25  ;;  %v4068_v3 = vpop.f32.mrb[48].mxu1  ;;  %4403 = vmatprep.subr.bf16.mxu0 %v4402_v36 }
 0x24b   :  { %v4640_v5 = vpack.i.bf16 %v5385_v37, %v4068_v3  ;;  %v668_v6 = vpop.f32.mrb[49].mxu1  ;;  %4405 = vmatpush3.bf16.msra.mxu0 %v4404_v10 }
 0x24c   :  { %v4645_v9 = vpack.i.bf16 %v5387_v38, %v668_v6  ;;  %4407 = vmatprep.subr.bf16.mxu0 %v4406_v14 }
 0x24d   :  { %4621 = vrot.lane.b32.xlu0 %v4620_v28, %s4962_s25  ;;  %v1045_v28 = vld [vmem:[%s6817_s4 + $0x60] sm:$0xff]  ;;  %s4966_s4 = smov 112  }
 0x24e   :  { %4646 = vrot.lane.b32.xlu1 %v4645_v9, %s4963_s28  ;;  %v5503_v37 = vpop.f32.mrb[50].mxu1  ;;  %v4412_v31 = vpack.c.bf16 %v1046_v29, %v1045_v28 }
 0x24f   :  { %v4690_v38 = vpack.i.bf16 %v5389_v39, %v5503_v37  ;;  %v678_v13 = vpop.f32.mrb[51].mxu1  ;;  %4409 = vmatpush3.bf16.msra.mxu0 %v4408_v18 }
 0x250   :  { %v4650_v17 = vpack.i.bf16 %v5391_v40, %v678_v13  ;;  %v4410_v40 = vpack.c.bf16 %v1062_v25, %v1061_v20 }
 0x251   :  { %4631 = vrot.lane.b32.xlu0 %v4630_v61, %s4962_s25 }
 0x252   :  { %4651 = vrot.lane.b32.xlu1 %v4650_v17, %s4963_s28  ;;  %v4074_v19 = vpop.f32.mrb[52].mxu1  ;;  %4411 = vmatprep.subr.bf16.mxu0 %v4410_v40 }
 0x253   :  { %v4655_v26 = vpack.i.bf16 %v5393_v41, %v4074_v19  ;;  %v688_v27 = vpop.f32.mrb[53].mxu1  ;;  %4413 = vmatpush3.bf16.msra.mxu0 %v4412_v31 }
 0x254   :  { %v4660_v30 = vpack.i.bf16 %v5395_v42, %v688_v27  ;;  %4415 = vmatprep.subr.bf16.mxu0 %v4414_v33 }
 0x255   :  { %4641 = vrot.lane.b32.xlu0 %v4640_v5, %s4963_s28 }
 0x256   :  { %4661 = vrot.lane.b32.xlu1 %v4660_v30, %s4964_s0  ;;  %v4077_v41 = vpop.f32.mrb[54].mxu1 }
 0x257   :  { %v4700_v58 = vpack.i.bf16 %v5397_v43, %v4077_v41  ;;  %v698_v42 = vpop.f32.mrb[55].mxu1  ;;  %4417 = vmatpush3.bf16.msra.mxu0 %v4416_v34 }
 0x258   :  { %v4665_v61 = vpack.i.bf16 %v5399_v44, %v698_v42 }
 0x259   :  { %4656 = vrot.lane.b32.xlu0 %v4655_v26, %s4964_s0 }
 0x25a   :  { %4666 = vrot.lane.b32.xlu1 %v4665_v61, %s4964_s0  ;;  %v4080_v62 = vpop.f32.mrb[56].mxu1 }
 0x25b   :  { %v4670_v43 = vpack.i.bf16 %v5401_v45, %v4080_v62  ;;  %v708_v63 = vpop.f32.mrb[57].mxu1 }
 0x25c   :  { %v4675_v0 = vpack.i.bf16 %v5403_v46, %v708_v63 }
 0x25d   :  { %4671 = vrot.lane.b32.xlu0 %v4670_v43, %s4965_s21 }
 0x25e   :  { %4676 = vrot.lane.b32.xlu1 %v4675_v0, %s4965_s21  ;;  %v4083_v1 = vpop.f32.mrb[58].mxu1 }
 0x25f   :  { %v4705_v44 = vpack.i.bf16 %v5405_v47, %v4083_v1  ;;  %v718_v2 = vpop.f32.mrb[59].mxu1 }
 0x260   :  { %v4680_v3 = vpack.i.bf16 %v5407_v48, %v718_v2 }
 0x262   :  { %4681 = vrot.lane.b32.xlu1 %v4680_v3, %s4965_s21  ;;  %v4086_v35 = vpop.f32.mrb[60].mxu1 }
 0x263   :  { %v4685_v4 = vpack.i.bf16 %v5409_v49, %v4086_v35  ;;  %v728_v45 = vpop.f32.mrb[61].mxu1 }
 0x264   :  { %v4695_v5 = vpack.i.bf16 %v5411_v50, %v728_v45 }
 0x265   :  { %4686 = vrot.lane.b32.xlu0 %v4685_v4, %s4966_s4 }
 0x266   :  { %4696 = vrot.lane.b32.xlu1 %v4695_v5, %s4966_s4  ;;  %v4089_v46 = vpop.f32.mrb[62].mxu1 }
 0x267   :  { %v4715_v6 = vpack.i.bf16 %v5413_v51, %v4089_v46  ;;  %v738_v36 = vpop.f32.mrb[63].mxu1 }
 0x268   :  { %v4710_v47 = vpack.i.bf16 %v5415_v52, %v738_v36 }
 0x269   :  { %4691 = vrot.lane.b32.xlu0 %v4690_v38, %s4963_s28 }
 0x26a   :  { %4701 = vrot.lane.b32.xlu1 %v4700_v58, %s4964_s0 }
 0x26d   :  { %4706 = vrot.lane.b32.xlu0 %v4705_v44, %s4965_s21 }
 0x26e   :  { %4711 = vrot.lane.b32.xlu1 %v4710_v47, %s4966_s4 }
 0x272   :  { %4716 = vrot.lane.b32.xlu1 %v4715_v6, %s4966_s4 }
 0x2a7   :  { %v4582_v48 = vpop.permute.xlu0 %4581 }
 0x2a8   :  { %v4584_v13 = vunpack.i.h.bf16 %v4582_v48  ;;  %v4583_v14 = vunpack.i.l.bf16 %v4582_v48 }
 0x2aa   :  { %v973_v26 = vsel %vm971_vm1, %v5361_v21, %v4584_v13  ;;  %v1006_v27 = vsel %vm971_vm1, %v5417_v53, %v4583_v14 }
 0x2ab   :  { %v4587_v49 = vpop.permute.xlu0 %4586 }
 0x2ac   :  { %v4597_v7 = vpop.permute.xlu1 %4596  ;;  %v4589_v16 = vunpack.i.h.bf16 %v4587_v49  ;;  %v4588_v18 = vunpack.i.l.bf16 %v4587_v49 }
 0x2ad   :  { %v4599_v19 = vunpack.i.h.bf16 %v4597_v7  ;;  %v4598_v20 = vunpack.i.l.bf16 %v4597_v7 }
 0x2ae   :  { %v972_v28 = vsel %vm971_vm1, %v5363_v22, %v4589_v16  ;;  %v1005_v32 = vsel %vm971_vm1, %v5419_v54, %v4588_v18 }
 0x2af   :  { %v4592_v50 = vpop.permute.xlu0 %4591  ;;  %v974_v57 = vsel %vm971_vm1, %v5367_v24, %v4599_v19  ;;  %v1007_v21 = vsel %vm971_vm1, %v5423_v56, %v4598_v20 }
 0x2b0   :  { %v4594_v25 = vunpack.i.h.bf16 %v4592_v50  ;;  %v4593_v29 = vunpack.i.l.bf16 %v4592_v50 }
 0x2b2   :  { %v975_v53 = vsel %vm971_vm1, %v5365_v23, %v4594_v25  ;;  %v1008_v24 = vsel %vm971_vm1, %v5421_v55, %v4593_v29 }
 0x2b3   :  { %v4602_v8 = vpop.permute.xlu0 %4601 }
 0x2b4   :  { %v4617_v51 = vpop.permute.xlu1 %4616  ;;  %v4604_v30 = vunpack.i.h.bf16 %v4602_v8  ;;  %v4603_v22 = vunpack.i.l.bf16 %v4602_v8 }
 0x2b5   :  { %v4619_v42 = vunpack.i.h.bf16 %v4617_v51  ;;  %v4618_v33 = vunpack.i.l.bf16 %v4617_v51 }
 0x2b6   :  { %v978_v56 = vsel %vm976_vm2, %v973_v26, %v4604_v30  ;;  %v1010_v2 = vsel %vm976_vm2, %v1006_v27, %v4603_v22 }
 0x2b7   :  { %v4607_v9 = vpop.permute.xlu0 %4606  ;;  %v979_v55 = vsel %vm976_vm2, %v974_v57, %v4619_v42  ;;  %v1011_v3 = vsel %vm976_vm2, %v1007_v21, %v4618_v33 }
 0x2b8   :  { %v4627_v10 = vpop.permute.xlu1 %4626  ;;  %v4609_v40 = vunpack.i.h.bf16 %v4607_v9  ;;  %v4608_v31 = vunpack.i.l.bf16 %v4607_v9 }
 0x2b9   :  { %v4629_v59 = vunpack.i.h.bf16 %v4627_v10  ;;  %v4628_v61 = vunpack.i.l.bf16 %v4627_v10 }
 0x2ba   :  { %v977_v60 = vsel %vm976_vm2, %v972_v28, %v4609_v40  ;;  %v1009_v23 = vsel %vm976_vm2, %v1005_v32, %v4608_v31 }
 0x2bb   :  { %v4612_v52 = vpop.permute.xlu0 %4611  ;;  %v982_v35 = vsel %vm981_vm3, %v977_v60, %v4629_v59  ;;  %v1013_v4 = vsel %vm981_vm3, %v1009_v23, %v4628_v61 }
 0x2bc   :  { %v5571_v11 = vpop.permute.xlu1 %4636  ;;  %v4614_v54 = vunpack.i.h.bf16 %v4612_v52  ;;  %v4613_v34 = vunpack.i.l.bf16 %v4612_v52 }
 0x2bd   :  { %v4639_v62 = vunpack.i.h.bf16 %v5571_v11  ;;  %v4638_v46 = vunpack.i.l.bf16 %v5571_v11 }
 0x2be   :  { %v980_v45 = vsel %vm976_vm2, %v975_v53, %v4614_v54  ;;  %v1012_v5 = vsel %vm976_vm2, %v1008_v24, %v4613_v34 }
 0x2bf   :  { %v5573_v12 = vpop.permute.xlu0 %4621  ;;  %v984_v36 = vsel %vm981_vm3, %v979_v55, %v4639_v62 }
 0x2c0   :  { %v5575_v39 = vpop.permute.xlu1 %4646  ;;  %v4624_v63 = vunpack.i.h.bf16 %v5573_v12  ;;  %v4623_v0 = vunpack.i.l.bf16 %v5573_v12 }
 0x2c1   :  { %v4649_v1 = vunpack.i.h.bf16 %v5575_v39  ;;  %v4648_v44 = vunpack.i.l.bf16 %v5575_v39 }
 0x2c2   :  { %v983_v7 = vsel %vm981_vm3, %v978_v56, %v4624_v63  ;;  %v1014_v8 = vsel %vm981_vm3, %v1010_v2, %v4623_v0 }
 0x2c3   :  { %v5577_v37 = vpop.permute.xlu0 %4631  ;;  %v986_v51 = vsel %vm88_vm0, %v982_v35, %v4649_v1  ;;  %v1017_v9 = vsel %vm88_vm0, %v1013_v4, %v4648_v44 }
 0x2c4   :  { %v5579_v38 = vpop.permute.xlu1 %4651  ;;  %v4634_v10 = vunpack.i.h.bf16 %v5577_v37  ;;  %v4633_v52 = vunpack.i.l.bf16 %v5577_v37 }
 0x2c5   :  { %v4654_v39 = vunpack.i.h.bf16 %v5579_v38  ;;  %v4653_v13 = vunpack.i.l.bf16 %v5579_v38 }
 0x2c6   :  { %v985_v62 = vsel %vm981_vm3, %v980_v45, %v4634_v10  ;;  %v1016_v44 = vsel %vm981_vm3, %v1012_v5, %v4633_v52 }
 0x2c7   :  { %v5581_v15 = vpop.permute.xlu0 %4641  ;;  %v988_v60 = vsel %vm88_vm0, %v984_v36, %v4654_v39 }
 0x2c8   :  { %v5583_v17 = vpop.permute.xlu1 %4661  ;;  %v4643_v47 = vunpack.i.l.bf16 %v5581_v15  ;;  %v4644_v14 = vunpack.i.h.bf16 %v5581_v15 }
 0x2c9   :  { %v4664_v48 = vunpack.i.h.bf16 %v5583_v17  ;;  %v4663_v49 = vunpack.i.l.bf16 %v5583_v17 }
 0x2ca   :  { %v1018_v18 = vsel %vm88_vm0, %v1014_v8, %v4643_v47  ;;  %v987_v61 = vsel %vm88_vm0, %v983_v7, %v4644_v14 }
 0x2cb   :  { %v5601_v58 = vpop.permute.xlu0 %4656  ;;  %v991_v19 = vsel %vm990_vm4, %v986_v51, %v4664_v48  ;;  %v1021_v26 = vsel %vm990_vm4, %v1017_v9, %v4663_v49 }
 0x2cc   :  { %v5591_v41 = vpop.permute.xlu1 %4666  ;;  %v4658_v16 = vunpack.i.l.bf16 %v5601_v58  ;;  %v4659_v37 = vunpack.i.h.bf16 %v5601_v58 }
 0x2cd   :  { %v4669_v38 = vunpack.i.h.bf16 %v5591_v41  ;;  %v4668_v15 = vunpack.i.l.bf16 %v5591_v41  ;;  %v1015_v41 = vsel %vm981_vm3, %v1011_v3, %v4638_v46 }
 0x2ce   :  { %v1022_v53 = vsel %vm990_vm4, %v1018_v18, %v4658_v16  ;;  %v1019_v34 = vsel %vm88_vm0, %v1015_v41, %v4653_v13  ;;  %v992_v23 = vsel %vm990_vm4, %v987_v61, %v4659_v37  ;;  %v5674_v13 = vld [vmem:[%s6819_s6] sm:$0xff]  ;;  %v5717_v61 = vld [vmem:[%s6819_s6 + $0x30] sm:$0xff] }
 0x2cf   :  { %v4672_v6 = vpop.permute.xlu0 %4671  ;;  %v1023_v0 = vsel %vm990_vm4, %v1019_v34, %v4668_v15  ;;  %v993_v1 = vsel %vm990_vm4, %v988_v60, %v4669_v38  ;;  %v3352_v18 = vld [vmem:[%s6818_s5] ss:$0 sm:$0xff]  ;;  %v5712_v60 = vld [vmem:[%s6819_s6 + $0x28] sm:$0xff] }
 0x2d0   :  { %v4677_v43 = vpop.permute.xlu1 %4676  ;;  %v4673_v20 = vunpack.i.l.bf16 %v4672_v6  ;;  %v4674_v31 = vunpack.i.h.bf16 %v4672_v6  ;;  %v5703_v41 = vld [vmem:[%s6819_s6 + $0x20] sm:$0xff] }
 0x2d1   :  { %v4679_v11 = vunpack.i.h.bf16 %v4677_v43  ;;  %v4678_v12 = vunpack.i.l.bf16 %v4677_v43  ;;  %v5731_v34 = vld [vmem:[%s6819_s6 + $0x40] sm:$0xff] }
 0x2d2   :  { %v1026_v59 = vsel %vm995_vm5, %v1022_v53, %v4673_v20  ;;  %v997_v63 = vsel %vm995_vm5, %v992_v23, %v4674_v31  ;;  %v5754_v23 = vld [vmem:[%s6819_s6 + $0x58] sm:$0xff] }
 0x2d3   :  { %v996_v29 = vsel %vm995_vm5, %v991_v19, %v4679_v11  ;;  %v1025_v30 = vsel %vm995_vm5, %v1021_v26, %v4678_v12 }
 0x2d4   :  { %v4682_v50 = vpop.permute.xlu1 %4681 }
 0x2d5   :  { %v4684_v58 = vunpack.i.h.bf16 %v4682_v50  ;;  %v4683_v22 = vunpack.i.l.bf16 %v4682_v50 }
 0x2d7   :  { %v4687_v17 = vpop.permute.xlu0 %4686  ;;  %v1027_v3 = vsel %vm995_vm5, %v1023_v0, %v4683_v22  ;;  %v998_v35 = vsel %vm995_vm5, %v993_v1, %v4684_v58  ;;  %v5782_v0 = vld [vmem:[%s6819_s6 + $0x78] sm:$0xff]  ;;  %v5787_v1 = vld [vmem:[%s6819_s6 + $0x80] sm:$0xff] }
 0x2d8   :  { %v4697_v25 = vpop.permute.xlu1 %4696  ;;  %v4688_v27 = vunpack.i.l.bf16 %v4687_v17  ;;  %v4689_v42 = vunpack.i.h.bf16 %v4687_v17 }
 0x2d9   :  { %v4699_v40 = vunpack.i.h.bf16 %v4697_v25  ;;  %v4698_v28 = vunpack.i.l.bf16 %v4697_v25 }
 0x2da   :  { %v1030_v54 = vsel %vm1000_vm6, %v1026_v59, %v4688_v27  ;;  %v1002_v55 = vsel %vm1000_vm6, %v997_v63, %v4689_v42  ;;  %v5684_v42 = vld [vmem:[%s6819_s6 + $0x8] sm:$0xff]  ;;  %v5698_v59 = vld [vmem:[%s6819_s6 + $0x18] sm:$0xff]  ;;  %v5773_v63 = vld [vmem:[%s6819_s6 + $0x70] sm:$0xff] }
 0x2db   :  { %v4692_v32 = vpop.permute.xlu0 %4691  ;;  %v1029_v57 = vsel %vm1000_vm6, %v1025_v30, %v4698_v28  ;;  %v1001_v21 = vsel %vm1000_vm6, %v996_v29, %v4699_v40 }
 0x2dc   :  { %v4702_v33 = vpop.permute.xlu1 %4701  ;;  %1136 = vmatprep.mubr.f32.mxu0 %v1029_v57  ;;  %v4694_v24 = vunpack.i.h.bf16 %v4692_v32  ;;  %v4693_v56 = vunpack.i.l.bf16 %v4692_v32 }
 0x2dd   :  { %1137 = vmatmul.mubr.f32.vlgmr.msra.gmra.mrb[16].mxu0 %v1001_v21  ;;  %v4704_v4 = vunpack.i.h.bf16 %v4702_v33  ;;  %v4703_v46 = vunpack.i.l.bf16 %v4702_v33  ;;  %v5689_v33 = vld [vmem:[%s6819_s6 + $0x10] sm:$0xff] }
 0x2de   :  { %1141 = vmatprep.mubr.f32.mxu0 %v1030_v54  ;;  %v989_v36 = vsel %vm88_vm0, %v985_v62, %v4694_v24  ;;  %v1020_v47 = vsel %vm88_vm0, %v1016_v44, %v4693_v56  ;;  %v5726_v54 = vld [vmem:[%s6819_s6 + $0x38] sm:$0xff]  ;;  %v5740_v24 = vld [vmem:[%s6819_s6 + $0x48] sm:$0xff]  ;;  %v5745_v56 = vld [vmem:[%s6819_s6 + $0x50] sm:$0xff] }
 0x2df   :  { %v4707_v43 = vpop.permute.xlu0 %4706  ;;  %v1024_v9 = vsel %vm990_vm4, %v1020_v47, %v4703_v46  ;;  %v994_v10 = vsel %vm990_vm4, %v989_v36, %v4704_v4  ;;  %v5759_v62 = vld [vmem:[%s6819_s6 + $0x60] sm:$0xff]  ;;  %v5796_v44 = vld [vmem:[%s6819_s6 + $0x88] sm:$0xff]  ;;  %v5829_v4 = vld [vmem:[%s6819_s6 + $0xb0] sm:$0xff] }
 0x2e0   :  { %v4712_v2 = vpop.permute.xlu1 %4711  ;;  %v4709_v48 = vunpack.i.h.bf16 %v4707_v43  ;;  %v4708_v49 = vunpack.i.l.bf16 %v4707_v43  ;;  %v5768_v43 = vld [vmem:[%s6819_s6 + $0x68] sm:$0xff]  ;;  %v5838_v46 = vld [vmem:[%s6819_s6 + $0xb8] sm:$0xff]  ;;  %v5857_v36 = vld [vmem:[%s6819_s6 + $0xd0] sm:$0xff] }
 0x2e1   :  { %v4714_v6 = vunpack.i.h.bf16 %v4712_v2  ;;  %v4713_v45 = vunpack.i.l.bf16 %v4712_v2  ;;  %1142 = vmatmul.mubr.f32.gmra.mrb[18].mxu0 %v1002_v55  ;;  %v5801_v2 = vld [vmem:[%s6819_s6 + $0x90] sm:$0xff]  ;;  %v5810_v55 = vld [vmem:[%s6819_s6 + $0x98] sm:$0xff]  ;;  %6847 = vst [vmem:[#allocation5_spill] sm:$0xff] %v5857_v36 }
 0x2e2   :  { %v1028_v52 = vsel %vm995_vm5, %v1024_v9, %v4708_v49  ;;  %v999_v11 = vsel %vm995_vm5, %v994_v10, %v4709_v48  ;;  %v5866_v47 = vld [vmem:[%s6819_s6 + $0xd8] sm:$0xff]  ;;  %v5871_v48 = vld [vmem:[%s6819_s6 + $0xe0] sm:$0xff]  ;;  %v5880_v49 = vld [vmem:[%s6819_s6 + $0xe8] sm:$0xff] }
 0x2e3   :  { %v1031_v5 = vsel %vm1000_vm6, %v1027_v3, %v4713_v45  ;;  %v1003_v50 = vsel %vm1000_vm6, %v998_v35, %v4714_v6  ;;  %v5815_v3 = vld [vmem:[%s6819_s6 + $0xa0] sm:$0xff]  ;;  %v5824_v35 = vld [vmem:[%s6819_s6 + $0xa8] sm:$0xff]  ;;  %6848 = vst [vmem:[#allocation6_spill] sm:$0xff] %v5866_v47  ;;  %6849 = vst [vmem:[#allocation7_spill] sm:$0xff] %v5871_v48 }
 0x2e4   :  { %v4717_v7 = vpop.permute.xlu1 %4716  ;;  %1146 = vmatprep.mubr.f32.mxu0 %v1031_v5  ;;  %v5843_v6 = vld [vmem:[%s6819_s6 + $0xc0] sm:$0xff]  ;;  %v5852_v45 = vld [vmem:[%s6819_s6 + $0xc8] sm:$0xff]  ;;  %6850 = vst [vmem:[#allocation8_spill] sm:$0xff] %v5880_v49  ;;  %v5885_v5 = vld [vmem:[%s6819_s6 + $0xf0] sm:$0xff] }
 0x2e5   :  { %v4719_v8 = vunpack.i.h.bf16 %v4717_v7  ;;  %v4718_v51 = vunpack.i.l.bf16 %v4717_v7  ;;  %1147 = vmatmul.mubr.f32.gmra.mrb[20].mxu0 %v1003_v50  ;;  %6851 = vst [vmem:[#allocation9_spill] sm:$0xff] %v5885_v5  ;;  %v5894_v50 = vld [vmem:[%s6819_s6 + $0xf8] sm:$0xff]  ;;  %v5899_v7 = vld [vmem:[%s6819_s6 + $0x100] sm:$0xff] }
 0x2e6   :  { %6852 = vst [vmem:[#allocation10_spill] sm:$0xff] %v5894_v50  ;;  %6853 = vst [vmem:[#allocation11_spill] sm:$0xff] %v5899_v7  ;;  %v5922_v9 = vld [vmem:[%s6819_s6 + $0x118] sm:$0xff]  ;;  %v1686_v10 = vld [vmem:[%s6820_s7 + $0x80] sm:$0xff] }
 0x2e7   :  { %v1032_v12 = vsel %vm1000_vm6, %v1028_v52, %v4718_v51  ;;  %v1004_v39 = vsel %vm1000_vm6, %v999_v11, %v4719_v8  ;;  %v5908_v8 = vld [vmem:[%s6819_s6 + $0x108] sm:$0xff]  ;;  %v5913_v51 = vld [vmem:[%s6819_s6 + $0x110] sm:$0xff]  ;;  %6856 = vst [vmem:[#allocation14_spill] sm:$0xff] %v5922_v9  ;;  %v1670_v11 = vld [vmem:[%s6820_s7] sm:$0xff] }
 0x2e8   :  { %1151 = vmatprep.mubr.f32.mxu0 %v1032_v12  ;;  %6854 = vst [vmem:[#allocation12_spill] sm:$0xff] %v5908_v8  ;;  %6855 = vst [vmem:[#allocation13_spill] sm:$0xff] %v5913_v51  ;;  %v1687_v52 = vld [vmem:[%s6820_s7 + $0x88] sm:$0xff] }
 0x2e9   :  { %1152 = vmatmul.mubr.f32.gmra.mrb[22].mxu0 %v1004_v39  ;;  %v4426_v12 = vpack.c.bf16 %v1687_v52, %v1686_v10  ;;  %v1671_v39 = vld [vmem:[%s6820_s7 + $0x8] sm:$0xff]  ;;  %v1696_v52 = vld [vmem:[%s6820_s7 + $0xd0] sm:$0xff] }
 0x2ea   :  { %4098 = vmatprep.mubr.msk.f32.mxu0 %vm976_vm2, %v5674_v13  ;;  %v1679_v10 = vld [vmem:[%s6820_s7 + $0x48] sm:$0xff] }
 0x3b0   :  { %v3622_v14 = vpop.f32.mrb[16].mxu0 }
 0x3b1   :  { %v3623_v16 = vpop.f32.mrb[17].mxu0 }
 0x3b2   :  { %v3624_v17 = vadd.f32 %v3623_v16, %v3622_v14  ;;  %v1688_v14 = vld [vmem:[%s6820_s7 + $0x90] sm:$0xff]  ;;  %v1689_v16 = vld [vmem:[%s6820_s7 + $0x98] sm:$0xff] }
 0x3b4   :  { %v3625_v19 = vpop.f32.mrb[18].mxu0  ;;  %v1139_v25 = vadd.f32 %v3624_v17, %v3352_v18  ;;  %v4428_v17 = vpack.c.bf16 %v1671_v39, %v1670_v11  ;;  %v1697_v11 = vld [vmem:[%s6820_s7 + $0xd8] sm:$0xff] }
 0x3b5   :  { %v3626_v20 = vpop.f32.mrb[19].mxu0  ;;  %v4446_v39 = vpack.c.bf16 %v1697_v11, %v1696_v52  ;;  %v1699_v52 = vld [vmem:[%s6820_s7 + $0xe8] sm:$0xff] }
 0x3b6   :  { %v3627_v26 = vadd.f32 %v3626_v20, %v3625_v19  ;;  %v1157_v28 = vmax.f32 %v1139_v25, 0.0  ;;  %v1672_v19 = vld [vmem:[%s6820_s7 + $0x10] sm:$0xff]  ;;  %v1673_v20 = vld [vmem:[%s6820_s7 + $0x18] sm:$0xff]  ;;  %v1690_v25 = vld [vmem:[%s6820_s7 + $0xa0] sm:$0xff] }
 0x3b8   :  { %v1144_v37 = vadd.f32 %v3627_v26, %v3352_v18  ;;  %v3628_v27 = vpop.f32.mrb[20].mxu0  ;;  %v1691_v26 = vld [vmem:[%s6820_s7 + $0xa8] sm:$0xff] }
 0x3b9   :  { %v3629_v40 = vpop.f32.mrb[21].mxu0 }
 0x3ba   :  { %v1158_v38 = vmax.f32 %v1144_v37, 0.0  ;;  %v3630_v15 = vadd.f32 %v3629_v40, %v3628_v27  ;;  %v4432_v37 = vpack.c.bf16 %v1673_v20, %v1672_v19  ;;  %v4434_v27 = vpack.c.bf16 %v1691_v26, %v1690_v25  ;;  %v1674_v40 = vld [vmem:[%s6820_s7 + $0x20] sm:$0xff] }
 0x3bc   :  { %v3631_v29 = vpop.f32.mrb[22].mxu0  ;;  %v4418_v30 = vpack.c.bf16 %v1158_v38, %v1157_v28  ;;  %v1149_v32 = vadd.f32 %v3630_v15, %v3352_v18  ;;  %v1675_v28 = vld [vmem:[%s6820_s7 + $0x28] sm:$0xff]  ;;  %v1692_v38 = vld [vmem:[%s6820_s7 + $0xb0] sm:$0xff]  ;;  %v1693_v15 = vld [vmem:[%s6820_s7 + $0xb8] sm:$0xff] }
 0x3bd   :  { %v3632_v31 = vpop.f32.mrb[23].mxu0 }
 0x3be   :  { %v3633_v57 = vadd.f32 %v3632_v31, %v3631_v29  ;;  %4419 = vmatprep.subr.bf16.mxu0 %v4418_v30  ;;  %v1159_v53 = vmax.f32 %v1149_v32, 0.0  ;;  %v4436_v29 = vpack.c.bf16 %v1675_v28, %v1674_v40  ;;  %v1676_v31 = vld [vmem:[%s6820_s7 + $0x30] sm:$0xff]  ;;  %v1677_v32 = vld [vmem:[%s6820_s7 + $0x38] sm:$0xff] }
 0x3bf   :  { %4421 = vmatpush3.bf16.msra.mxu0 %v4418_v30  ;;  %v4438_v30 = vpack.c.bf16 %v1693_v15, %v1692_v38 }
 0x3c0   :  { %v1154_v21 = vadd.f32 %v3633_v57, %v3352_v18  ;;  %v4430_v18 = vpack.c.bf16 %v1689_v16, %v1688_v14  ;;  %v1694_v57 = vld [vmem:[%s6820_s7 + $0xc0] sm:$0xff] }
 0x3c2   :  { %v1160_v58 = vmax.f32 %v1154_v21, 0.0  ;;  %v1695_v21 = vld [vmem:[%s6820_s7 + $0xc8] sm:$0xff] }
 0x3c4   :  { %v4422_v22 = vpack.c.bf16 %v1160_v58, %v1159_v53  ;;  %v4440_v53 = vpack.c.bf16 %v1677_v32, %v1676_v31  ;;  %v4442_v58 = vpack.c.bf16 %v1695_v21, %v1694_v57  ;;  %v1680_v31 = vld [vmem:[%s6820_s7 + $0x50] sm:$0xff]  ;;  %v1681_v32 = vld [vmem:[%s6820_s7 + $0x58] sm:$0xff] }
 0x3c5   :  { %v4448_v57 = vpack.c.bf16 %v1681_v32, %v1680_v31  ;;  %v1682_v32 = vld [vmem:[%s6820_s7 + $0x60] sm:$0xff] }
 0x3c6   :  { %4423 = vmatprep.subr.bf16.mxu0 %v4422_v22 }
 0x3c7   :  { %4425 = vmatpush3.bf16.msra.mxu0 %v4422_v22  ;;  %v1678_v22 = vld [vmem:[%s6820_s7 + $0x40] sm:$0xff] }
 0x3c8   :  { %4427 = vmatprep.subr.bf16.mxu0 %v4426_v12  ;;  %v4444_v12 = vpack.c.bf16 %v1679_v10, %v1678_v22  ;;  %v1698_v10 = vld [vmem:[%s6820_s7 + $0xe0] sm:$0xff] }
 0x3c9   :  { %v4450_v11 = vpack.c.bf16 %v1699_v52, %v1698_v10  ;;  %v1701_v10 = vld [vmem:[%s6820_s7 + $0xf8] sm:$0xff] }
 0x3ca   :  { %4099 = vmatmul.mubr.msk.f32.vlgmr.msra.gmra.mrb[24].mxu0 %vm976_vm2, %v5684_v42 }
 0x3cb   :  { %4101 = vmatprep.mubr.msk.f32.mxu0 %vm976_vm2, %v5689_v33  ;;  %4429 = vmatpush3.bf16.msra.mxu0 %v4428_v17 }
 0x3cc   :  { %4431 = vmatprep.subr.bf16.mxu0 %v4430_v18 }
 0x3ce   :  { %4102 = vmatmul.mubr.msk.f32.gmra.mrb[26].mxu0 %vm976_vm2, %v5698_v59 }
 0x3cf   :  { %4104 = vmatprep.mubr.msk.f32.mxu0 %vm976_vm2, %v5703_v41  ;;  %4433 = vmatpush3.bf16.msra.mxu0 %v4432_v37 }
 0x3d0   :  { %4435 = vmatprep.subr.bf16.mxu0 %v4434_v27 }
 0x3d2   :  { %4105 = vmatmul.mubr.msk.f32.gmra.mrb[28].mxu0 %vm976_vm2, %v5712_v60 }
 0x3d3   :  { %4107 = vmatprep.mubr.msk.f32.mxu0 %vm976_vm2, %v5717_v61  ;;  %4437 = vmatpush3.bf16.msra.mxu0 %v4436_v29 }
 0x3d4   :  { %4439 = vmatprep.subr.bf16.mxu0 %v4438_v30 }
 0x3d6   :  { %4108 = vmatmul.mubr.msk.f32.gmra.mrb[30].mxu0 %vm976_vm2, %v5726_v54 }
 0x3d7   :  { %4110 = vmatprep.mubr.msk.f32.mxu0 %vm976_vm2, %v5731_v34  ;;  %4441 = vmatpush3.bf16.msra.mxu0 %v4440_v53 }
 0x3d8   :  { %4443 = vmatprep.subr.bf16.mxu0 %v4442_v58 }
 0x3da   :  { %4111 = vmatmul.mubr.msk.f32.gmra.mrb[32].mxu0 %vm976_vm2, %v5740_v24 }
 0x3db   :  { %4113 = vmatprep.mubr.msk.f32.mxu0 %vm976_vm2, %v5745_v56  ;;  %4445 = vmatpush3.bf16.msra.mxu0 %v4444_v12 }
 0x3dc   :  { %4447 = vmatprep.subr.bf16.mxu0 %v4446_v39 }
 0x3de   :  { %4114 = vmatmul.mubr.msk.f32.gmra.mrb[34].mxu0 %vm976_vm2, %v5754_v23 }
 0x3df   :  { %4116 = vmatprep.mubr.msk.f32.mxu0 %vm976_vm2, %v5759_v62  ;;  %4449 = vmatpush3.bf16.msra.mxu0 %v4448_v57  ;;  %v1683_v57 = vld [vmem:[%s6820_s7 + $0x68] sm:$0xff] }
 0x3e0   :  { %4451 = vmatprep.subr.bf16.mxu0 %v4450_v11 }
 0x3e2   :  { %4117 = vmatmul.mubr.msk.f32.gmra.mrb[36].mxu0 %vm976_vm2, %v5768_v43 }
 0x3e3   :  { %4119 = vmatprep.mubr.msk.f32.mxu0 %vm976_vm2, %v5773_v63 }
 0x3e6   :  { %4120 = vmatmul.mubr.msk.f32.gmra.mrb[38].mxu0 %vm976_vm2, %v5782_v0 }
 0x3e7   :  { %4122 = vmatprep.mubr.msk.f32.mxu0 %vm976_vm2, %v5787_v1 }
 0x3ea   :  { %4123 = vmatmul.mubr.msk.f32.gmra.mrb[40].mxu0 %vm976_vm2, %v5796_v44 }
 0x3eb   :  { %4125 = vmatprep.mubr.msk.f32.mxu0 %vm976_vm2, %v5801_v2 }
 0x3ee   :  { %4126 = vmatmul.mubr.msk.f32.gmra.mrb[42].mxu0 %vm976_vm2, %v5810_v55 }
 0x3ef   :  { %4128 = vmatprep.mubr.msk.f32.mxu0 %vm976_vm2, %v5815_v3 }
 0x3f2   :  { %4129 = vmatmul.mubr.msk.f32.gmra.mrb[44].mxu0 %vm976_vm2, %v5824_v35 }
 0x3f3   :  { %4131 = vmatprep.mubr.msk.f32.mxu0 %vm976_vm2, %v5829_v4 }
 0x3f6   :  { %4132 = vmatmul.mubr.msk.f32.gmra.mrb[46].mxu0 %vm976_vm2, %v5838_v46 }
 0x3f7   :  { %4134 = vmatprep.mubr.msk.f32.mxu0 %vm976_vm2, %v5843_v6 }
 0x3fa   :  { %4135 = vmatmul.mubr.msk.f32.gmra.mrb[48].mxu0 %vm976_vm2, %v5852_v45 }
 0x3fb   :  { %4137 = vmatprep.mubr.msk.f32.mxu0 %vm976_vm2, %v5857_v36 }
 0x3fe   :  { %4138 = vmatmul.mubr.msk.f32.gmra.mrb[50].mxu0 %vm976_vm2, %v5866_v47 }
 0x3ff   :  { %4140 = vmatprep.mubr.msk.f32.mxu0 %vm976_vm2, %v5871_v48 }
 0x402   :  { %4141 = vmatmul.mubr.msk.f32.gmra.mrb[52].mxu0 %vm976_vm2, %v5880_v49 }
 0x403   :  { %4143 = vmatprep.mubr.msk.f32.mxu0 %vm976_vm2, %v5885_v5 }
 0x406   :  { %4144 = vmatmul.mubr.msk.f32.gmra.mrb[54].mxu0 %vm976_vm2, %v5894_v50 }
 0x407   :  { %4146 = vmatprep.mubr.msk.f32.mxu0 %vm976_vm2, %v5899_v7 }
 0x40a   :  { %4147 = vmatmul.mubr.msk.f32.gmra.mrb[56].mxu0 %vm976_vm2, %v5908_v8 }
 0x40b   :  { %4149 = vmatprep.mubr.msk.f32.mxu0 %vm976_vm2, %v5913_v51  ;;  %v4452_v51 = vpack.c.bf16 %v1683_v57, %v1682_v32 }
 0x40d   :  { %4453 = vmatpush3.bf16.msra.mxu0 %v4452_v51  ;;  %v1685_v51 = vld [vmem:[%s6820_s7 + $0x78] sm:$0xff] }
 0x40e   :  { %4150 = vmatmul.mubr.msk.f32.gmra.mrb[58].mxu0 %vm976_vm2, %v5922_v9 }
 0x49d   :  { %v5992_v14 = vpop.f32.mrb[24].mxu0 }
 0x49e   :  { %v5994_v16 = vpop.f32.mrb[25].mxu0 }
 0x4a1   :  { %v5996_v17 = vpop.f32.mrb[26].mxu0 }
 0x4a2   :  { %v5998_v18 = vpop.f32.mrb[27].mxu0 }
 0x4a5   :  { %v4106_v19 = vpop.f32.mrb[28].mxu0 }
 0x4a6   :  { %v1391_v20 = vpop.f32.mrb[29].mxu0 }
 0x4a9   :  { %v6000_v25 = vpop.f32.mrb[30].mxu0 }
 0x4aa   :  { %v6002_v26 = vpop.f32.mrb[31].mxu0 }
 0x4ad   :  { %v4112_v37 = vpop.f32.mrb[32].mxu0 }
 0x4ae   :  { %v1411_v27 = vpop.f32.mrb[33].mxu0 }
 0x4b1   :  { %v6004_v40 = vpop.f32.mrb[34].mxu0 }
 0x4b2   :  { %v6006_v28 = vpop.f32.mrb[35].mxu0 }
 0x4b5   :  { %v4118_v38 = vpop.f32.mrb[36].mxu0 }
 0x4b6   :  { %v1431_v15 = vpop.f32.mrb[37].mxu0 }
 0x4b9   :  { %v6008_v29 = vpop.f32.mrb[38].mxu0 }
 0x4ba   :  { %v6010_v30 = vpop.f32.mrb[39].mxu0 }
 0x4bd   :  { %v6018_v21 = vpop.f32.mrb[40].mxu0 }
 0x4be   :  { %v6020_v53 = vpop.f32.mrb[41].mxu0 }
 0x4c1   :  { %v6022_v58 = vpop.f32.mrb[42].mxu0 }
 0x4c2   :  { %v6024_v22 = vpop.f32.mrb[43].mxu0 }
 0x4c5   :  { %v4130_v12 = vpop.f32.mrb[44].mxu0 }
 0x4c6   :  { %v4720_v39 = vpack.i.bf16 %v4106_v19, %v4130_v12  ;;  %v1471_v31 = vpop.f32.mrb[45].mxu0  ;;  %v1700_v19 = vld [vmem:[%s6820_s7 + $0xf0] sm:$0xff] }
 0x4c7   :  { %v4725_v9 = vpack.i.bf16 %v1391_v20, %v1471_v31  ;;  %v4454_v12 = vpack.c.bf16 %v1701_v10, %v1700_v19  ;;  %v1684_v20 = vld [vmem:[%s6820_s7 + $0x70] sm:$0xff] }
 0x4c8   :  { %4721 = vrot.lane.b32.xlu1 %v4720_v39, %s4961_s3  ;;  %v4456_v39 = vpack.c.bf16 %v1685_v51, %v1684_v20 }
 0x4c9   :  { %4726 = vrot.lane.b32.xlu0 %v4725_v9, %s4961_s3  ;;  %v4133_v8 = vpop.f32.mrb[46].mxu0  ;;  %4455 = vmatprep.subr.bf16.mxu0 %v4454_v12 }
 0x4ca   :  { %v4760_v52 = vpack.i.bf16 %v6000_v25, %v4133_v8  ;;  %v1481_v11 = vpop.f32.mrb[47].mxu0  ;;  %4457 = vmatpush3.bf16.msra.mxu0 %v4456_v39 }
 0x4cb   :  { %v4750_v9 = vpack.i.bf16 %v6002_v26, %v1481_v11  ;;  %v1702_v26 = vld [vmem:[%s6820_s7 + $0x100] sm:$0xff] }
 0x4cd   :  { %v4136_v31 = vpop.f32.mrb[48].mxu0 }
 0x4ce   :  { %v4730_v32 = vpack.i.bf16 %v4112_v37, %v4136_v31  ;;  %v1491_v57 = vpop.f32.mrb[49].mxu0  ;;  %v1703_v37 = vld [vmem:[%s6820_s7 + $0x108] sm:$0xff] }
 0x4cf   :  { %v4735_v7 = vpack.i.bf16 %v1411_v27, %v1491_v57  ;;  %v4458_v27 = vpack.c.bf16 %v1703_v37, %v1702_v26 }
 0x4d0   :  { %4731 = vrot.lane.b32.xlu0 %v4730_v32, %s4963_s28 }
 0x4d1   :  { %4736 = vrot.lane.b32.xlu1 %v4735_v7, %s4963_s28  ;;  %v4139_v8 = vpop.f32.mrb[50].mxu0  ;;  %4459 = vmatprep.subr.bf16.mxu0 %v4458_v27 }
 0x4d2   :  { %v4770_v25 = vpack.i.bf16 %v6004_v40, %v4139_v8  ;;  %v1501_v19 = vpop.f32.mrb[51].mxu0 }
 0x4d3   :  { %v4755_v10 = vpack.i.bf16 %v6006_v28, %v1501_v19 }
 0x4d5   :  { %v4142_v11 = vpop.f32.mrb[52].mxu0 }
 0x4d6   :  { %v4740_v12 = vpack.i.bf16 %v4118_v38, %v4142_v11  ;;  %v1511_v20 = vpop.f32.mrb[53].mxu0  ;;  %v1704_v11 = vld [vmem:[%s6820_s7 + $0x110] sm:$0xff] }
 0x4d7   :  { %v4745_v51 = vpack.i.bf16 %v1431_v15, %v1511_v20 }
 0x4d8   :  { %4741 = vrot.lane.b32.xlu1 %v4740_v12, %s4965_s21  ;;  %v1705_v12 = vld [vmem:[%s6820_s7 + $0x118] sm:$0xff]  ;;  %s3324_s7 = sshll.u32 %s4967_s23, 4  ;;  %s3325_s7 = int_to_ptr.vmem [resolvable:$true] %s3324_s7 }
 0x4d9   :  { %4746 = vrot.lane.b32.xlu0 %v4745_v51, %s4965_s21  ;;  %v4145_v7 = vpop.f32.mrb[54].mxu0  ;;  %v4462_v5 = vpack.c.bf16 %v1705_v12, %v1704_v11  ;;  %p4941_p1 = scmp.lt.s32.totalorder %s3325_s7, %s3325_s7 }
 0x4da   :  { %v4775_v40 = vpack.i.bf16 %v6008_v29, %v4145_v7  ;;  %v1521_v28 = vpop.f32.mrb[55].mxu0 }
 0x4db   :  { %v4765_v39 = vpack.i.bf16 %v6010_v30, %v1521_v28 }
 0x4dc   :  { %4756 = vrot.lane.b32.xlu1 %v4755_v10, %s4963_s28 }
 0x4dd   :  { %4751 = vrot.lane.b32.xlu0 %v4750_v9, %s4961_s3  ;;  %v6070_v31 = vpop.f32.mrb[56].mxu0 }
 0x4de   :  { %v6072_v38 = vpop.f32.mrb[57].mxu0 }
 0x4e0   :  { %4761 = vrot.lane.b32.xlu1 %v4760_v52, %s4961_s3 }
 0x4e1   :  { %4766 = vrot.lane.b32.xlu0 %v4765_v39, %s4965_s21  ;;  %v6076_v15 = vpop.f32.mrb[58].mxu0 }
 0x4e2   :  { %v6078_v32 = vpop.f32.mrb[59].mxu0 }
 0x4e4   :  { %4776 = vrot.lane.b32.xlu1 %v4775_v40, %s4965_s21 }
 0x4e5   :  { %4771 = vrot.lane.b32.xlu0 %v4770_v25, %s4963_s28 }
 0x53a   :  { %v4722_v29 = vpop.permute.xlu1 %4721 }
 0x53b   :  { %v4727_v30 = vpop.permute.xlu0 %4726  ;;  %v4723_v37 = vunpack.i.l.bf16 %v4722_v29 }
 0x53c   :  { %v4729_v9 = vunpack.i.h.bf16 %v4727_v30  ;;  %v4728_v19 = vunpack.i.l.bf16 %v4727_v30  ;;  %v4724_v30 = vunpack.i.h.bf16 %v4722_v29 }
 0x53e   :  { %v1646_v25 = vsel %vm976_vm2, %v5994_v16, %v4729_v9  ;;  %v1658_v39 = vsel %vm976_vm2, %v6020_v53, %v4728_v19  ;;  %v1659_v9 = vsel %vm976_vm2, %v6018_v21, %v4723_v37 }
 0x542   :  { %v4732_v8 = vpop.permute.xlu0 %4731 }
 0x543   :  { %v4737_v57 = vpop.permute.xlu1 %4736  ;;  %v4733_v20 = vunpack.i.l.bf16 %v4732_v8  ;;  %v4734_v49 = vunpack.i.h.bf16 %v4732_v8  ;;  %v1647_v8 = vsel %vm976_vm2, %v5992_v14, %v4724_v30 }
 0x544   :  { %v4739_v10 = vunpack.i.h.bf16 %v4737_v57  ;;  %v4738_v26 = vunpack.i.l.bf16 %v4737_v57 }
 0x545   :  { %v1663_v53 = vsel %vm88_vm0, %v1659_v9, %v4733_v20 }
 0x546   :  { %v1650_v57 = vsel %vm88_vm0, %v1646_v25, %v4739_v10  ;;  %v1662_v50 = vsel %vm88_vm0, %v1658_v39, %v4738_v26  ;;  %v1651_v26 = vsel %vm88_vm0, %v1647_v8, %v4734_v49 }
 0x54a   :  { %v4742_v52 = vpop.permute.xlu1 %4741 }
 0x54b   :  { %v4747_v51 = vpop.permute.xlu0 %4746  ;;  %v4743_v7 = vunpack.i.l.bf16 %v4742_v52  ;;  %v4744_v36 = vunpack.i.h.bf16 %v4742_v52 }
 0x54c   :  { %v4749_v40 = vunpack.i.h.bf16 %v4747_v51  ;;  %v4748_v28 = vunpack.i.l.bf16 %v4747_v51 }
 0x54d   :  { %v1667_v10 = vsel %vm995_vm5, %v1663_v53, %v4743_v7  ;;  %v1655_v12 = vsel %vm995_vm5, %v1651_v26, %v4744_v36 }
 0x54e   :  { %v4757_v48 = vpop.permute.xlu1 %4756  ;;  %v1666_v47 = vsel %vm995_vm5, %v1662_v50, %v4748_v28  ;;  %v1654_v16 = vsel %vm995_vm5, %v1650_v57, %v4749_v40 }
 0x54f   :  { %v4752_v51 = vpop.permute.xlu0 %4751  ;;  %1789 = vmatprep.mubr.f32.mxu0 %v1666_v47  ;;  %v4759_v37 = vunpack.i.h.bf16 %v4757_v48  ;;  %v4758_v52 = vunpack.i.l.bf16 %v4757_v48 }
 0x550   :  { %v4754_v29 = vunpack.i.h.bf16 %v4752_v51  ;;  %v4753_v19 = vunpack.i.l.bf16 %v4752_v51  ;;  %1790 = vmatmul.mubr.f32.vlgmr.msra.gmra.mrb[60].mxu0 %v1654_v16 }
 0x551   :  { %1794 = vmatprep.mubr.f32.mxu0 %v1667_v10  ;;  %4461 = vmatpush3.bf16.msra.mxu0 %v4458_v27 }
 0x552   :  { %v4762_v50 = vpop.permute.xlu1 %4761  ;;  %v1660_v21 = vsel %vm976_vm2, %v6024_v22, %v4753_v19  ;;  %v1648_v47 = vsel %vm976_vm2, %v5998_v18, %v4754_v29  ;;  %4463 = vmatprep.subr.bf16.mxu0 %v4462_v5 }
 0x553   :  { %v4767_v11 = vpop.permute.xlu0 %4766  ;;  %v4764_v14 = vunpack.i.h.bf16 %v4762_v50  ;;  %v4763_v27 = vunpack.i.l.bf16 %v4762_v50  ;;  %v1664_v7 = vsel %vm88_vm0, %v1660_v21, %v4758_v52  ;;  %v1652_v49 = vsel %vm88_vm0, %v1648_v47, %v4759_v37 }
 0x554   :  { %v4769_v25 = vunpack.i.h.bf16 %v4767_v11  ;;  %v4768_v20 = vunpack.i.l.bf16 %v4767_v11  ;;  %1795 = vmatmul.mubr.f32.gmra.mrb[62].mxu0 %v1655_v12 }
 0x555   :  { %4465 = vmatpush3.bf16.msra.mxu0 %v4462_v5  ;;  %v1661_v57 = vsel %vm976_vm2, %v6022_v58, %v4763_v27  ;;  %v1649_v16 = vsel %vm976_vm2, %v5996_v17, %v4764_v14 }
 0x556   :  { %v4777_v22 = vpop.permute.xlu1 %4776  ;;  %v1668_v40 = vsel %vm995_vm5, %v1664_v7, %v4768_v20  ;;  %v1656_v18 = vsel %vm995_vm5, %v1652_v49, %v4769_v25 }
 0x557   :  { %v4772_v28 = vpop.permute.xlu0 %4771  ;;  %1799 = vmatprep.mubr.f32.mxu0 %v1668_v40  ;;  %v4779_v36 = vunpack.i.h.bf16 %v4777_v22  ;;  %v4778_v30 = vunpack.i.l.bf16 %v4777_v22 }
 0x558   :  { %v4774_v48 = vunpack.i.h.bf16 %v4772_v28  ;;  %v4773_v39 = vunpack.i.l.bf16 %v4772_v28  ;;  %1800 = vmatmul.mubr.f32.gmra.mrb[64].mxu0 %v1656_v18 }
 0x55a   :  { %v1665_v5 = vsel %vm88_vm0, %v1661_v57, %v4773_v39  ;;  %v1653_v9 = vsel %vm88_vm0, %v1649_v16, %v4774_v48  ;;  %v2286_v57 = vld [vmem:[%s6822_s9 + $0xb0] sm:$0xff]  ;;  %v2287_v16 = vld [vmem:[%s6822_s9 + $0xb8] sm:$0xff] }
 0x55b   :  { %v1669_v51 = vsel %vm995_vm5, %v1665_v5, %v4778_v30  ;;  %v1657_v53 = vsel %vm995_vm5, %v1653_v9, %v4779_v36  ;;  %v2269_v36 = vld [vmem:[%s6822_s9 + $0x28] sm:$0xff]  ;;  %v4486_v9 = vpack.c.bf16 %v2287_v16, %v2286_v57 }
 0x55c   :  { %1804 = vmatprep.mubr.f32.mxu0 %v1669_v51  ;;  %v2270_v51 = vld [vmem:[%s6822_s9 + $0x30] sm:$0xff] }
 0x55d   :  { %1805 = vmatmul.mubr.f32.gmra.mrb[66].mxu0 %v1657_v53  ;;  %v2271_v53 = vld [vmem:[%s6822_s9 + $0x38] sm:$0xff] }
 0x55e   :  { %4160 = vmatprep.mubr.msk.f32.mxu0 %vm976_vm2, %v6072_v38 }
 0x561   :  { %4161 = vmatmul.mubr.msk.f32.vlgmr.msra.gmra.mrb[68].mxu0 %vm976_vm2, %v6070_v31 }
 0x562   :  { %4163 = vmatprep.mubr.msk.f32.mxu0 %vm976_vm2, %v6078_v32  ;;  %v3389_v32 = vld [vmem:[%s6821_s8] ss:$0 sm:$0xff] }
 0x565   :  { %4164 = vmatmul.mubr.msk.f32.gmra.mrb[70].mxu0 %vm976_vm2, %v6076_v15 }
 0x566   :  { %4174 = vmatprep.mubr.msk.f32.mxu0 %vm976_vm2, %v5674_v13 }
 0x623   :  { %v3706_v17 = vpop.f32.mrb[60].mxu0 }
 0x624   :  { %v3707_v58 = vpop.f32.mrb[61].mxu0 }
 0x625   :  { %v3708_v29 = vadd.f32 %v3707_v58, %v3706_v17  ;;  %v2288_v17 = vld [vmem:[%s6822_s9 + $0xc0] sm:$0xff]  ;;  %v2289_v58 = vld [vmem:[%s6822_s9 + $0xc8] sm:$0xff] }
 0x627   :  { %v3709_v19 = vpop.f32.mrb[62].mxu0  ;;  %v1792_v52 = vadd.f32 %v3708_v29, %v3389_v32  ;;  %v4488_v29 = vpack.c.bf16 %v2271_v53, %v2270_v51 }
 0x628   :  { %v3710_v10 = vpop.f32.mrb[63].mxu0 }
 0x629   :  { %v3711_v8 = vadd.f32 %v3710_v10, %v3709_v19  ;;  %v4490_v19 = vpack.c.bf16 %v2289_v58, %v2288_v17  ;;  %v2272_v10 = vld [vmem:[%s6822_s9 + $0x40] sm:$0xff] }
 0x62a   :  { %v2296_v58 = vld [vmem:[%s6822_s9 + $0x100] sm:$0xff] }
 0x62b   :  { %v3712_v50 = vpop.f32.mrb[64].mxu0  ;;  %v1797_v15 = vadd.f32 %v3711_v8, %v3389_v32  ;;  %v2273_v8 = vld [vmem:[%s6822_s9 + $0x48] sm:$0xff] }
 0x62c   :  { %v3713_v38 = vpop.f32.mrb[65].mxu0 }
 0x62d   :  { %v3714_v26 = vadd.f32 %v3713_v38, %v3712_v50  ;;  %v2290_v50 = vld [vmem:[%s6822_s9 + $0xd0] sm:$0xff]  ;;  %v2291_v38 = vld [vmem:[%s6822_s9 + $0xd8] sm:$0xff] }
 0x62f   :  { %v1802_v7 = vadd.f32 %v3714_v26, %v3389_v32  ;;  %v4492_v26 = vpack.c.bf16 %v2273_v8, %v2272_v10 }
 0x630   :  { %v3715_v21 = vpop.f32.mrb[66].mxu0 }
 0x631   :  { %v3716_v31 = vpop.f32.mrb[67].mxu0 }
 0x632   :  { %v3717_v47 = vadd.f32 %v3716_v31, %v3715_v21  ;;  %v4494_v21 = vpack.c.bf16 %v2291_v38, %v2290_v50  ;;  %v2274_v31 = vld [vmem:[%s6822_s9 + $0x50] sm:$0xff] }
 0x634   :  { %v4162_v37 = vpop.f32.mrb[68].mxu0  ;;  %v1807_v20 = vadd.f32 %v3717_v47, %v3389_v32  ;;  %v2275_v32 = vld [vmem:[%s6822_s9 + $0x58] sm:$0xff]  ;;  %v2292_v47 = vld [vmem:[%s6822_s9 + $0xe0] sm:$0xff] }
 0x635   :  { %v6133_v13 = vadd.f32 %v4162_v37, %v1797_v15  ;;  %v1876_v11 = vpop.f32.mrb[69].mxu0  ;;  %v2293_v15 = vld [vmem:[%s6822_s9 + $0xe8] sm:$0xff]  ;;  %v4496_v37 = vpack.c.bf16 %v2275_v32, %v2274_v31 }
 0x636   :  { %v6135_v12 = vadd.f32 %v1876_v11, %v1792_v52  ;;  %v4498_v52 = vpack.c.bf16 %v2293_v15, %v2292_v47  ;;  %v2276_v11 = vld [vmem:[%s6822_s9 + $0x60] sm:$0xff] }
 0x637   :  { %v1896_v25 = vmax.f32 %v6133_v13, 0.0 }
 0x638   :  { %v1895_v14 = vmax.f32 %v6135_v12, 0.0  ;;  %v4165_v27 = vpop.f32.mrb[70].mxu0 }
 0x639   :  { %v6139_v49 = vadd.f32 %v4165_v27, %v1807_v20  ;;  %v1886_v22 = vpop.f32.mrb[71].mxu0 }
 0x63a   :  { %v6141_v40 = vadd.f32 %v1886_v22, %v1802_v7  ;;  %v4466_v18 = vpack.c.bf16 %v1896_v25, %v1895_v14  ;;  %v2277_v25 = vld [vmem:[%s6822_s9 + $0x68] sm:$0xff] }
 0x63b   :  { %v1898_v28 = vmax.f32 %v6139_v49, 0.0  ;;  %v4500_v20 = vpack.c.bf16 %v2277_v25, %v2276_v11 }
 0x63c   :  { %v1897_v48 = vmax.f32 %v6141_v40, 0.0  ;;  %4467 = vmatprep.subr.bf16.mxu0 %v4466_v18 }
 0x63d   :  { %4469 = vmatpush3.bf16.msra.mxu0 %v4466_v18 }
 0x63e   :  { %v4470_v39 = vpack.c.bf16 %v1898_v28, %v1897_v48 }
 0x640   :  { %4471 = vmatprep.subr.bf16.mxu0 %v4470_v39 }
 0x641   :  { %4473 = vmatpush3.bf16.msra.mxu0 %v4470_v39 }
 0x644   :  { %4175 = vmatmul.mubr.msk.f32.vlgmr.msra.gmra.mrb[72].mxu0 %vm976_vm2, %v5684_v42  ;;  %v6857_v42 = vld [vmem:[#allocation5_spill] sm:$0xff] }
 0x645   :  { %4177 = vmatprep.mubr.msk.f32.mxu0 %vm976_vm2, %v5689_v33  ;;  %v6858_v33 = vld [vmem:[#allocation6_spill] sm:$0xff] }
 0x648   :  { %4178 = vmatmul.mubr.msk.f32.gmra.mrb[74].mxu0 %vm976_vm2, %v5698_v59  ;;  %v6859_v59 = vld [vmem:[#allocation7_spill] sm:$0xff] }
 0x649   :  { %4180 = vmatprep.mubr.msk.f32.mxu0 %vm976_vm2, %v5703_v41  ;;  %v6860_v41 = vld [vmem:[#allocation8_spill] sm:$0xff] }
 0x64c   :  { %4181 = vmatmul.mubr.msk.f32.gmra.mrb[76].mxu0 %vm976_vm2, %v5712_v60  ;;  %v6861_v60 = vld [vmem:[#allocation9_spill] sm:$0xff] }
 0x64d   :  { %4183 = vmatprep.mubr.msk.f32.mxu0 %vm976_vm2, %v5717_v61  ;;  %v6862_v61 = vld [vmem:[#allocation10_spill] sm:$0xff] }
 0x650   :  { %4184 = vmatmul.mubr.msk.f32.gmra.mrb[78].mxu0 %vm976_vm2, %v5726_v54  ;;  %v6863_v54 = vld [vmem:[#allocation11_spill] sm:$0xff] }
 0x651   :  { %4186 = vmatprep.mubr.msk.f32.mxu0 %vm976_vm2, %v5731_v34  ;;  %v6864_v34 = vld [vmem:[#allocation12_spill] sm:$0xff] }
 0x654   :  { %4187 = vmatmul.mubr.msk.f32.gmra.mrb[80].mxu0 %vm976_vm2, %v5740_v24  ;;  %v6865_v24 = vld [vmem:[#allocation13_spill] sm:$0xff] }
 0x655   :  { %4189 = vmatprep.mubr.msk.f32.mxu0 %vm976_vm2, %v5745_v56  ;;  %v6866_v56 = vld [vmem:[#allocation14_spill] sm:$0xff] }
 0x658   :  { %4190 = vmatmul.mubr.msk.f32.gmra.mrb[82].mxu0 %vm976_vm2, %v5754_v23  ;;  %v2280_v23 = vld [vmem:[%s6822_s9 + $0x80] sm:$0xff] }
 0x659   :  { %4192 = vmatprep.mubr.msk.f32.mxu0 %vm976_vm2, %v5759_v62  ;;  %v2281_v62 = vld [vmem:[%s6822_s9 + $0x88] sm:$0xff] }
 0x65c   :  { %4193 = vmatmul.mubr.msk.f32.gmra.mrb[84].mxu0 %vm976_vm2, %v5768_v43  ;;  %v4474_v43 = vpack.c.bf16 %v2281_v62, %v2280_v23 }
 0x65d   :  { %4195 = vmatprep.mubr.msk.f32.mxu0 %vm976_vm2, %v5773_v63  ;;  %v2264_v63 = vld [vmem:[%s6822_s9] sm:$0xff] }
 0x65e   :  { %4475 = vmatprep.subr.bf16.mxu1 %v4474_v43 }
 0x660   :  { %4196 = vmatmul.mubr.msk.f32.gmra.mrb[86].mxu0 %vm976_vm2, %v5782_v0  ;;  %v2265_v0 = vld [vmem:[%s6822_s9 + $0x8] sm:$0xff] }
 0x661   :  { %4198 = vmatprep.mubr.msk.f32.mxu0 %vm976_vm2, %v5787_v1  ;;  %v4476_v1 = vpack.c.bf16 %v2265_v0, %v2264_v63 }
 0x663   :  { %4477 = vmatpush3.bf16.msra.mxu1 %v4476_v1  ;;  %v2294_v1 = vld [vmem:[%s6822_s9 + $0xf0] sm:$0xff] }
 0x664   :  { %4199 = vmatmul.mubr.msk.f32.gmra.mrb[88].mxu0 %vm976_vm2, %v5796_v44  ;;  %v2282_v44 = vld [vmem:[%s6822_s9 + $0x90] sm:$0xff] }
 0x665   :  { %4201 = vmatprep.mubr.msk.f32.mxu0 %vm976_vm2, %v5801_v2  ;;  %v2283_v2 = vld [vmem:[%s6822_s9 + $0x98] sm:$0xff] }
 0x668   :  { %4202 = vmatmul.mubr.msk.f32.gmra.mrb[90].mxu0 %vm976_vm2, %v5810_v55  ;;  %v4478_v55 = vpack.c.bf16 %v2283_v2, %v2282_v44  ;;  %v2295_v44 = vld [vmem:[%s6822_s9 + $0xf8] sm:$0xff]  ;;  %v2278_v2 = vld [vmem:[%s6822_s9 + $0x70] sm:$0xff] }
 0x669   :  { %4204 = vmatprep.mubr.msk.f32.mxu0 %vm976_vm2, %v5815_v3  ;;  %v2266_v3 = vld [vmem:[%s6822_s9 + $0x10] sm:$0xff] }
 0x66a   :  { %4479 = vmatprep.subr.bf16.mxu1 %v4478_v55 }
 0x66c   :  { %4205 = vmatmul.mubr.msk.f32.gmra.mrb[92].mxu0 %vm976_vm2, %v5824_v35  ;;  %v2267_v35 = vld [vmem:[%s6822_s9 + $0x18] sm:$0xff] }
 0x66d   :  { %4207 = vmatprep.mubr.msk.f32.mxu0 %vm976_vm2, %v5829_v4  ;;  %v2284_v4 = vld [vmem:[%s6822_s9 + $0xa0] sm:$0xff] }
 0x670   :  { %4208 = vmatmul.mubr.msk.f32.gmra.mrb[94].mxu0 %vm976_vm2, %v5838_v46  ;;  %v4480_v46 = vpack.c.bf16 %v2267_v35, %v2266_v3  ;;  %v4502_v3 = vpack.c.bf16 %v2295_v44, %v2294_v1  ;;  %v2279_v35 = vld [vmem:[%s6822_s9 + $0x78] sm:$0xff] }
 0x671   :  { %4210 = vmatprep.mubr.msk.f32.mxu0 %vm976_vm2, %v5843_v6  ;;  %v2285_v6 = vld [vmem:[%s6822_s9 + $0xa8] sm:$0xff] }
 0x672   :  { %v4482_v30 = vpack.c.bf16 %v2285_v6, %v2284_v4  ;;  %4481 = vmatpush3.bf16.msra.mxu1 %v4480_v46  ;;  %v4504_v4 = vpack.c.bf16 %v2279_v35, %v2278_v2 }
 0x674   :  { %4211 = vmatmul.mubr.msk.f32.gmra.mrb[96].mxu0 %vm976_vm2, %v5852_v45  ;;  %v2268_v45 = vld [vmem:[%s6822_s9 + $0x20] sm:$0xff]  ;;  %4483 = vmatprep.subr.bf16.mxu1 %v4482_v30 }
 0x675   :  { %4213 = vmatprep.mubr.msk.f32.mxu0 %vm976_vm2, %v6857_v42  ;;  %v4484_v5 = vpack.c.bf16 %v2269_v36, %v2268_v45 }
 0x677   :  { %4485 = vmatpush3.bf16.msra.mxu1 %v4484_v5 }
 0x678   :  { %4214 = vmatmul.mubr.msk.f32.gmra.mrb[98].mxu0 %vm976_vm2, %v6858_v33  ;;  %4487 = vmatprep.subr.bf16.mxu1 %v4486_v9 }
 0x679   :  { %4216 = vmatprep.mubr.msk.f32.mxu0 %vm976_vm2, %v6859_v59 }
 0x67b   :  { %4489 = vmatpush3.bf16.msra.mxu1 %v4488_v29  ;;  %v2297_v29 = vld [vmem:[%s6822_s9 + $0x108] sm:$0xff] }
 0x67c   :  { %4217 = vmatmul.mubr.msk.f32.gmra.mrb[100].mxu0 %vm976_vm2, %v6860_v41  ;;  %4491 = vmatprep.subr.bf16.mxu1 %v4490_v19  ;;  %v4506_v10 = vpack.c.bf16 %v2297_v29, %v2296_v58 }
 0x67d   :  { %4219 = vmatprep.mubr.msk.f32.mxu0 %vm976_vm2, %v6861_v60 }
 0x67f   :  { %4493 = vmatpush3.bf16.msra.mxu1 %v4492_v26 }
 0x680   :  { %4220 = vmatmul.mubr.msk.f32.gmra.mrb[102].mxu0 %vm976_vm2, %v6862_v61  ;;  %4495 = vmatprep.subr.bf16.mxu1 %v4494_v21 }
 0x681   :  { %4222 = vmatprep.mubr.msk.f32.mxu0 %vm976_vm2, %v6863_v54 }
 0x683   :  { %4497 = vmatpush3.bf16.msra.mxu1 %v4496_v37 }
 0x684   :  { %4223 = vmatmul.mubr.msk.f32.gmra.mrb[104].mxu0 %vm976_vm2, %v6864_v34  ;;  %4499 = vmatprep.subr.bf16.mxu1 %v4498_v52 }
 0x685   :  { %4225 = vmatprep.mubr.msk.f32.mxu0 %vm976_vm2, %v6865_v24 }
 0x687   :  { %4501 = vmatpush3.bf16.msra.mxu1 %v4500_v20 }
 0x688   :  { %4226 = vmatmul.mubr.msk.f32.gmra.mrb[106].mxu0 %vm976_vm2, %v6866_v56  ;;  %4503 = vmatprep.subr.bf16.mxu1 %v4502_v3 }
 0x68b   :  { %4505 = vmatpush3.bf16.msra.mxu1 %v4504_v4 }
 0x68c   :  { %4507 = vmatprep.subr.bf16.mxu1 %v4506_v10 }
 0x717   :  { %v6299_v14 = vpop.f32.mrb[72].mxu0 }
 0x718   :  { %v6301_v27 = vpop.f32.mrb[73].mxu0 }
 0x71b   :  { %v6303_v7 = vpop.f32.mrb[74].mxu0 }
 0x71c   :  { %v6305_v22 = vpop.f32.mrb[75].mxu0 }
 0x71f   :  { %v4182_v18 = vpop.f32.mrb[76].mxu0 }
 0x720   :  { %v1985_v28 = vpop.f32.mrb[77].mxu0 }
 0x723   :  { %v4185_v48 = vpop.f32.mrb[78].mxu0 }
 0x724   :  { %v1995_v39 = vpop.f32.mrb[79].mxu0 }
 0x727   :  { %v4188_v42 = vpop.f32.mrb[80].mxu0 }
 0x728   :  { %v2005_v33 = vpop.f32.mrb[81].mxu0 }
 0x72b   :  { %v4191_v59 = vpop.f32.mrb[82].mxu0 }
 0x72c   :  { %v2015_v41 = vpop.f32.mrb[83].mxu0 }
 0x72f   :  { %v4194_v60 = vpop.f32.mrb[84].mxu0 }
 0x730   :  { %v2025_v61 = vpop.f32.mrb[85].mxu0 }
 0x733   :  { %v4197_v54 = vpop.f32.mrb[86].mxu0 }
 0x734   :  { %v2035_v34 = vpop.f32.mrb[87].mxu0 }
 0x737   :  { %v6307_v24 = vpop.f32.mrb[88].mxu0 }
 0x738   :  { %v6309_v56 = vpop.f32.mrb[89].mxu0 }
 0x73b   :  { %v6311_v23 = vpop.f32.mrb[90].mxu0 }
 0x73c   :  { %v6313_v62 = vpop.f32.mrb[91].mxu0 }
 0x73f   :  { %v4206_v43 = vpop.f32.mrb[92].mxu0 }
 0x740   :  { %v4780_v63 = vpack.i.bf16 %v4182_v18, %v4206_v43  ;;  %v2065_v0 = vpop.f32.mrb[93].mxu0 }
 0x741   :  { %v4785_v55 = vpack.i.bf16 %v1985_v28, %v2065_v0 }
 0x742   :  { %4781 = vrot.lane.b32.xlu1 %v4780_v63, %s4961_s3 }
 0x743   :  { %4786 = vrot.lane.b32.xlu0 %v4785_v55, %s4961_s3  ;;  %v4209_v46 = vpop.f32.mrb[94].mxu0 }
 0x744   :  { %v4820_v6 = vpack.i.bf16 %v4185_v48, %v4209_v46  ;;  %v2075_v45 = vpop.f32.mrb[95].mxu0 }
 0x745   :  { %v4810_v36 = vpack.i.bf16 %v1995_v39, %v2075_v45 }
 0x747   :  { %v4212_v30 = vpop.f32.mrb[96].mxu0 }
 0x748   :  { %v4790_v57 = vpack.i.bf16 %v4188_v42, %v4212_v30  ;;  %v2085_v16 = vpop.f32.mrb[97].mxu0 }
 0x749   :  { %v4795_v5 = vpack.i.bf16 %v2005_v33, %v2085_v16 }
 0x74a   :  { %4791 = vrot.lane.b32.xlu0 %v4790_v57, %s4963_s28 }
 0x74b   :  { %4796 = vrot.lane.b32.xlu1 %v4795_v5, %s4963_s28  ;;  %v4215_v9 = vpop.f32.mrb[98].mxu0 }
 0x74c   :  { %v4830_v51 = vpack.i.bf16 %v4191_v59, %v4215_v9  ;;  %v2095_v53 = vpop.f32.mrb[99].mxu0 }
 0x74d   :  { %v4815_v17 = vpack.i.bf16 %v2015_v41, %v2095_v53  ;;  %v2298_v41 = vld [vmem:[%s6822_s9 + $0x110] sm:$0xff] }
 0x74f   :  { %v4218_v19 = vpop.f32.mrb[100].mxu0 }
 0x750   :  { %v4800_v8 = vpack.i.bf16 %v4194_v60, %v4218_v19  ;;  %v2105_v50 = vpop.f32.mrb[101].mxu0  ;;  %v2299_v60 = vld [vmem:[%s6822_s9 + $0x118] sm:$0xff] }
 0x751   :  { %v4805_v38 = vpack.i.bf16 %v2025_v61, %v2105_v50  ;;  %v4510_v3 = vpack.c.bf16 %v2299_v60, %v2298_v41 }
 0x752   :  { %4801 = vrot.lane.b32.xlu1 %v4800_v8, %s4965_s21 }
 0x753   :  { %4806 = vrot.lane.b32.xlu0 %v4805_v38, %s4965_s21  ;;  %v4221_v26 = vpop.f32.mrb[102].mxu0 }
 0x754   :  { %v4835_v21 = vpack.i.bf16 %v4197_v54, %v4221_v26  ;;  %v2115_v31 = vpop.f32.mrb[103].mxu0 }
 0x755   :  { %v4825_v32 = vpack.i.bf16 %v2035_v34, %v2115_v31 }
 0x756   :  { %4816 = vrot.lane.b32.xlu1 %v4815_v17, %s4963_s28 }
 0x757   :  { %4811 = vrot.lane.b32.xlu0 %v4810_v36, %s4961_s3  ;;  %v6341_v47 = vpop.f32.mrb[104].mxu0 }
 0x758   :  { %v6343_v15 = vpop.f32.mrb[105].mxu0 }
 0x75a   :  { %4821 = vrot.lane.b32.xlu1 %v4820_v6, %s4961_s3 }
 0x75b   :  { %4826 = vrot.lane.b32.xlu0 %v4825_v32, %s4965_s21  ;;  %v6347_v37 = vpop.f32.mrb[106].mxu0 }
 0x75c   :  { %v6349_v52 = vpop.f32.mrb[107].mxu0 }
 0x75e   :  { %4836 = vrot.lane.b32.xlu1 %v4835_v21, %s4965_s21 }
 0x75f   :  { %4831 = vrot.lane.b32.xlu0 %v4830_v51, %s4963_s28 }
 0x7b4   :  { %v4782_v11 = vpop.permute.xlu1 %4781 }
 0x7b5   :  { %v4787_v25 = vpop.permute.xlu0 %4786  ;;  %v4783_v33 = vunpack.i.l.bf16 %v4782_v11  ;;  %v4784_v44 = vunpack.i.h.bf16 %v4782_v11 }
 0x7b6   :  { %v4789_v18 = vunpack.i.h.bf16 %v4787_v25  ;;  %v4788_v48 = vunpack.i.l.bf16 %v4787_v25 }
 0x7b7   :  { %v2253_v6 = vsel %vm976_vm2, %v6307_v24, %v4783_v33  ;;  %v2241_v5 = vsel %vm976_vm2, %v6299_v14, %v4784_v44 }
 0x7b8   :  { %v2240_v61 = vsel %vm976_vm2, %v6301_v27, %v4789_v18  ;;  %v2252_v1 = vsel %vm976_vm2, %v6309_v56, %v4788_v48 }
 0x7bc   :  { %v4792_v28 = vpop.permute.xlu0 %4791 }
 0x7bd   :  { %v4797_v20 = vpop.permute.xlu1 %4796  ;;  %v4793_v54 = vunpack.i.l.bf16 %v4792_v28  ;;  %v4794_v35 = vunpack.i.h.bf16 %v4792_v28 }
 0x7be   :  { %v4799_v39 = vunpack.i.h.bf16 %v4797_v20  ;;  %v4798_v42 = vunpack.i.l.bf16 %v4797_v20 }
 0x7bf   :  { %v2257_v56 = vsel %vm88_vm0, %v2253_v6, %v4793_v54  ;;  %v2245_v51 = vsel %vm88_vm0, %v2241_v5, %v4794_v35 }
 0x7c0   :  { %v2244_v2 = vsel %vm88_vm0, %v2240_v61, %v4799_v39  ;;  %v2256_v55 = vsel %vm88_vm0, %v2252_v1, %v4798_v42 }
 0x7c4   :  { %v4802_v59 = vpop.permute.xlu1 %4801 }
 0x7c5   :  { %v4807_v34 = vpop.permute.xlu0 %4806  ;;  %v4803_v43 = vunpack.i.l.bf16 %v4802_v59  ;;  %v4804_v45 = vunpack.i.h.bf16 %v4802_v59 }
 0x7c6   :  { %v4809_v63 = vunpack.i.h.bf16 %v4807_v34  ;;  %v4808_v0 = vunpack.i.l.bf16 %v4807_v34 }
 0x7c7   :  { %v2261_v16 = vsel %vm995_vm5, %v2257_v56, %v4803_v43  ;;  %v2249_v19 = vsel %vm995_vm5, %v2245_v51, %v4804_v45  ;;  %v3435_v51 = vld [vmem:[%s6825_s12] ss:$0 sm:$0xff] }
 0x7c8   :  { %v4817_v4 = vpop.permute.xlu1 %4816  ;;  %v2260_v46 = vsel %vm995_vm5, %v2256_v55, %v4808_v0  ;;  %v2248_v27 = vsel %vm995_vm5, %v2244_v2, %v4809_v63  ;;  %v3430_v0 = vld [vmem:[%s6823_s10] ss:$0 sm:$0xff] }
 0x7c9   :  { %v4812_v36 = vpop.permute.xlu0 %4811  ;;  %2383 = vmatprep.mubr.f32.mxu1 %v2260_v46  ;;  %v4819_v17 = vunpack.i.h.bf16 %v4817_v4  ;;  %v4818_v58 = vunpack.i.l.bf16 %v4817_v4 }
 0x7ca   :  { %v4814_v30 = vunpack.i.h.bf16 %v4812_v36  ;;  %v4813_v57 = vunpack.i.l.bf16 %v4812_v36  ;;  %2384 = vmatmul.mubr.f32.vlgmr.msra.gmra.mrb[64].mxu1 %v2248_v27 }
 0x7cb   :  { %2388 = vmatprep.mubr.f32.mxu1 %v2261_v16  ;;  %4509 = vmatpush3.bf16.msra.mxu1 %v4506_v10 }
 0x7cc   :  { %v4822_v9 = vpop.permute.xlu1 %4821  ;;  %v2254_v24 = vsel %vm976_vm2, %v6313_v62, %v4813_v57  ;;  %v2242_v53 = vsel %vm976_vm2, %v6305_v22, %v4814_v30  ;;  %4511 = vmatprep.subr.bf16.mxu1 %v4510_v3 }
 0x7cd   :  { %v4827_v29 = vpop.permute.xlu0 %4826  ;;  %v4824_v14 = vunpack.i.h.bf16 %v4822_v9  ;;  %v4823_v10 = vunpack.i.l.bf16 %v4822_v9  ;;  %v2258_v38 = vsel %vm88_vm0, %v2254_v24, %v4818_v58  ;;  %v2246_v26 = vsel %vm88_vm0, %v2242_v53, %v4819_v17  ;;  %v4900_v9 = vld [vmem:[%s6819_s6] sm:$0xff] }
 0x7ce   :  { %v4829_v8 = vunpack.i.h.bf16 %v4827_v29  ;;  %v4828_v50 = vunpack.i.l.bf16 %v4827_v29  ;;  %2389 = vmatmul.mubr.f32.gmra.mrb[66].mxu1 %v2249_v19 }
 0x7cf   :  { %4513 = vmatpush3.bf16.msra.mxu1 %v4510_v3  ;;  %v2255_v18 = vsel %vm976_vm2, %v6311_v23, %v4823_v10  ;;  %v2243_v28 = vsel %vm976_vm2, %v6303_v7, %v4824_v14  ;;  %v2493_v7 = vld [vmem:[%s6824_s11] sm:$0xff]  ;;  %v2494_v23 = vld [vmem:[%s6824_s11 + $0x8] sm:$0xff] }
 0x7d0   :  { %v4837_v62 = vpop.permute.xlu1 %4836  ;;  %v2262_v21 = vsel %vm995_vm5, %v2258_v38, %v4828_v50  ;;  %v2250_v22 = vsel %vm995_vm5, %v2246_v26, %v4829_v8  ;;  %v4514_v59 = vpack.c.bf16 %v2494_v23, %v2493_v7  ;;  %v4913_v7 = vld [vmem:[%s6819_s6 + $0x68] sm:$0xff]  ;;  %v4914_v23 = vld [vmem:[%s6819_s6 + $0x70] sm:$0xff] }
 0x7d1   :  { %v4832_v31 = vpop.permute.xlu0 %4831  ;;  %2393 = vmatprep.mubr.f32.mxu1 %v2262_v21  ;;  %v4839_v25 = vunpack.i.h.bf16 %v4837_v62  ;;  %v4838_v20 = vunpack.i.l.bf16 %v4837_v62 }
 0x7d2   :  { %v4834_v32 = vunpack.i.h.bf16 %v4832_v31  ;;  %v4833_v11 = vunpack.i.l.bf16 %v4832_v31  ;;  %2394 = vmatmul.mubr.f32.gmra.mrb[68].mxu1 %v2250_v22  ;;  %4515 = vmatprep.subr.bf16.mxu1 %v4514_v59 }
 0x7d4   :  { %v2259_v48 = vsel %vm88_vm0, %v2255_v18, %v4833_v11  ;;  %v2247_v39 = vsel %vm88_vm0, %v2243_v28, %v4834_v32  ;;  %v4901_v32 = vld [vmem:[%s6819_s6 + $0x8] sm:$0xff]  ;;  %v4904_v11 = vld [vmem:[%s6819_s6 + $0x20] sm:$0xff]  ;;  %v4907_v18 = vld [vmem:[%s6819_s6 + $0x38] sm:$0xff] }
 0x7d5   :  { %v2263_v42 = vsel %vm995_vm5, %v2259_v48, %v4838_v20  ;;  %v2251_v33 = vsel %vm995_vm5, %v2247_v39, %v4839_v25  ;;  %v4905_v25 = vld [vmem:[%s6819_s6 + $0x28] sm:$0xff]  ;;  %v4906_v20 = vld [vmem:[%s6819_s6 + $0x30] sm:$0xff]  ;;  %v4908_v28 = vld [vmem:[%s6819_s6 + $0x40] sm:$0xff] }
 0x7d6   :  { %2398 = vmatprep.mubr.f32.mxu1 %v2263_v42  ;;  %v4909_v48 = vld [vmem:[%s6819_s6 + $0x48] sm:$0xff]  ;;  %v4910_v39 = vld [vmem:[%s6819_s6 + $0x50] sm:$0xff]  ;;  %v4911_v42 = vld [vmem:[%s6819_s6 + $0x58] sm:$0xff] }
 0x7d7   :  { %2399 = vmatmul.mubr.f32.gmra.mrb[70].mxu1 %v2251_v33  ;;  %v4912_v33 = vld [vmem:[%s6819_s6 + $0x60] sm:$0xff] }
 0x7d8   :  { %4236 = vmatprep.mubr.msk.f32.mxu1 %vm976_vm2, %v6343_v15 }
 0x7db   :  { %4237 = vmatmul.mubr.msk.f32.vlgmr.msra.gmra.mrb[72].mxu1 %vm976_vm2, %v6341_v47 }
 0x7dc   :  { %4239 = vmatprep.mubr.msk.f32.mxu1 %vm976_vm2, %v6349_v52  ;;  %4517 = vmatpush3.bf16.msra.mxu1 %v4514_v59  ;;  %v4915_v59 = vld [vmem:[%s6819_s6 + $0x78] sm:$0xff] }
 0x7df   :  { %4240 = vmatmul.mubr.msk.f32.gmra.mrb[74].mxu1 %vm976_vm2, %v6347_v37 }
 0x89d   :  { %v3798_v15 = vpop.f32.mrb[64].mxu1 }
 0x89e   :  { %v3799_v41 = vpop.f32.mrb[65].mxu1 }
 0x89f   :  { %v3800_v47 = vadd.f32 %v3799_v41, %v3798_v15  ;;  %v4916_v15 = vld [vmem:[%s6819_s6 + $0x80] sm:$0xff]  ;;  %v4917_v41 = vld [vmem:[%s6819_s6 + $0x88] sm:$0xff] }
 0x8a1   :  { %v3801_v60 = vpop.f32.mrb[66].mxu1  ;;  %v2386_v55 = vadd.f32 %v3800_v47, %v3430_v0  ;;  %v4918_v47 = vld [vmem:[%s6819_s6 + $0x90] sm:$0xff] }
 0x8a2   :  { %v3802_v61 = vpop.f32.mrb[67].mxu1 }
 0x8a3   :  { %v3803_v52 = vadd.f32 %v3802_v61, %v3801_v60  ;;  %v4919_v60 = vld [vmem:[%s6819_s6 + $0x98] sm:$0xff]  ;;  %v4920_v61 = vld [vmem:[%s6819_s6 + $0xa0] sm:$0xff] }
 0x8a5   :  { %v3804_v54 = vpop.f32.mrb[68].mxu1  ;;  %v2391_v44 = vadd.f32 %v3803_v52, %v3430_v0  ;;  %v4921_v52 = vld [vmem:[%s6819_s6 + $0xa8] sm:$0xff] }
 0x8a6   :  { %v3805_v34 = vpop.f32.mrb[69].mxu1 }
 0x8a7   :  { %v3806_v37 = vadd.f32 %v3805_v34, %v3804_v54  ;;  %v4922_v54 = vld [vmem:[%s6819_s6 + $0xb0] sm:$0xff]  ;;  %v4923_v34 = vld [vmem:[%s6819_s6 + $0xb8] sm:$0xff] }
 0x8a9   :  { %v2396_v45 = vadd.f32 %v3806_v37, %v3430_v0  ;;  %v4924_v37 = vld [vmem:[%s6819_s6 + $0xc0] sm:$0xff] }
 0x8aa   :  { %v3807_v43 = vpop.f32.mrb[70].mxu1 }
 0x8ab   :  { %v3808_v63 = vpop.f32.mrb[71].mxu1 }
 0x8ac   :  { %v3809_v1 = vadd.f32 %v3808_v63, %v3807_v43  ;;  %v4925_v43 = vld [vmem:[%s6819_s6 + $0xc8] sm:$0xff]  ;;  %v4926_v63 = vld [vmem:[%s6819_s6 + $0xd0] sm:$0xff] }
 0x8ae   :  { %v4238_v2 = vpop.f32.mrb[72].mxu1  ;;  %v2401_v46 = vadd.f32 %v3809_v1, %v3430_v0  ;;  %v4927_v0 = vld [vmem:[%s6819_s6 + $0xd8] sm:$0xff]  ;;  %v4928_v1 = vld [vmem:[%s6819_s6 + $0xe0] sm:$0xff] }
 0x8af   :  { %v2476_v3 = vadd.f32 %v4238_v2, %v2391_v44  ;;  %v2470_v35 = vpop.f32.mrb[73].mxu1  ;;  %v4929_v44 = vld [vmem:[%s6819_s6 + $0xe8] sm:$0xff]  ;;  %v4930_v2 = vld [vmem:[%s6819_s6 + $0xf0] sm:$0xff] }
 0x8b0   :  { %v2471_v4 = vadd.f32 %v2470_v35, %v2386_v55  ;;  %v4931_v55 = vld [vmem:[%s6819_s6 + $0xf8] sm:$0xff]  ;;  %v4933_v35 = vld [vmem:[%s6819_s6 + $0x108] sm:$0xff] }
 0x8b1   :  { %v2490_v36 = vmax.f32 %v2476_v3, 0.0  ;;  %v4932_v3 = vld [vmem:[%s6819_s6 + $0x100] sm:$0xff] }
 0x8b2   :  { %v2489_v27 = vmax.f32 %v2471_v4, 0.0  ;;  %v4241_v6 = vpop.f32.mrb[74].mxu1  ;;  %v4934_v4 = vld [vmem:[%s6819_s6 + $0x110] sm:$0xff] }
 0x8b3   :  { %v2486_v56 = vadd.f32 %v4241_v6, %v2401_v46  ;;  %v2480_v30 = vpop.f32.mrb[75].mxu1  ;;  %v4935_v46 = vld [vmem:[%s6819_s6 + $0x118] sm:$0xff]  ;;  %v2989_v6 = vld [vmem:[%s6826_s13 + $0x88] sm:$0xff] }
 0x8b4   :  { %v2481_v57 = vadd.f32 %v2480_v30, %v2396_v45  ;;  %4246 = vmatprep.mubr.msk.f32.mxu1 %vm971_vm1, %v2489_v27  ;;  %v2988_v27 = vld [vmem:[%s6826_s13 + $0x80] sm:$0xff]  ;;  %v2990_v30 = vld [vmem:[%s6826_s13 + $0x90] sm:$0xff] }
 0x8b5   :  { %4247 = vmatmul.mubr.msk.f32.vlgmr.msra.gmra.mrb[76].mxu1 %vm971_vm1, %v2490_v36  ;;  %v2492_v5 = vmax.f32 %v2486_v56, 0.0  ;;  %v2972_v45 = vld [vmem:[%s6826_s13] sm:$0xff]  ;;  %v4526_v36 = vpack.c.bf16 %v2989_v6, %v2988_v27  ;;  %v2973_v56 = vld [vmem:[%s6826_s13 + $0x8] sm:$0xff] }
 0x8b6   :  { %v2491_v16 = vmax.f32 %v2481_v57, 0.0  ;;  %v2991_v57 = vld [vmem:[%s6826_s13 + $0x98] sm:$0xff] }
 0x8b7   :  { %4527 = vmatprep.subr.bf16.mxu0 %v4526_v36  ;;  %v2985_v36 = vld [vmem:[%s6826_s13 + $0x68] sm:$0xff] }
 0x8b8   :  { %4249 = vmatprep.mubr.msk.f32.mxu1 %vm971_vm1, %v2491_v16  ;;  %v4528_v16 = vpack.c.bf16 %v2973_v56, %v2972_v45  ;;  %v2984_v45 = vld [vmem:[%s6826_s13 + $0x60] sm:$0xff] }
 0x8b9   :  { %4250 = vmatmul.mubr.msk.f32.gmra.mrb[78].mxu1 %vm971_vm1, %v2492_v5  ;;  %v4530_v5 = vpack.c.bf16 %v2991_v57, %v2990_v30  ;;  %v4552_v30 = vpack.c.bf16 %v2985_v36, %v2984_v45 }
 0x8ba   :  { %4260 = vmatprep.mubr.msk.f32.mxu1 %vm976_vm2, %v4900_v9  ;;  %v2974_v9 = vld [vmem:[%s6826_s13 + $0x10] sm:$0xff]  ;;  %4529 = vmatpush3.bf16.msra.mxu0 %v4528_v16 }
 0x8bb   :  { %4531 = vmatprep.subr.bf16.mxu0 %v4530_v5  ;;  %v3002_v16 = vld [vmem:[%s6826_s13 + $0xf0] sm:$0xff]  ;;  %v3003_v5 = vld [vmem:[%s6826_s13 + $0xf8] sm:$0xff] }
 0x988   :  { %v4248_v24 = vpop.f32.mrb[76].mxu1 }
 0x989   :  { %v2586_v53 = vadd.f32 %v4248_v24, %v3435_v51  ;;  %v2580_v17 = vpop.f32.mrb[77].mxu1  ;;  %v2992_v24 = vld [vmem:[%s6826_s13 + $0xa0] sm:$0xff] }
 0x98a   :  { %v2581_v58 = vadd.f32 %v3435_v51, %v2580_v17 }
 0x98b   :  { %v6420_v29 = vadd.f32 %v2586_v53, %v6133_v13  ;;  %v2993_v53 = vld [vmem:[%s6826_s13 + $0xa8] sm:$0xff] }
 0x98c   :  { %v6423_v19 = vadd.f32 %v2581_v58, %v6135_v12  ;;  %v4251_v8 = vpop.f32.mrb[78].mxu1  ;;  %v4534_v58 = vpack.c.bf16 %v2993_v53, %v2992_v24  ;;  %v4554_v24 = vpack.c.bf16 %v3003_v5, %v3002_v16  ;;  %v2986_v53 = vld [vmem:[%s6826_s13 + $0x70] sm:$0xff] }
 0x98d   :  { %v2604_v50 = vmax.f32 %v6420_v29, 0.0  ;;  %v2596_v14 = vadd.f32 %v4251_v8, %v3435_v51  ;;  %v2590_v10 = vpop.f32.mrb[79].mxu1  ;;  %v2976_v8 = vld [vmem:[%s6826_s13 + $0x20] sm:$0xff] }
 0x98e   :  { %v2603_v38 = vmax.f32 %v6423_v19, 0.0  ;;  %v2591_v26 = vadd.f32 %v3435_v51, %v2590_v10  ;;  %v2975_v51 = vld [vmem:[%s6826_s13 + $0x18] sm:$0xff] }
 0x98f   :  { %v6428_v62 = vadd.f32 %v2596_v14, %v6139_v49  ;;  %v4902_v49 = vld [vmem:[%s6819_s6 + $0x10] sm:$0xff]  ;;  %v4532_v17 = vpack.c.bf16 %v2975_v51, %v2974_v9  ;;  %v2995_v10 = vld [vmem:[%s6826_s13 + $0xb8] sm:$0xff] }
 0x990   :  { %v6431_v21 = vadd.f32 %v2591_v26, %v6141_v40  ;;  %v4518_v22 = vpack.c.bf16 %v2604_v50, %v2603_v38  ;;  %v4903_v40 = vld [vmem:[%s6819_s6 + $0x18] sm:$0xff]  ;;  %v2977_v50 = vld [vmem:[%s6826_s13 + $0x28] sm:$0xff]  ;;  %v2994_v14 = vld [vmem:[%s6826_s13 + $0xb0] sm:$0xff] }
 0x991   :  { %v2606_v13 = vmax.f32 %v6428_v62, 0.0  ;;  %4533 = vmatpush3.bf16.msra.mxu0 %v4532_v17  ;;  %v4536_v38 = vpack.c.bf16 %v2977_v50, %v2976_v8  ;;  %v4538_v26 = vpack.c.bf16 %v2995_v10, %v2994_v14  ;;  %v2987_v17 = vld [vmem:[%s6826_s13 + $0x78] sm:$0xff] }
 0x992   :  { %v2605_v12 = vmax.f32 %v6431_v21, 0.0  ;;  %4519 = vmatprep.subr.bf16.mxu1 %v4518_v22  ;;  %4535 = vmatprep.subr.bf16.mxu0 %v4534_v58  ;;  %v4556_v8 = vpack.c.bf16 %v2987_v17, %v2986_v53 }
 0x993   :  { %4521 = vmatpush3.bf16.msra.mxu1 %v4518_v22  ;;  %v2978_v22 = vld [vmem:[%s6826_s13 + $0x30] sm:$0xff] }
 0x994   :  { %v4522_v31 = vpack.c.bf16 %v2606_v13, %v2605_v12  ;;  %v2979_v13 = vld [vmem:[%s6826_s13 + $0x38] sm:$0xff]  ;;  %v2996_v12 = vld [vmem:[%s6826_s13 + $0xc0] sm:$0xff] }
 0x995   :  { %4537 = vmatpush3.bf16.msra.mxu0 %v4536_v38 }
 0x996   :  { %4523 = vmatprep.subr.bf16.mxu1 %v4522_v31  ;;  %4539 = vmatprep.subr.bf16.mxu0 %v4538_v26 }
 0x997   :  { %4525 = vmatpush3.bf16.msra.mxu1 %v4522_v31  ;;  %v2997_v31 = vld [vmem:[%s6826_s13 + $0xc8] sm:$0xff] }
 0x99a   :  { %4261 = vmatmul.mubr.msk.f32.vlgmr.msra.gmra.mrb[80].mxu1 %vm976_vm2, %v4901_v32  ;;  %v4540_v32 = vpack.c.bf16 %v2979_v13, %v2978_v22 }
 0x99b   :  { %4263 = vmatprep.mubr.msk.f32.mxu1 %vm976_vm2, %v4902_v49  ;;  %v4542_v49 = vpack.c.bf16 %v2997_v31, %v2996_v12  ;;  %v3004_v31 = vld [vmem:[%s6826_s13 + $0x100] sm:$0xff] }
 0x99c   :  { %4541 = vmatpush3.bf16.msra.mxu0 %v4540_v32  ;;  %v3005_v32 = vld [vmem:[%s6826_s13 + $0x108] sm:$0xff] }
 0x99d   :  { %4543 = vmatprep.subr.bf16.mxu0 %v4542_v49 }
 0x99e   :  { %4264 = vmatmul.mubr.msk.f32.gmra.mrb[82].mxu1 %vm976_vm2, %v4903_v40  ;;  %v2980_v40 = vld [vmem:[%s6826_s13 + $0x40] sm:$0xff] }
 0x99f   :  { %4266 = vmatprep.mubr.msk.f32.mxu1 %vm976_vm2, %v4904_v11  ;;  %v2981_v11 = vld [vmem:[%s6826_s13 + $0x48] sm:$0xff] }
 0x9a2   :  { %4267 = vmatmul.mubr.msk.f32.gmra.mrb[84].mxu1 %vm976_vm2, %v4905_v25  ;;  %v2998_v25 = vld [vmem:[%s6826_s13 + $0xd0] sm:$0xff] }
 0x9a3   :  { %4269 = vmatprep.mubr.msk.f32.mxu1 %vm976_vm2, %v4906_v20  ;;  %v2999_v20 = vld [vmem:[%s6826_s13 + $0xd8] sm:$0xff] }
 0x9a6   :  { %4270 = vmatmul.mubr.msk.f32.gmra.mrb[86].mxu1 %vm976_vm2, %v4907_v18  ;;  %v4544_v18 = vpack.c.bf16 %v2981_v11, %v2980_v40  ;;  %v4558_v40 = vpack.c.bf16 %v3005_v32, %v3004_v31 }
 0x9a7   :  { %4272 = vmatprep.mubr.msk.f32.mxu1 %vm976_vm2, %v4908_v28  ;;  %v4546_v28 = vpack.c.bf16 %v2999_v20, %v2998_v25 }
 0x9a8   :  { %4545 = vmatpush3.bf16.msra.mxu0 %v4544_v18 }
 0x9a9   :  { %4547 = vmatprep.subr.bf16.mxu0 %v4546_v28 }
 0x9aa   :  { %4273 = vmatmul.mubr.msk.f32.gmra.mrb[88].mxu1 %vm976_vm2, %v4909_v48 }
 0x9ab   :  { %4275 = vmatprep.mubr.msk.f32.mxu1 %vm976_vm2, %v4910_v39 }
 0x9ae   :  { %4276 = vmatmul.mubr.msk.f32.gmra.mrb[90].mxu1 %vm976_vm2, %v4911_v42 }
 0x9af   :  { %4278 = vmatprep.mubr.msk.f32.mxu1 %vm976_vm2, %v4912_v33 }
 0x9b2   :  { %4279 = vmatmul.mubr.msk.f32.gmra.mrb[92].mxu1 %vm976_vm2, %v4913_v7 }
 0x9b3   :  { %4281 = vmatprep.mubr.msk.f32.mxu1 %vm976_vm2, %v4914_v23 }
 0x9b6   :  { %4282 = vmatmul.mubr.msk.f32.gmra.mrb[94].mxu1 %vm976_vm2, %v4915_v59 }
 0x9b7   :  { %4284 = vmatprep.mubr.msk.f32.mxu1 %vm976_vm2, %v4916_v15 }
 0x9ba   :  { %4285 = vmatmul.mubr.msk.f32.gmra.mrb[96].mxu1 %vm976_vm2, %v4917_v41 }
 0x9bb   :  { %4287 = vmatprep.mubr.msk.f32.mxu1 %vm976_vm2, %v4918_v47 }
 0x9be   :  { %4288 = vmatmul.mubr.msk.f32.gmra.mrb[98].mxu1 %vm976_vm2, %v4919_v60 }
 0x9bf   :  { %4290 = vmatprep.mubr.msk.f32.mxu1 %vm976_vm2, %v4920_v61 }
 0x9c2   :  { %4291 = vmatmul.mubr.msk.f32.gmra.mrb[100].mxu1 %vm976_vm2, %v4921_v52 }
 0x9c3   :  { %4293 = vmatprep.mubr.msk.f32.mxu1 %vm976_vm2, %v4922_v54 }
 0x9c6   :  { %4294 = vmatmul.mubr.msk.f32.gmra.mrb[102].mxu1 %vm976_vm2, %v4923_v34 }
 0x9c7   :  { %4296 = vmatprep.mubr.msk.f32.mxu1 %vm976_vm2, %v4924_v37 }
 0x9ca   :  { %4297 = vmatmul.mubr.msk.f32.gmra.mrb[104].mxu1 %vm976_vm2, %v4925_v43  ;;  %v2982_v43 = vld [vmem:[%s6826_s13 + $0x50] sm:$0xff] }
 0x9cb   :  { %4299 = vmatprep.mubr.msk.f32.mxu1 %vm976_vm2, %v4926_v63  ;;  %v2983_v63 = vld [vmem:[%s6826_s13 + $0x58] sm:$0xff] }
 0x9ce   :  { %4300 = vmatmul.mubr.msk.f32.gmra.mrb[106].mxu1 %vm976_vm2, %v4927_v0  ;;  %v4548_v0 = vpack.c.bf16 %v2983_v63, %v2982_v43 }
 0x9cf   :  { %4302 = vmatprep.mubr.msk.f32.mxu1 %vm976_vm2, %v4928_v1 }
 0x9d0   :  { %4549 = vmatpush3.bf16.msra.mxu0 %v4548_v0 }
 0x9d2   :  { %4303 = vmatmul.mubr.msk.f32.gmra.mrb[108].mxu1 %vm976_vm2, %v4929_v44 }
 0x9d3   :  { %4305 = vmatprep.mubr.msk.f32.mxu1 %vm976_vm2, %v4930_v2 }
 0x9d6   :  { %4306 = vmatmul.mubr.msk.f32.gmra.mrb[110].mxu1 %vm976_vm2, %v4931_v55 }
 0x9d7   :  { %4308 = vmatprep.mubr.msk.f32.mxu1 %vm976_vm2, %v4932_v3  ;;  %v3000_v3 = vld [vmem:[%s6826_s13 + $0xe0] sm:$0xff] }
 0x9da   :  { %4309 = vmatmul.mubr.msk.f32.gmra.mrb[112].mxu1 %vm976_vm2, %v4933_v35  ;;  %v3001_v35 = vld [vmem:[%s6826_s13 + $0xe8] sm:$0xff] }
 0x9db   :  { %4311 = vmatprep.mubr.msk.f32.mxu1 %vm976_vm2, %v4934_v4  ;;  %v4550_v4 = vpack.c.bf16 %v3001_v35, %v3000_v3  ;;  %v3006_v35 = vld [vmem:[%s6826_s13 + $0x110] sm:$0xff] }
 0x9dd   :  { %4551 = vmatprep.subr.bf16.mxu0 %v4550_v4  ;;  %v3007_v4 = vld [vmem:[%s6826_s13 + $0x118] sm:$0xff] }
 0x9de   :  { %4312 = vmatmul.mubr.msk.f32.gmra.mrb[114].mxu1 %vm976_vm2, %v4935_v46  ;;  %4553 = vmatpush3.bf16.msra.mxu0 %v4552_v30 }
 0x9df   :  { %4555 = vmatprep.subr.bf16.mxu0 %v4554_v24 }
 0x9e2   :  { %4557 = vmatpush3.bf16.msra.mxu0 %v4556_v8 }
 0x9e3   :  { %4559 = vmatprep.subr.bf16.mxu0 %v4558_v40 }
 0xa6d   :  { %v6641_v48 = vpop.f32.mrb[80].mxu1 }
 0xa6e   :  { %v6643_v39 = vpop.f32.mrb[81].mxu1 }
 0xa71   :  { %v6645_v42 = vpop.f32.mrb[82].mxu1 }
 0xa72   :  { %v6647_v33 = vpop.f32.mrb[83].mxu1 }
 0xa75   :  { %v4268_v7 = vpop.f32.mrb[84].mxu1 }
 0xa76   :  { %v2693_v23 = vpop.f32.mrb[85].mxu1 }
 0xa79   :  { %v6649_v59 = vpop.f32.mrb[86].mxu1 }
 0xa7a   :  { %v6651_v15 = vpop.f32.mrb[87].mxu1 }
 0xa7d   :  { %v4274_v41 = vpop.f32.mrb[88].mxu1 }
 0xa7e   :  { %v2713_v47 = vpop.f32.mrb[89].mxu1 }
 0xa81   :  { %v6653_v60 = vpop.f32.mrb[90].mxu1 }
 0xa82   :  { %v6655_v61 = vpop.f32.mrb[91].mxu1 }
 0xa85   :  { %v4280_v52 = vpop.f32.mrb[92].mxu1 }
 0xa86   :  { %v2733_v54 = vpop.f32.mrb[93].mxu1 }
 0xa89   :  { %v6657_v34 = vpop.f32.mrb[94].mxu1 }
 0xa8a   :  { %v6659_v37 = vpop.f32.mrb[95].mxu1 }
 0xa8d   :  { %v6667_v1 = vpop.f32.mrb[96].mxu1 }
 0xa8e   :  { %v6669_v44 = vpop.f32.mrb[97].mxu1 }
 0xa91   :  { %v6671_v2 = vpop.f32.mrb[98].mxu1 }
 0xa92   :  { %v6673_v55 = vpop.f32.mrb[99].mxu1 }
 0xa95   :  { %v4292_v46 = vpop.f32.mrb[100].mxu1 }
 0xa96   :  { %v4840_v27 = vpack.i.bf16 %v4268_v7, %v4292_v46  ;;  %v2773_v6 = vpop.f32.mrb[101].mxu1 }
 0xa97   :  { %v4845_v56 = vpack.i.bf16 %v2693_v23, %v2773_v6 }
 0xa98   :  { %4841 = vrot.lane.b32.xlu1 %v4840_v27, %s4961_s3 }
 0xa99   :  { %4846 = vrot.lane.b32.xlu0 %v4845_v56, %s4961_s3  ;;  %v4295_v57 = vpop.f32.mrb[102].mxu1 }
 0xa9a   :  { %v4880_v9 = vpack.i.bf16 %v6649_v59, %v4295_v57  ;;  %v2783_v51 = vpop.f32.mrb[103].mxu1 }
 0xa9b   :  { %v4870_v58 = vpack.i.bf16 %v6651_v15, %v2783_v51 }
 0xa9d   :  { %v4298_v50 = vpop.f32.mrb[104].mxu1 }
 0xa9e   :  { %v4850_v14 = vpack.i.bf16 %v4274_v41, %v4298_v50  ;;  %v2793_v10 = vpop.f32.mrb[105].mxu1 }
 0xa9f   :  { %v4855_v38 = vpack.i.bf16 %v2713_v47, %v2793_v10 }
 0xaa0   :  { %4851 = vrot.lane.b32.xlu0 %v4850_v14, %s4963_s28 }
 0xaa1   :  { %4856 = vrot.lane.b32.xlu1 %v4855_v38, %s4963_s28  ;;  %v4301_v26 = vpop.f32.mrb[106].mxu1 }
 0xaa2   :  { %v4890_v22 = vpack.i.bf16 %v6653_v60, %v4301_v26  ;;  %v2803_v13 = vpop.f32.mrb[107].mxu1 }
 0xaa3   :  { %v4875_v12 = vpack.i.bf16 %v6655_v61, %v2803_v13 }
 0xaa5   :  { %v4304_v49 = vpop.f32.mrb[108].mxu1 }
 0xaa6   :  { %v4860_v11 = vpack.i.bf16 %v4280_v52, %v4304_v49  ;;  %v2813_v25 = vpop.f32.mrb[109].mxu1 }
 0xaa7   :  { %v4865_v20 = vpack.i.bf16 %v2733_v54, %v2813_v25 }
 0xaa8   :  { %4861 = vrot.lane.b32.xlu1 %v4860_v11, %s4965_s21 }
 0xaa9   :  { %4866 = vrot.lane.b32.xlu0 %v4865_v20, %s4965_s21  ;;  %v4307_v18 = vpop.f32.mrb[110].mxu1 }
 0xaaa   :  { %v4895_v28 = vpack.i.bf16 %v6657_v34, %v4307_v18  ;;  %v2823_v7 = vpop.f32.mrb[111].mxu1 }
 0xaab   :  { %v4885_v23 = vpack.i.bf16 %v6659_v37, %v2823_v7 }
 0xaac   :  { %4876 = vrot.lane.b32.xlu1 %v4875_v12, %s4963_s28 }
 0xaad   :  { %4871 = vrot.lane.b32.xlu0 %v4870_v58, %s4961_s3  ;;  %v6719_v59 = vpop.f32.mrb[112].mxu1 }
 0xaae   :  { %v6721_v15 = vpop.f32.mrb[113].mxu1 }
 0xab0   :  { %4881 = vrot.lane.b32.xlu1 %v4880_v9, %s4961_s3  ;;  %v4562_v9 = vpack.c.bf16 %v3007_v4, %v3006_v35 }
 0xab1   :  { %4886 = vrot.lane.b32.xlu0 %v4885_v23, %s4965_s21  ;;  %v6725_v41 = vpop.f32.mrb[114].mxu1 }
 0xab2   :  { %v6727_v47 = vpop.f32.mrb[115].mxu1 }
 0xab4   :  { %4896 = vrot.lane.b32.xlu1 %v4895_v28, %s4965_s21 }
 0xab5   :  { %4891 = vrot.lane.b32.xlu0 %v4890_v22, %s4963_s28 }
 0xb0a   :  { %v4842_v60 = vpop.permute.xlu1 %4841 }
 0xb0b   :  { %v4847_v61 = vpop.permute.xlu0 %4846  ;;  %v4843_v0 = vunpack.i.l.bf16 %v4842_v60  ;;  %v4844_v57 = vunpack.i.h.bf16 %v4842_v60 }
 0xb0c   :  { %v4849_v54 = vunpack.i.h.bf16 %v4847_v61  ;;  %v4848_v37 = vunpack.i.l.bf16 %v4847_v61 }
 0xb0d   :  { %v2961_v17 = vsel %vm976_vm2, %v6667_v1, %v4843_v0  ;;  %v2949_v38 = vsel %vm976_vm2, %v6641_v48, %v4844_v57 }
 0xb0e   :  { %v2948_v46 = vsel %vm976_vm2, %v6643_v39, %v4849_v54  ;;  %v2960_v30 = vsel %vm976_vm2, %v6669_v44, %v4848_v37 }
 0xb12   :  { %v4852_v34 = vpop.permute.xlu0 %4851 }
 0xb13   :  { %v4857_v52 = vpop.permute.xlu1 %4856  ;;  %v4853_v27 = vunpack.i.l.bf16 %v4852_v34  ;;  %v4854_v51 = vunpack.i.h.bf16 %v4852_v34 }
 0xb14   :  { %v4859_v43 = vunpack.i.h.bf16 %v4857_v52  ;;  %v4858_v63 = vunpack.i.l.bf16 %v4857_v52 }
 0xb15   :  { %v2965_v44 = vsel %vm88_vm0, %v2961_v17, %v4853_v27  ;;  %v2953_v22 = vsel %vm88_vm0, %v2949_v38, %v4854_v51 }
 0xb16   :  { %v2952_v16 = vsel %vm88_vm0, %v2948_v46, %v4859_v43  ;;  %v2964_v5 = vsel %vm88_vm0, %v2960_v30, %v4858_v63 }
 0xb1a   :  { %v4862_v3 = vpop.permute.xlu1 %4861 }
 0xb1b   :  { %v4867_v6 = vpop.permute.xlu0 %4866  ;;  %v4863_v45 = vunpack.i.l.bf16 %v4862_v3  ;;  %v4864_v58 = vunpack.i.h.bf16 %v4862_v3 }
 0xb1c   :  { %v4869_v36 = vunpack.i.h.bf16 %v4867_v6  ;;  %v4868_v56 = vunpack.i.l.bf16 %v4867_v6 }
 0xb1d   :  { %v2969_v10 = vsel %vm995_vm5, %v2965_v44, %v4863_v45  ;;  %v2957_v49 = vsel %vm995_vm5, %v2953_v22, %v4864_v58 }
 0xb1e   :  { %v4877_v24 = vpop.permute.xlu1 %4876  ;;  %v2968_v53 = vsel %vm995_vm5, %v2964_v5, %v4868_v56  ;;  %v2956_v39 = vsel %vm995_vm5, %v2952_v16, %v4869_v36  ;;  %v3476_v56 = vld [vmem:[%s6827_s14] ss:$0 sm:$0xff] }
 0xb1f   :  { %v4872_v8 = vpop.permute.xlu0 %4871  ;;  %3091 = vmatprep.mubr.f32.mxu0 %v2968_v53  ;;  %v4879_v12 = vunpack.i.h.bf16 %v4877_v24  ;;  %v4878_v31 = vunpack.i.l.bf16 %v4877_v24 }
 0xb20   :  { %v4874_v50 = vunpack.i.h.bf16 %v4872_v8  ;;  %v4873_v14 = vunpack.i.l.bf16 %v4872_v8  ;;  %3092 = vmatmul.mubr.f32.vlgmr.msra.gmra.mrb[108].mxu0 %v2956_v39 }
 0xb21   :  { %3096 = vmatprep.mubr.f32.mxu0 %v2969_v10  ;;  %4561 = vmatpush3.bf16.msra.mxu0 %v4558_v40 }
 0xb22   :  { %v4882_v26 = vpop.permute.xlu1 %4881  ;;  %v2962_v1 = vsel %vm976_vm2, %v6673_v55, %v4873_v14  ;;  %v2950_v13 = vsel %vm976_vm2, %v6647_v33, %v4874_v50  ;;  %4563 = vmatprep.subr.bf16.mxu0 %v4562_v9 }
 0xb23   :  { %v4887_v32 = vpop.permute.xlu0 %4886  ;;  %v4884_v48 = vunpack.i.h.bf16 %v4882_v26  ;;  %v4883_v40 = vunpack.i.l.bf16 %v4882_v26  ;;  %v2966_v20 = vsel %vm88_vm0, %v2962_v1, %v4878_v31  ;;  %v2954_v18 = vsel %vm88_vm0, %v2950_v13, %v4879_v12  ;;  %v3481_v26 = vld [vmem:[%s6829_s16] ss:$0 sm:$0xff]  ;;  %s4936_s16 = scalar_lea.vmem %s3325_s7, 512 }
 0xb24   :  { %v4889_v11 = vunpack.i.h.bf16 %v4887_v32  ;;  %v4888_v25 = vunpack.i.l.bf16 %v4887_v32  ;;  %3097 = vmatmul.mubr.f32.gmra.mrb[110].mxu0 %v2957_v49  ;;  %p4937_p0 = scmp.ne.s32.totalorder %s3325_s7, %s4936_s16  ;;  %p4942_p2 = scmp.lt.s32.totalorder %s4936_s16, %s4936_s16 }
 0xb25   :  { %4565 = vmatpush3.bf16.msra.mxu0 %v4562_v9  ;;  %v2963_v54 = vsel %vm976_vm2, %v6671_v2, %v4883_v40  ;;  %v2951_v34 = vsel %vm976_vm2, %v6645_v42, %v4884_v48  ;;  %v3201_v42 = vld [vmem:[%s6828_s15] sm:$0xff]  ;;  %v3202_v2 = vld [vmem:[%s6828_s15 + $0x8] sm:$0xff] }
 0xb26   :  { %v4897_v55 = vpop.permute.xlu1 %4896  ;;  %v2970_v28 = vsel %vm995_vm5, %v2966_v20, %v4888_v25  ;;  %v2958_v33 = vsel %vm995_vm5, %v2954_v18, %v4889_v11  ;;  %v4566_v3 = vpack.c.bf16 %v3202_v2, %v3201_v42  ;;  %p4943_p3 = por %p4942_p2, %p4941_p1 }
 0xb27   :  { %v4892_v7 = vpop.permute.xlu0 %4891  ;;  %3101 = vmatprep.mubr.f32.mxu0 %v2970_v28  ;;  %v4899_v61 = vunpack.i.h.bf16 %v4897_v55  ;;  %v4898_v52 = vunpack.i.l.bf16 %v4897_v55 }
 0xb28   :  { %v4894_v23 = vunpack.i.h.bf16 %v4892_v7  ;;  %v4893_v60 = vunpack.i.l.bf16 %v4892_v7  ;;  %3102 = vmatmul.mubr.f32.gmra.mrb[112].mxu0 %v2958_v33  ;;  %4567 = vmatprep.subr.bf16.mxu0 %v4566_v3  ;;  %p4944_p4 = pnand %p4943_p3, %p4937_p0 }
 0xb2a   :  { %v2967_v37 = vsel %vm88_vm0, %v2963_v54, %v4893_v60  ;;  %v2955_v43 = vsel %vm88_vm0, %v2951_v34, %v4894_v23 }
 0xb2b   :  { %v2971_v63 = vsel %vm995_vm5, %v2967_v37, %v4898_v52  ;;  %v2959_v0 = vsel %vm995_vm5, %v2955_v43, %v4899_v61 }
 0xb2c   :  { %3106 = vmatprep.mubr.f32.mxu0 %v2971_v63 }
 0xb2d   :  { %3107 = vmatmul.mubr.f32.gmra.mrb[114].mxu0 %v2959_v0 }
 0xb2e   :  { %4322 = vmatprep.mubr.msk.f32.mxu0 %vm976_vm2, %v6721_v15 }
 0xb31   :  { %4323 = vmatmul.mubr.msk.f32.vlgmr.msra.gmra.mrb[116].mxu0 %vm976_vm2, %v6719_v59 }
 0xb32   :  { %4325 = vmatprep.mubr.msk.f32.mxu0 %vm976_vm2, %v6727_v47  ;;  %4569 = vmatpush3.bf16.msra.mxu0 %v4566_v3 }
 0xb35   :  { %4326 = vmatmul.mubr.msk.f32.gmra.mrb[118].mxu0 %vm976_vm2, %v6725_v41 }
 0xbf3   :  { %v3896_v15 = vpop.f32.mrb[108].mxu0 }
 0xbf4   :  { %v3897_v35 = vpop.f32.mrb[109].mxu0 }
 0xbf5   :  { %v3898_v59 = vadd.f32 %v3897_v35, %v3896_v15 }
 0xbf7   :  { %v3899_v4 = vpop.f32.mrb[110].mxu0  ;;  %v3094_v5 = vadd.f32 %v3898_v59, %v3476_v56 }
 0xbf8   :  { %v3900_v46 = vpop.f32.mrb[111].mxu0 }
 0xbf9   :  { %v3901_v47 = vadd.f32 %v3900_v46, %v3899_v4 }
 0xbfb   :  { %v3902_v27 = vpop.f32.mrb[112].mxu0  ;;  %v3099_v57 = vadd.f32 %v3901_v47, %v3476_v56 }
 0xbfc   :  { %v3903_v6 = vpop.f32.mrb[113].mxu0 }
 0xbfd   :  { %v3904_v41 = vadd.f32 %v3903_v6, %v3902_v27 }
 0xbff   :  { %v3104_v58 = vadd.f32 %v3904_v41, %v3476_v56 }
 0xc00   :  { %v3905_v45 = vpop.f32.mrb[114].mxu0 }
 0xc01   :  { %v3906_v36 = vpop.f32.mrb[115].mxu0 }
 0xc02   :  { %v3907_v30 = vadd.f32 %v3906_v36, %v3905_v45 }
 0xc04   :  { %v4324_v16 = vpop.f32.mrb[116].mxu0  ;;  %v3109_v53 = vadd.f32 %v3907_v30, %v3476_v56 }
 0xc05   :  { %v3184_v9 = vadd.f32 %v4324_v16, %v3099_v57  ;;  %v3178_v51 = vpop.f32.mrb[117].mxu0 }
 0xc06   :  { %v3179_v24 = vadd.f32 %v3178_v51, %v3094_v5 }
 0xc07   :  { %v3198_v8 = vmax.f32 %v3184_v9, 0.0 }
 0xc08   :  { %v3197_v39 = vmax.f32 %v3179_v24, 0.0  ;;  %v4327_v17 = vpop.f32.mrb[118].mxu0 }
 0xc09   :  { %v3194_v44 = vadd.f32 %v4327_v17, %v3109_v53  ;;  %v3188_v50 = vpop.f32.mrb[119].mxu0 }
 0xc0a   :  { %v3189_v14 = vadd.f32 %v3188_v50, %v3104_v58  ;;  %4332 = vmatprep.mubr.msk.f32.mxu0 %vm971_vm1, %v3197_v39 }
 0xc0b   :  { %4333 = vmatmul.mubr.msk.f32.vlgmr.msra.gmra.mrb[120].mxu0 %vm971_vm1, %v3198_v8  ;;  %v3200_v38 = vmax.f32 %v3194_v44, 0.0 }
 0xc0c   :  { %v3199_v10 = vmax.f32 %v3189_v14, 0.0 }
 0xc0e   :  { %4335 = vmatprep.mubr.msk.f32.mxu0 %vm971_vm1, %v3199_v10 }
 0xc0f   :  { %4336 = vmatmul.mubr.msk.f32.gmra.mrb[122].mxu0 %vm971_vm1, %v3200_v38 }
 0xcde   :  { %v4334_v22 = vpop.f32.mrb[120].mxu0 }
 0xcdf   :  { %v3294_v1 = vadd.f32 %v4334_v22, %v3481_v26  ;;  %v3288_v13 = vpop.f32.mrb[121].mxu0 }
 0xce0   :  { %v3289_v12 = vadd.f32 %v3481_v26, %v3288_v13 }
 0xce1   :  { %v3308_v31 = vadd.f32 %v3294_v1, %v6420_v29 }
 0xce2   :  { %v3307_v32 = vadd.f32 %v3289_v12, %v6423_v19  ;;  %v4337_v49 = vpop.f32.mrb[122].mxu0 }
 0xce3   :  { %v3312_v11 = vmax.f32 %v3308_v31, 0.0  ;;  %v3304_v25 = vadd.f32 %v4337_v49, %v3481_v26  ;;  %v3298_v48 = vpop.f32.mrb[123].mxu0 }
 0xce4   :  { %v3311_v40 = vmax.f32 %v3307_v32, 0.0  ;;  %v3299_v20 = vadd.f32 %v3481_v26, %v3298_v48 }
 0xce5   :  { %3316 = vst.msk [vmem:[#allocation2 + $0x8] sm:$0xff] %vm976_vm2, %v3312_v11  ;;  %v3310_v18 = vadd.f32 %v3304_v25, %v6428_v62 }
 0xce6   :  { %3315 = vst.msk [vmem:[#allocation2] sm:$0xff] %vm976_vm2, %v3311_v40  ;;  %v3309_v55 = vadd.f32 %v3299_v20, %v6431_v21 }
 0xce7   :  { %v3314_v28 = vmax.f32 %v3310_v18, 0.0 }
 0xce8   :  { %v3313_v29 = vmax.f32 %v3309_v55, 0.0 }
 0xce9   :  { %3318 = vst.msk [vmem:[#allocation2 + $0x18] sm:$0xff] %vm976_vm2, %v3314_v28 }
 0xcea   :  { %3317 = vst.msk [vmem:[#allocation2 + $0x10] sm:$0xff] %vm976_vm2, %v3313_v29 }
 0xceb   :  { %4947 = shalt.err (!%p4944_p4)
}
 0xcec   :  { %s4948_s9 = scalar_lea.hbm %s6830_s17, 512 }
 0xced   :  { %p4949_p5 = scmp.ne.s32.totalorder %s6830_s17, %s4948_s9  ;;  %p4952_p6 = scmp.lt.u32.totalorder %s4948_s9, %s6830_s17 }
 0xcef   :  { %p4954_p7 = pnand %p4952_p6, %p4949_p5 }
 0xcf1   :  { %4957 = shalt.err (!%p4954_p7)
}
 0xcf2   :  { %s4968_s0 = smov 128   ;;  %s4969_s10 = smov 8  }
 0xcf3   :  { %3330 = dma.vmem_to_hbm [thread:$0]  %s3325_s7, 512, %s6830_s17, [#allocation3], %s4968_s0, %s4968_s0, %s4969_s10  }
 0xcf4   :  { %4958 = dma.done.wait [#allocation3], 512  }
 0xcf5   :  { %4959 = vsyncadd [#allocation3], 4294966784 }
 0xcf6   :  { %3334 = vsyncpa [#allocation3], 1 }

</bundles_post_ra>
